<compile_context>
chip_gen: v6e
topology: v6e:2x2x1
jax: 0.10.0
libtpu: 0.0.40
codegen_flags: <defaults>
</compile_context>

<pallas_src>
import functools

import jax
import jax.numpy as jnp
from jax import lax
from jax.experimental import pallas as pl
from jax.experimental.pallas import tpu as pltpu


_VMEM_LIMIT = 64 * 1024 * 1024  # explicit scoped-VMEM cap (don't rely on 32MiB default)


# ----------------------------- plain-JAX glue ------------------------------------

def extract_patches(x, kernel=3, stride=1):
    """JAX port of the torch helper: NCHW -> [B, nH*nW, C, k, k] (same ordering)."""
    if kernel != 1:
        x = jnp.pad(x, ((0, 0), (0, 0), (1, 1), (1, 1)))
    B, C, H, W = x.shape
    nH = (H - kernel) // stride + 1
    nW = (W - kernel) // stride + 1
    rows = []
    for kh in range(kernel):
        cols = []
        for kw in range(kernel):
            cols.append(x[:, :, kh:kh + (nH - 1) * stride + 1:stride,
                                kw:kw + (nW - 1) * stride + 1:stride])
        rows.append(jnp.stack(cols, axis=-1))
    p = jnp.stack(rows, axis=-2)                 # [B, C, nH, nW, kh, kw]
    p = jnp.transpose(p, (0, 2, 3, 1, 4, 5))     # [B, nH, nW, C, kh, kw]
    return p.reshape(B, nH * nW, C, kernel, kernel)


def resize_bilinear_align_corners(x, out_h, out_w):
    """F.interpolate(mode='bilinear', align_corners=True) for NCHW."""
    B, C, H, W = x.shape

    def coords(out_n, in_n):
        if out_n == 1:
            return jnp.zeros((out_n,), jnp.float32)
        return jnp.arange(out_n, dtype=jnp.float32) * (in_n - 1) / (out_n - 1)

    ys, xs = coords(out_h, H), coords(out_w, W)
    y0 = jnp.clip(jnp.floor(ys).astype(jnp.int32), 0, H - 1)
    y1 = jnp.clip(y0 + 1, 0, H - 1)
    x0 = jnp.clip(jnp.floor(xs).astype(jnp.int32), 0, W - 1)
    x1_ = jnp.clip(x0 + 1, 0, W - 1)
    wy = (ys - y0.astype(jnp.float32))[None, None, :, None]
    wx = (xs - x0.astype(jnp.float32))[None, None, None, :]

    def g(yi, xi):
        return x[:, :, yi, :][:, :, :, xi]

    top = g(y0, x0) * (1.0 - wx) + g(y0, x1_) * wx
    bot = g(y1, x0) * (1.0 - wx) + g(y1, x1_) * wx
    return top * (1.0 - wy) + bot * wy


def _pick_tile(L, target=256):
    """Largest multiple-of-8 divisor of L that is <= target (else the full L)."""
    if L <= target:
        return L
    best = None
    for cand in range(8, target + 1, 8):
        if L % cand == 0:
            best = cand
    return best if best is not None else L


# ----------------------------- Pallas kernels ------------------------------------

def _atn_kernel(q_ref, c_ref, craw_ref, mm_ref, r_ref, *, scale):
    """Position-tiled contextual attention.

    q_ref:    (TM, D2)  bf16  x2 patches for this position tile
    c_ref:    (L,  D2)  bf16  all candidate x2 patches (resident across tiles)
    craw_ref: (L,  D1)  bf16  all raw x1 patches (resident across tiles)
    mm_ref:   (1,  L)   f32   candidate validity (mask == 0 everywhere in patch)
    r_ref:    (TM, D1)  f32   attention-weighted reconstruction patches
    """
    # wi_normed = wi / max(||wi||_2, 1e-4), with the softmax scale folded in so the
    # (TM, L) score tile needs only a single VALU multiply afterwards.
    c = c_ref[...].astype(jnp.float32)
    sumsq = jnp.sum(c * c, axis=-1, keepdims=True)
    inv = lax.rsqrt(jnp.maximum(sumsq, 1e-8))        # == 1 / max(sqrt(sumsq), 1e-4)
    cn = (c * (inv * scale)).astype(jnp.bfloat16)

    # scores[pos, cand] * scale  (bf16 MXU, f32 accumulation)
    s = lax.dot_general(q_ref[...], cn, (((1,), (1,)), ((), ())),
                        preferred_element_type=jnp.float32)
    mm = mm_ref[...]                                 # (1, L): broadcast over positions
    s = s * mm                                       # == score * mm * scale (torch order)

    # softmax over candidates (masked ones contribute exp(-max), matching torch)
    s = s - jnp.max(s, axis=-1, keepdims=True)
    e = jnp.exp(s)
    a = e * pl.reciprocal(jnp.sum(e, axis=-1, keepdims=True), approx=True)
    a = jnp.maximum(a * mm, 1e-8)                    # * mi ; clamp(min=1e-8)

    # reconstruction patches = A @ raw_patches (bf16 MXU, f32 accumulation)
    r_ref[...] = jnp.dot(a.astype(jnp.bfloat16), craw_ref[...],
                         preferred_element_type=jnp.float32).astype(r_ref.dtype)


def _fuse_kernel(y_ref, w_ref, b_ref, o_ref, x_ref, *, offsets, tap_rows, span):
    """Grouped dilated 3x3 convs + bias + ReLU; one batch element per grid step.

    y_ref: (C1, Npad)     bf16  y padded by max dilation, spatial dims flattened
    w_ref: (G, Cg, 9*C1)  bf16  per-group weights, contraction ordered (tap, cin)
    b_ref: (G, Cg, 1)     f32
    o_ref: (G, Cg, span)  f32   span = Hy * padded_width (junk cols cropped outside)
    x_ref: (9*C1, span)   bf16  VMEM scratch holding the 9 shifted taps
    """
    for g, offs in enumerate(offsets):               # static unroll (offsets are ints)
        for t, off in enumerate(offs):
            x_ref[t * tap_rows:(t + 1) * tap_rows, :] = y_ref[:, off:off + span]
        # single lane-dense matmul: (Cg, 9*C1) @ (9*C1, span)
        acc = jnp.dot(w_ref[g], x_ref[...], preferred_element_type=jnp.float32)
        o_ref[g] = jnp.maximum(acc + b_ref[g], 0.0).astype(o_ref.dtype)


# ----------------------------- forward wrapper -----------------------------------

def atn_conv_forward(x1, x2, mask, params, *, ksize=3, stride=1, rate=2,
                     softmax_scale=10.0, groups=4, rates=(1, 2, 4, 8), fuse=True):
    B, C1, H1, W1 = x1.shape
    _, C2, H2, W2 = x2.shape
    K = 2 * rate

    # ---- patch extraction (data movement, glue) ----
    raw_w = extract_patches(x1, kernel=K, stride=rate * stride)   # [B, L, C1, K, K]
    w = extract_patches(x2, kernel=ksize, stride=stride)          # [B, L, C2, k, k]
    L = w.shape[1]
    assert raw_w.shape[1] == L, "patch counts of x1/x2 must match"
    D2 = C2 * ksize * ksize
    D1 = C1 * K * K
    P = w.reshape(B, L, D2).astype(jnp.bfloat16)       # bf16 MXU operands
    Praw = raw_w.reshape(B, L, D1).astype(jnp.bfloat16)

    # ---- mask -> per-candidate validity mm (glue) ----
    if mask is None:
        mm = jnp.ones((B, L), jnp.float32)
    else:
        mask_r = resize_bilinear_align_corners(mask.astype(jnp.float32), H2, W2)
        mp = extract_patches(mask_r, kernel=ksize, stride=stride)  # [B, L, 1, k, k]
        mmean = jnp.mean(mp, axis=(2, 3, 4))
        mm = (mmean == 0.0).astype(jnp.float32)
    mm3 = mm.reshape(B, 1, L)

    # ---- Pallas kernel 1: position-tiled attention ----
    TM = _pick_tile(L)
    R = pl.pallas_call(
        functools.partial(_atn_kernel, scale=softmax_scale),
        out_shape=jax.ShapeDtypeStruct((B, L, D1), jnp.float32),
        grid=(B, L // TM),
        in_specs=[
            pl.BlockSpec((None, TM, D2), lambda b, i: (b, i, 0)),   # query tile
            pl.BlockSpec((None, L, D2), lambda b, i: (b, 0, 0)),    # candidates (resident)
            pl.BlockSpec((None, L, D1), lambda b, i: (b, 0, 0)),    # raw patches (resident)
            pl.BlockSpec((None, 1, L), lambda b, i: (b, 0, 0)),
        ],
        out_specs=pl.BlockSpec((None, TM, D1), lambda b, i: (b, i, 0)),
        compiler_params=pltpu.CompilerParams(
            dimension_semantics=("parallel", "parallel"),
            vmem_limit_bytes=_VMEM_LIMIT),
    )(P, P, Praw, mm3)

    # ---- fold (== conv_transpose2d(stride=rate, padding=1) / 4) via phase overlap-add
    # K == 2*rate, so every output pixel receives exactly nD*nD = 4 contributions:
    # 4 dense shifted adds replace the K*K strided scatter-adds.
    nH, nW = H2 // stride, W2 // stride
    nD = K // rate                                    # == 2
    R8 = R.reshape(B, nH, nW, C1, nD, rate, nD, rate)
    Qh, Qw = nH + nD - 1, nW + nD - 1
    acc = None
    for dh in range(nD):
        for dw in range(nD):
            t = R8[:, :, :, :, dh, :, dw, :]          # (B, nH, nW, C1, rate, rate)
            t = jnp.pad(t, ((0, 0), (dh, nD - 1 - dh), (dw, nD - 1 - dw),
                            (0, 0), (0, 0), (0, 0)))
            acc = t if acc is None else acc + t       # (B, Qh, Qw, C1, rate, rate)
    out_pad = jnp.transpose(acc, (0, 3, 1, 4, 2, 5)).reshape(B, C1, Qh * rate, Qw * rate)
    Hp, Wp = (nH - 1) * rate + K, (nW - 1) * rate + K
    # NOTE: the crop + /4.0 hard-code padding=1, stride=rate, rate=2 (as in torch).
    y = out_pad[:, :, 1:Hp - 1, 1:Wp - 1] / 4.0       # (B, C1, rate*nH, rate*nW)

    if not fuse:
        return y

    # ---- Pallas kernel 2: grouped dilated convs, taps built in-kernel ----
    Hy, Wy = y.shape[2], y.shape[3]
    dmax = max(rates[:groups])
    Wf = Wy + 2 * dmax
    # Pad once by the max dilation (+1 bottom row so flat tap slices never run off the
    # end); group g simply reads at offsets shifted by (dmax - d_g).
    y_pad = jnp.pad(y, ((0, 0), (0, 0), (dmax, dmax + 1), (dmax, dmax)))
    y_flat = y_pad.reshape(B, C1, -1).astype(jnp.bfloat16)        # (B, C1, Npad)
    Npad = y_flat.shape[-1]
    span = Hy * Wf      # conv computed on the full padded width; junk cols cropped below

    offsets = tuple(
        tuple((dmax - d + kh * d) * Wf + (dmax - d + kw * d)
              for kh in range(3) for kw in range(3))
        for d in rates[:groups])

    wf = params["fuse_w"]                             # (G, Cg, C1, 3, 3)  PyTorch layout
    bf = params["fuse_b"]                             # (G, Cg)
    Cg = wf.shape[1]
    # contraction axis ordered (tap, cin) to match the scratch layout in the kernel
    w_mat = jnp.transpose(wf, (0, 1, 3, 4, 2)).reshape(groups, Cg, 9 * C1).astype(jnp.bfloat16)
    b_mat = bf.reshape(groups, Cg, 1).astype(jnp.float32)

    # TODO(synk): for very large feature maps add an HW-tile grid axis (needs halo
    # handling around the dilated taps); at these sizes the per-batch block fits VMEM.
    out = pl.pallas_call(
        functools.partial(_fuse_kernel, offsets=offsets, tap_rows=C1, span=span),
        out_shape=jax.ShapeDtypeStruct((B, groups, Cg, span), jnp.float32),
        grid=(B,),
        in_specs=[
            pl.BlockSpec((None, C1, Npad), lambda b: (b, 0, 0)),
            pl.BlockSpec((groups, Cg, 9 * C1), lambda b: (0, 0, 0)),
            pl.BlockSpec((groups, Cg, 1), lambda b: (0, 0, 0)),
        ],
        out_specs=pl.BlockSpec((None, groups, Cg, span), lambda b: (b, 0, 0, 0)),
        scratch_shapes=[pltpu.VMEM((9 * C1, span), jnp.bfloat16)],
        compiler_params=pltpu.CompilerParams(
            dimension_semantics=("parallel",),
            vmem_limit_bytes=_VMEM_LIMIT),
    )(y_flat, w_mat, b_mat)

    # crop the padded-width junk columns; channels-first layout comes out directly
    out = out.reshape(B, groups, Cg, Hy, Wf)[..., :Wy]
    return out.reshape(B, groups * Cg, Hy, Wy)


# ----------------------------- parameter init ------------------------------------

def init_params(key, input_channels, output_channels, groups):
    """Deterministic init matching PyTorch Conv2d defaults (U(-1/sqrt(fan_in), +))."""
    Cg = output_channels // groups
    fan_in = input_channels * 3 * 3
    bound = 1.0 / (fan_in ** 0.5)
    kw, kb = jax.random.split(key)
    w = jax.random.uniform(kw, (groups, Cg, input_channels, 3, 3), jnp.float32,
                           -bound, bound)
    b = jax.random.uniform(kb, (groups, Cg), jnp.float32, -bound, bound)
    return {"fuse_w": w, "fuse_b": b}


# ----------------------------------- main -----------------------------------------

if __name__ == "__main__":
    key = jax.random.PRNGKey(0)
    k1, k2, kp = jax.random.split(key, 3)

    B = 2
    input_channels, output_channels, groups = 16, 16, 4
    C1, H1, W1 = input_channels, 16, 16        # x1: low-level, larger resolution
    C2, H2, W2 = 8, 8, 8                       # x2: high-level, smaller resolution

    x1 = jax.random.normal(k1, (B, C1, H1, W1), jnp.float32)
    x2 = jax.random.normal(k2, (B, C2, H2, W2), jnp.float32)
    # binary hole mask at x1 resolution (1 = hole), downsampled bilinearly inside forward
    mask = jnp.zeros((B, 1, H1, W1), jnp.float32).at[:, :, 4:10, 4:10].set(1.0)

    params = init_params(kp, input_channels, output_channels, groups)

    fwd = jax.jit(functools.partial(atn_conv_forward, ksize=3, stride=1, rate=2,
                                    softmax_scale=10.0, groups=groups,
                                    rates=(1, 2, 4, 8), fuse=True))
    out = fwd(x1, x2, mask, params)
    out = jax.block_until_ready(out)

    assert out.shape == (B, output_channels, H1, W1), out.shape
    assert bool(jnp.all(jnp.isfinite(out)))
    print("KERNEL_OK")
</pallas_src>

<mosaic_0001>
module attributes {stable_mosaic.version = 11 : i64} {
  func.func @_atn_kernel(%arg0: i32, %arg1: i32, %arg2: memref<1x64x72xbf16, #tpu.memory_space<vmem>>, %arg3: memref<1x64x72xbf16, #tpu.memory_space<vmem>>, %arg4: memref<1x64x256xbf16, #tpu.memory_space<vmem>>, %arg5: memref<1x1x64xf32, #tpu.memory_space<vmem>>, %arg6: memref<1x64x256xf32, #tpu.memory_space<vmem>>) attributes {dimension_semantics = [#tpu.dimension_semantics<parallel>, #tpu.dimension_semantics<parallel>], iteration_bounds = array<i64: 2, 1>, scalar_prefetch = 0 : i64, scratch_operands = 0 : i64, tpu.core_type = #tpu.core_type<tc>, window_params = [{transform_indices = @transform_0, window_bounds = array<i64: 1, 64, 72>}, {transform_indices = @transform_1, window_bounds = array<i64: 1, 64, 72>}, {transform_indices = @transform_2, window_bounds = array<i64: 1, 64, 256>}, {transform_indices = @transform_3, window_bounds = array<i64: 1, 1, 64>}, {transform_indices = @transform_4, window_bounds = array<i64: 1, 64, 256>}]} {
    %c0 = arith.constant 0 : index
    %c0_0 = arith.constant 0 : index
    %c0_1 = arith.constant 0 : index
    %0 = vector.load %arg3[%c0, %c0_0, %c0_1] : memref<1x64x72xbf16, #tpu.memory_space<vmem>>, vector<1x64x72xbf16>
    %1 = vector.shape_cast %0 : vector<1x64x72xbf16> to vector<64x72xbf16>
    %2 = arith.extf %1 : vector<64x72xbf16> to vector<64x72xf32>
    %3 = arith.mulf %2, %2 : vector<64x72xf32>
    %cst = arith.constant dense<0.000000e+00> : vector<64xf32>
    %4 = vector.multi_reduction <add>, %3, %cst [1] : vector<64x72xf32> to vector<64xf32>
    %5 = vector.shape_cast %4 : vector<64xf32> to vector<64x1xf32>
    %cst_2 = arith.constant 9.99999993E-9 : f32
    %6 = vector.broadcast %cst_2 : f32 to vector<64x1xf32>
    %7 = arith.maximumf %5, %6 : vector<64x1xf32>
    %8 = math.rsqrt %7 : vector<64x1xf32>
    %cst_3 = arith.constant 1.000000e+01 : f32
    %9 = vector.broadcast %cst_3 : f32 to vector<64x1xf32>
    %10 = arith.mulf %8, %9 : vector<64x1xf32>
    %11 = vector.broadcast %10 : vector<64x1xf32> to vector<64x72xf32>
    %12 = arith.mulf %2, %11 : vector<64x72xf32>
    %13 = arith.truncf %12 : vector<64x72xf32> to vector<64x72xbf16>
    %c0_4 = arith.constant 0 : index
    %c0_5 = arith.constant 0 : index
    %c0_6 = arith.constant 0 : index
    %14 = vector.load %arg2[%c0_4, %c0_5, %c0_6] : memref<1x64x72xbf16, #tpu.memory_space<vmem>>, vector<1x64x72xbf16>
    %15 = vector.shape_cast %14 : vector<1x64x72xbf16> to vector<64x72xbf16>
    %cst_7 = arith.constant dense<0.000000e+00> : vector<64x64xf32>
    %16 = tpu.matmul %15, %13, %cst_7 {dimension_numbers = #tpu.dot_dimension_numbers<[1], [1], [0], [0], [0, 0, 1, 0], [], []>} : vector<64x72xbf16>, vector<64x72xbf16>, vector<64x64xf32> -> vector<64x64xf32>
    %c0_8 = arith.constant 0 : index
    %c0_9 = arith.constant 0 : index
    %c0_10 = arith.constant 0 : index
    %17 = vector.load %arg5[%c0_8, %c0_9, %c0_10] : memref<1x1x64xf32, #tpu.memory_space<vmem>>, vector<1x1x64xf32>
    %18 = vector.shape_cast %17 : vector<1x1x64xf32> to vector<1x64xf32>
    %19 = vector.broadcast %18 : vector<1x64xf32> to vector<64x64xf32>
    %20 = arith.mulf %16, %19 : vector<64x64xf32>
    %cst_11 = arith.constant dense<0xFF800000> : vector<64xf32>
    %21 = vector.multi_reduction <maximumf>, %20, %cst_11 [1] : vector<64x64xf32> to vector<64xf32>
    %22 = vector.shape_cast %21 : vector<64xf32> to vector<64x1xf32>
    %23 = vector.broadcast %22 : vector<64x1xf32> to vector<64x64xf32>
    %24 = arith.subf %20, %23 : vector<64x64xf32>
    %25 = math.exp %24 : vector<64x64xf32>
    %cst_12 = arith.constant dense<0.000000e+00> : vector<64xf32>
    %26 = vector.multi_reduction <add>, %25, %cst_12 [1] : vector<64x64xf32> to vector<64xf32>
    %27 = vector.shape_cast %26 : vector<64xf32> to vector<64x1xf32>
    %28 = tpu.reciprocal %27 {approx = true} : vector<64x1xf32> -> vector<64x1xf32>
    %29 = vector.broadcast %28 : vector<64x1xf32> to vector<64x64xf32>
    %30 = arith.mulf %25, %29 : vector<64x64xf32>
    %31 = vector.broadcast %18 : vector<1x64xf32> to vector<64x64xf32>
    %32 = arith.mulf %30, %31 : vector<64x64xf32>
    %cst_13 = arith.constant 9.99999993E-9 : f32
    %33 = vector.broadcast %cst_13 : f32 to vector<64x64xf32>
    %34 = arith.maximumf %32, %33 : vector<64x64xf32>
    %35 = arith.truncf %34 : vector<64x64xf32> to vector<64x64xbf16>
    %c0_14 = arith.constant 0 : index
    %c0_15 = arith.constant 0 : index
    %c0_16 = arith.constant 0 : index
    %36 = vector.load %arg4[%c0_14, %c0_15, %c0_16] : memref<1x64x256xbf16, #tpu.memory_space<vmem>>, vector<1x64x256xbf16>
    %37 = vector.shape_cast %36 : vector<1x64x256xbf16> to vector<64x256xbf16>
    %cst_17 = arith.constant dense<0.000000e+00> : vector<64x256xf32>
    %38 = tpu.matmul %35, %37, %cst_17 {dimension_numbers = #tpu.dot_dimension_numbers<[1], [0], [0], [1], [0, 0, 1, 1], [], []>} : vector<64x64xbf16>, vector<64x256xbf16>, vector<64x256xf32> -> vector<64x256xf32>
    %c0_18 = arith.constant 0 : index
    %c0_19 = arith.constant 0 : index
    %c0_20 = arith.constant 0 : index
    %39 = vector.load %arg6[%c0_18, %c0_19, %c0_20] : memref<1x64x256xf32, #tpu.memory_space<vmem>>, vector<1x64x256xf32>
    %40 = vector.shape_cast %39 : vector<1x64x256xf32> to vector<64x256xf32>
    %41 = vector.shape_cast %38 : vector<64x256xf32> to vector<1x64x256xf32>
    tpu.vector_store %arg6[%c0_18, %c0_19, %c0_20], %41 {strides = array<i32>} : memref<1x64x256xf32, #tpu.memory_space<vmem>>, vector<1x64x256xf32>,
    return
  }
  func.func @transform_0(%arg0: i32, %arg1: i32) -> (i32, i32, i32) {
    %c0_i32 = arith.constant 0 : i32
    %c0_i32_0 = arith.constant 0 : i32
    return %arg0, %arg1, %c0_i32 : i32, i32, i32
  }
  func.func @transform_1(%arg0: i32, %arg1: i32) -> (i32, i32, i32) {
    %c0_i32 = arith.constant 0 : i32
    %c0_i32_0 = arith.constant 0 : i32
    %c0_i32_1 = arith.constant 0 : i32
    return %arg0, %c0_i32, %c0_i32_0 : i32, i32, i32
  }
  func.func @transform_2(%arg0: i32, %arg1: i32) -> (i32, i32, i32) {
    %c0_i32 = arith.constant 0 : i32
    %c0_i32_0 = arith.constant 0 : i32
    %c0_i32_1 = arith.constant 0 : i32
    return %arg0, %c0_i32, %c0_i32_0 : i32, i32, i32
  }
  func.func @transform_3(%arg0: i32, %arg1: i32) -> (i32, i32, i32) {
    %c0_i32 = arith.constant 0 : i32
    %c0_i32_0 = arith.constant 0 : i32
    %c0_i32_1 = arith.constant 0 : i32
    return %arg0, %c0_i32, %c0_i32_0 : i32, i32, i32
  }
  func.func @transform_4(%arg0: i32, %arg1: i32) -> (i32, i32, i32) {
    %c0_i32 = arith.constant 0 : i32
    %c0_i32_0 = arith.constant 0 : i32
    return %arg0, %arg1, %c0_i32 : i32, i32, i32
  }
}

module attributes {stable_mosaic.version = 11 : i64} {
  func.func @_fuse_kernel(%arg0: i32, %arg1: memref<1x16x1056xbf16, #tpu.memory_space<vmem>>, %arg2: memref<4x4x144xbf16, #tpu.memory_space<vmem>>, %arg3: memref<4x4x1xf32, #tpu.memory_space<vmem>>, %arg4: memref<1x4x4x512xf32, #tpu.memory_space<vmem>>, %arg5: memref<144x512xbf16, #tpu.memory_space<vmem>>) attributes {dimension_semantics = [#tpu.dimension_semantics<parallel>], iteration_bounds = array<i64: 2>, scalar_prefetch = 0 : i64, scratch_operands = 1 : i64, tpu.core_type = #tpu.core_type<tc>, window_params = [{transform_indices = @transform_0, window_bounds = array<i64: 1, 16, 1056>}, {pipeline_mode = #tpu.pipeline_mode<synchronous>, transform_indices = @transform_1, window_bounds = array<i64: 4, 4, 144>}, {pipeline_mode = #tpu.pipeline_mode<synchronous>, transform_indices = @transform_2, window_bounds = array<i64: 4, 4, 1>}, {transform_indices = @transform_3, window_bounds = array<i64: 1, 4, 4, 512>}]} {
    %c0 = arith.constant 0 : index
    %c0_0 = arith.constant 0 : index
    %c231 = arith.constant 231 : index
    %0 = vector.load %arg1[%c0, %c0_0, %c231] : memref<1x16x1056xbf16, #tpu.memory_space<vmem>>, vector<1x16x512xbf16>
    %1 = vector.shape_cast %0 : vector<1x16x512xbf16> to vector<16x512xbf16>
    %c0_1 = arith.constant 0 : index
    %c0_2 = arith.constant 0 : index
    %2 = vector.load %arg5[%c0_1, %c0_2] : memref<144x512xbf16, #tpu.memory_space<vmem>>, vector<16x512xbf16>
    tpu.vector_store %arg5[%c0_1, %c0_2], %1 {strides = array<i32>} : memref<144x512xbf16, #tpu.memory_space<vmem>>, vector<16x512xbf16>,
    %c0_3 = arith.constant 0 : index
    %c0_4 = arith.constant 0 : index
    %c232 = arith.constant 232 : index
    %3 = vector.load %arg1[%c0_3, %c0_4, %c232] : memref<1x16x1056xbf16, #tpu.memory_space<vmem>>, vector<1x16x512xbf16>
    %4 = vector.shape_cast %3 : vector<1x16x512xbf16> to vector<16x512xbf16>
    %c16 = arith.constant 16 : index
    %c0_5 = arith.constant 0 : index
    %5 = vector.load %arg5[%c16, %c0_5] : memref<144x512xbf16, #tpu.memory_space<vmem>>, vector<16x512xbf16>
    tpu.vector_store %arg5[%c16, %c0_5], %4 {strides = array<i32>} : memref<144x512xbf16, #tpu.memory_space<vmem>>, vector<16x512xbf16>,
    %c0_6 = arith.constant 0 : index
    %c0_7 = arith.constant 0 : index
    %c233 = arith.constant 233 : index
    %6 = vector.load %arg1[%c0_6, %c0_7, %c233] : memref<1x16x1056xbf16, #tpu.memory_space<vmem>>, vector<1x16x512xbf16>
    %7 = vector.shape_cast %6 : vector<1x16x512xbf16> to vector<16x512xbf16>
    %c32 = arith.constant 32 : index
    %c0_8 = arith.constant 0 : index
    %8 = vector.load %arg5[%c32, %c0_8] : memref<144x512xbf16, #tpu.memory_space<vmem>>, vector<16x512xbf16>
    tpu.vector_store %arg5[%c32, %c0_8], %7 {strides = array<i32>} : memref<144x512xbf16, #tpu.memory_space<vmem>>, vector<16x512xbf16>,
    %c0_9 = arith.constant 0 : index
    %c0_10 = arith.constant 0 : index
    %c263 = arith.constant 263 : index
    %9 = vector.load %arg1[%c0_9, %c0_10, %c263] : memref<1x16x1056xbf16, #tpu.memory_space<vmem>>, vector<1x16x512xbf16>
    %10 = vector.shape_cast %9 : vector<1x16x512xbf16> to vector<16x512xbf16>
    %c48 = arith.constant 48 : index
    %c0_11 = arith.constant 0 : index
    %11 = vector.load %arg5[%c48, %c0_11] : memref<144x512xbf16, #tpu.memory_space<vmem>>, vector<16x512xbf16>
    tpu.vector_store %arg5[%c48, %c0_11], %10 {strides = array<i32>} : memref<144x512xbf16, #tpu.memory_space<vmem>>, vector<16x512xbf16>,
    %c0_12 = arith.constant 0 : index
    %c0_13 = arith.constant 0 : index
    %c264 = arith.constant 264 : index
    %12 = vector.load %arg1[%c0_12, %c0_13, %c264] : memref<1x16x1056xbf16, #tpu.memory_space<vmem>>, vector<1x16x512xbf16>
    %13 = vector.shape_cast %12 : vector<1x16x512xbf16> to vector<16x512xbf16>
    %c64 = arith.constant 64 : index
    %c0_14 = arith.constant 0 : index
    %14 = vector.load %arg5[%c64, %c0_14] : memref<144x512xbf16, #tpu.memory_space<vmem>>, vector<16x512xbf16>
    tpu.vector_store %arg5[%c64, %c0_14], %13 {strides = array<i32>} : memref<144x512xbf16, #tpu.memory_space<vmem>>, vector<16x512xbf16>,
    %c0_15 = arith.constant 0 : index
    %c0_16 = arith.constant 0 : index
    %c265 = arith.constant 265 : index
    %15 = vector.load %arg1[%c0_15, %c0_16, %c265] : memref<1x16x1056xbf16, #tpu.memory_space<vmem>>, vector<1x16x512xbf16>
    %16 = vector.shape_cast %15 : vector<1x16x512xbf16> to vector<16x512xbf16>
    %c80 = arith.constant 80 : index
    %c0_17 = arith.constant 0 : index
    %17 = vector.load %arg5[%c80, %c0_17] : memref<144x512xbf16, #tpu.memory_space<vmem>>, vector<16x512xbf16>
    tpu.vector_store %arg5[%c80, %c0_17], %16 {strides = array<i32>} : memref<144x512xbf16, #tpu.memory_space<vmem>>, vector<16x512xbf16>,
    %c0_18 = arith.constant 0 : index
    %c0_19 = arith.constant 0 : index
    %c295 = arith.constant 295 : index
    %18 = vector.load %arg1[%c0_18, %c0_19, %c295] : memref<1x16x1056xbf16, #tpu.memory_space<vmem>>, vector<1x16x512xbf16>
    %19 = vector.shape_cast %18 : vector<1x16x512xbf16> to vector<16x512xbf16>
    %c96 = arith.constant 96 : index
    %c0_20 = arith.constant 0 : index
    %20 = vector.load %arg5[%c96, %c0_20] : memref<144x512xbf16, #tpu.memory_space<vmem>>, vector<16x512xbf16>
    tpu.vector_store %arg5[%c96, %c0_20], %19 {strides = array<i32>} : memref<144x512xbf16, #tpu.memory_space<vmem>>, vector<16x512xbf16>,
    %c0_21 = arith.constant 0 : index
    %c0_22 = arith.constant 0 : index
    %c296 = arith.constant 296 : index
    %21 = vector.load %arg1[%c0_21, %c0_22, %c296] : memref<1x16x1056xbf16, #tpu.memory_space<vmem>>, vector<1x16x512xbf16>
    %22 = vector.shape_cast %21 : vector<1x16x512xbf16> to vector<16x512xbf16>
    %c112 = arith.constant 112 : index
    %c0_23 = arith.constant 0 : index
    %23 = vector.load %arg5[%c112, %c0_23] : memref<144x512xbf16, #tpu.memory_space<vmem>>, vector<16x512xbf16>
    tpu.vector_store %arg5[%c112, %c0_23], %22 {strides = array<i32>} : memref<144x512xbf16, #tpu.memory_space<vmem>>, vector<16x512xbf16>,
    %c0_24 = arith.constant 0 : index
    %c0_25 = arith.constant 0 : index
    %c297 = arith.constant 297 : index
    %24 = vector.load %arg1[%c0_24, %c0_25, %c297] : memref<1x16x1056xbf16, #tpu.memory_space<vmem>>, vector<1x16x512xbf16>
    %25 = vector.shape_cast %24 : vector<1x16x512xbf16> to vector<16x512xbf16>
    %c128 = arith.constant 128 : index
    %c0_26 = arith.constant 0 : index
    %26 = vector.load %arg5[%c128, %c0_26] : memref<144x512xbf16, #tpu.memory_space<vmem>>, vector<16x512xbf16>
    tpu.vector_store %arg5[%c128, %c0_26], %25 {strides = array<i32>} : memref<144x512xbf16, #tpu.memory_space<vmem>>, vector<16x512xbf16>,
    %c0_27 = arith.constant 0 : index
    %c0_28 = arith.constant 0 : index
    %c0_29 = arith.constant 0 : index
    %27 = vector.load %arg2[%c0_27, %c0_28, %c0_29] : memref<4x4x144xbf16, #tpu.memory_space<vmem>>, vector<1x4x144xbf16>
    %28 = vector.shape_cast %27 : vector<1x4x144xbf16> to vector<4x144xbf16>
    %c0_30 = arith.constant 0 : index
    %c0_31 = arith.constant 0 : index
    %29 = vector.load %arg5[%c0_30, %c0_31] : memref<144x512xbf16, #tpu.memory_space<vmem>>, vector<144x512xbf16>
    %cst = arith.constant dense<0.000000e+00> : vector<4x512xf32>
    %30 = tpu.matmul %28, %29, %cst {dimension_numbers = #tpu.dot_dimension_numbers<[1], [0], [0], [1], [0, 0, 1, 1], [], []>} : vector<4x144xbf16>, vector<144x512xbf16>, vector<4x512xf32> -> vector<4x512xf32>
    %c0_32 = arith.constant 0 : index
    %c0_33 = arith.constant 0 : index
    %c0_34 = arith.constant 0 : index
    %31 = vector.load %arg3[%c0_32, %c0_33, %c0_34] : memref<4x4x1xf32, #tpu.memory_space<vmem>>, vector<1x4x1xf32>
    %32 = vector.shape_cast %31 : vector<1x4x1xf32> to vector<4x1xf32>
    %33 = vector.broadcast %32 : vector<4x1xf32> to vector<4x512xf32>
    %34 = arith.addf %30, %33 : vector<4x512xf32>
    %cst_35 = arith.constant 0.000000e+00 : f32
    %35 = vector.broadcast %cst_35 : f32 to vector<4x512xf32>
    %36 = arith.maximumf %34, %35 : vector<4x512xf32>
    %c0_36 = arith.constant 0 : index
    %c0_37 = arith.constant 0 : index
    %c0_38 = arith.constant 0 : index
    %c0_39 = arith.constant 0 : index
    %37 = vector.load %arg4[%c0_36, %c0_37, %c0_38, %c0_39] : memref<1x4x4x512xf32, #tpu.memory_space<vmem>>, vector<1x1x4x512xf32>
    %38 = vector.shape_cast %37 : vector<1x1x4x512xf32> to vector<4x512xf32>
    %39 = vector.shape_cast %36 : vector<4x512xf32> to vector<1x1x4x512xf32>
    tpu.vector_store %arg4[%c0_36, %c0_37, %c0_38, %c0_39], %39 {strides = array<i32>} : memref<1x4x4x512xf32, #tpu.memory_space<vmem>>, vector<1x1x4x512xf32>,
    %c0_40 = arith.constant 0 : index
    %c0_41 = arith.constant 0 : index
    %c198 = arith.constant 198 : index
    %40 = vector.load %arg1[%c0_40, %c0_41, %c198] : memref<1x16x1056xbf16, #tpu.memory_space<vmem>>, vector<1x16x512xbf16>
    %41 = vector.shape_cast %40 : vector<1x16x512xbf16> to vector<16x512xbf16>
    %c0_42 = arith.constant 0 : index
    %c0_43 = arith.constant 0 : index
    %42 = vector.load %arg5[%c0_42, %c0_43] : memref<144x512xbf16, #tpu.memory_space<vmem>>, vector<16x512xbf16>
    tpu.vector_store %arg5[%c0_42, %c0_43], %41 {strides = array<i32>} : memref<144x512xbf16, #tpu.memory_space<vmem>>, vector<16x512xbf16>,
    %c0_44 = arith.constant 0 : index
    %c0_45 = arith.constant 0 : index
    %c200 = arith.constant 200 : index
    %43 = vector.load %arg1[%c0_44, %c0_45, %c200] : memref<1x16x1056xbf16, #tpu.memory_space<vmem>>, vector<1x16x512xbf16>
    %44 = vector.shape_cast %43 : vector<1x16x512xbf16> to vector<16x512xbf16>
    %c16_46 = arith.constant 16 : index
    %c0_47 = arith.constant 0 : index
    %45 = vector.load %arg5[%c16_46, %c0_47] : memref<144x512xbf16, #tpu.memory_space<vmem>>, vector<16x512xbf16>
    tpu.vector_store %arg5[%c16_46, %c0_47], %44 {strides = array<i32>} : memref<144x512xbf16, #tpu.memory_space<vmem>>, vector<16x512xbf16>,
    %c0_48 = arith.constant 0 : index
    %c0_49 = arith.constant 0 : index
    %c202 = arith.constant 202 : index
    %46 = vector.load %arg1[%c0_48, %c0_49, %c202] : memref<1x16x1056xbf16, #tpu.memory_space<vmem>>, vector<1x16x512xbf16>
    %47 = vector.shape_cast %46 : vector<1x16x512xbf16> to vector<16x512xbf16>
    %c32_50 = arith.constant 32 : index
    %c0_51 = arith.constant 0 : index
    %48 = vector.load %arg5[%c32_50, %c0_51] : memref<144x512xbf16, #tpu.memory_space<vmem>>, vector<16x512xbf16>
    tpu.vector_store %arg5[%c32_50, %c0_51], %47 {strides = array<i32>} : memref<144x512xbf16, #tpu.memory_space<vmem>>, vector<16x512xbf16>,
    %c0_52 = arith.constant 0 : index
    %c0_53 = arith.constant 0 : index
    %c262 = arith.constant 262 : index
    %49 = vector.load %arg1[%c0_52, %c0_53, %c262] : memref<1x16x1056xbf16, #tpu.memory_space<vmem>>, vector<1x16x512xbf16>
    %50 = vector.shape_cast %49 : vector<1x16x512xbf16> to vector<16x512xbf16>
    %c48_54 = arith.constant 48 : index
    %c0_55 = arith.constant 0 : index
    %51 = vector.load %arg5[%c48_54, %c0_55] : memref<144x512xbf16, #tpu.memory_space<vmem>>, vector<16x512xbf16>
    tpu.vector_store %arg5[%c48_54, %c0_55], %50 {strides = array<i32>} : memref<144x512xbf16, #tpu.memory_space<vmem>>, vector<16x512xbf16>,
    %c0_56 = arith.constant 0 : index
    %c0_57 = arith.constant 0 : index
    %c264_58 = arith.constant 264 : index
    %52 = vector.load %arg1[%c0_56, %c0_57, %c264_58] : memref<1x16x1056xbf16, #tpu.memory_space<vmem>>, vector<1x16x512xbf16>
    %53 = vector.shape_cast %52 : vector<1x16x512xbf16> to vector<16x512xbf16>
    %c64_59 = arith.constant 64 : index
    %c0_60 = arith.constant 0 : index
    %54 = vector.load %arg5[%c64_59, %c0_60] : memref<144x512xbf16, #tpu.memory_space<vmem>>, vector<16x512xbf16>
    tpu.vector_store %arg5[%c64_59, %c0_60], %53 {strides = array<i32>} : memref<144x512xbf16, #tpu.memory_space<vmem>>, vector<16x512xbf16>,
    %c0_61 = arith.constant 0 : index
    %c0_62 = arith.constant 0 : index
    %c266 = arith.constant 266 : index
    %55 = vector.load %arg1[%c0_61, %c0_62, %c266] : memref<1x16x1056xbf16, #tpu.memory_space<vmem>>, vector<1x16x512xbf16>
    %56 = vector.shape_cast %55 : vector<1x16x512xbf16> to vector<16x512xbf16>
    %c80_63 = arith.constant 80 : index
    %c0_64 = arith.constant 0 : index
    %57 = vector.load %arg5[%c80_63, %c0_64] : memref<144x512xbf16, #tpu.memory_space<vmem>>, vector<16x512xbf16>
    tpu.vector_store %arg5[%c80_63, %c0_64], %56 {strides = array<i32>} : memref<144x512xbf16, #tpu.memory_space<vmem>>, vector<16x512xbf16>,
    %c0_65 = arith.constant 0 : index
    %c0_66 = arith.constant 0 : index
    %c326 = arith.constant 326 : index
    %58 = vector.load %arg1[%c0_65, %c0_66, %c326] : memref<1x16x1056xbf16, #tpu.memory_space<vmem>>, vector<1x16x512xbf16>
    %59 = vector.shape_cast %58 : vector<1x16x512xbf16> to vector<16x512xbf16>
    %c96_67 = arith.constant 96 : index
    %c0_68 = arith.constant 0 : index
    %60 = vector.load %arg5[%c96_67, %c0_68] : memref<144x512xbf16, #tpu.memory_space<vmem>>, vector<16x512xbf16>
    tpu.vector_store %arg5[%c96_67, %c0_68], %59 {strides = array<i32>} : memref<144x512xbf16, #tpu.memory_space<vmem>>, vector<16x512xbf16>,
    %c0_69 = arith.constant 0 : index
    %c0_70 = arith.constant 0 : index
    %c328 = arith.constant 328 : index
    %61 = vector.load %arg1[%c0_69, %c0_70, %c328] : memref<1x16x1056xbf16, #tpu.memory_space<vmem>>, vector<1x16x512xbf16>
    %62 = vector.shape_cast %61 : vector<1x16x512xbf16> to vector<16x512xbf16>
    %c112_71 = arith.constant 112 : index
    %c0_72 = arith.constant 0 : index
    %63 = vector.load %arg5[%c112_71, %c0_72] : memref<144x512xbf16, #tpu.memory_space<vmem>>, vector<16x512xbf16>
    tpu.vector_store %arg5[%c112_71, %c0_72], %62 {strides = array<i32>} : memref<144x512xbf16, #tpu.memory_space<vmem>>, vector<16x512xbf16>,
    %c0_73 = arith.constant 0 : index
    %c0_74 = arith.constant 0 : index
    %c330 = arith.constant 330 : index
    %64 = vector.load %arg1[%c0_73, %c0_74, %c330] : memref<1x16x1056xbf16, #tpu.memory_space<vmem>>, vector<1x16x512xbf16>
    %65 = vector.shape_cast %64 : vector<1x16x512xbf16> to vector<16x512xbf16>
    %c128_75 = arith.constant 128 : index
    %c0_76 = arith.constant 0 : index
    %66 = vector.load %arg5[%c128_75, %c0_76] : memref<144x512xbf16, #tpu.memory_space<vmem>>, vector<16x512xbf16>
    tpu.vector_store %arg5[%c128_75, %c0_76], %65 {strides = array<i32>} : memref<144x512xbf16, #tpu.memory_space<vmem>>, vector<16x512xbf16>,
    %c1 = arith.constant 1 : index
    %c0_77 = arith.constant 0 : index
    %c0_78 = arith.constant 0 : index
    %67 = vector.load %arg2[%c1, %c0_77, %c0_78] : memref<4x4x144xbf16, #tpu.memory_space<vmem>>, vector<1x4x144xbf16>
    %68 = vector.shape_cast %67 : vector<1x4x144xbf16> to vector<4x144xbf16>
    %c0_79 = arith.constant 0 : index
    %c0_80 = arith.constant 0 : index
    %69 = vector.load %arg5[%c0_79, %c0_80] : memref<144x512xbf16, #tpu.memory_space<vmem>>, vector<144x512xbf16>
    %cst_81 = arith.constant dense<0.000000e+00> : vector<4x512xf32>
    %70 = tpu.matmul %68, %69, %cst_81 {dimension_numbers = #tpu.dot_dimension_numbers<[1], [0], [0], [1], [0, 0, 1, 1], [], []>} : vector<4x144xbf16>, vector<144x512xbf16>, vector<4x512xf32> -> vector<4x512xf32>
    %c1_82 = arith.constant 1 : index
    %c0_83 = arith.constant 0 : index
    %c0_84 = arith.constant 0 : index
    %71 = vector.load %arg3[%c1_82, %c0_83, %c0_84] : memref<4x4x1xf32, #tpu.memory_space<vmem>>, vector<1x4x1xf32>
    %72 = vector.shape_cast %71 : vector<1x4x1xf32> to vector<4x1xf32>
    %73 = vector.broadcast %72 : vector<4x1xf32> to vector<4x512xf32>
    %74 = arith.addf %70, %73 : vector<4x512xf32>
    %cst_85 = arith.constant 0.000000e+00 : f32
    %75 = vector.broadcast %cst_85 : f32 to vector<4x512xf32>
    %76 = arith.maximumf %74, %75 : vector<4x512xf32>
    %c0_86 = arith.constant 0 : index
    %c1_87 = arith.constant 1 : index
    %c0_88 = arith.constant 0 : index
    %c0_89 = arith.constant 0 : index
    %77 = vector.load %arg4[%c0_86, %c1_87, %c0_88, %c0_89] : memref<1x4x4x512xf32, #tpu.memory_space<vmem>>, vector<1x1x4x512xf32>
    %78 = vector.shape_cast %77 : vector<1x1x4x512xf32> to vector<4x512xf32>
    %79 = vector.shape_cast %76 : vector<4x512xf32> to vector<1x1x4x512xf32>
    tpu.vector_store %arg4[%c0_86, %c1_87, %c0_88, %c0_89], %79 {strides = array<i32>} : memref<1x4x4x512xf32, #tpu.memory_space<vmem>>, vector<1x1x4x512xf32>,
    %c0_90 = arith.constant 0 : index
    %c0_91 = arith.constant 0 : index
    %c132 = arith.constant 132 : index
    %80 = vector.load %arg1[%c0_90, %c0_91, %c132] : memref<1x16x1056xbf16, #tpu.memory_space<vmem>>, vector<1x16x512xbf16>
    %81 = vector.shape_cast %80 : vector<1x16x512xbf16> to vector<16x512xbf16>
    %c0_92 = arith.constant 0 : index
    %c0_93 = arith.constant 0 : index
    %82 = vector.load %arg5[%c0_92, %c0_93] : memref<144x512xbf16, #tpu.memory_space<vmem>>, vector<16x512xbf16>
    tpu.vector_store %arg5[%c0_92, %c0_93], %81 {strides = array<i32>} : memref<144x512xbf16, #tpu.memory_space<vmem>>, vector<16x512xbf16>,
    %c0_94 = arith.constant 0 : index
    %c0_95 = arith.constant 0 : index
    %c136 = arith.constant 136 : index
    %83 = vector.load %arg1[%c0_94, %c0_95, %c136] : memref<1x16x1056xbf16, #tpu.memory_space<vmem>>, vector<1x16x512xbf16>
    %84 = vector.shape_cast %83 : vector<1x16x512xbf16> to vector<16x512xbf16>
    %c16_96 = arith.constant 16 : index
    %c0_97 = arith.constant 0 : index
    %85 = vector.load %arg5[%c16_96, %c0_97] : memref<144x512xbf16, #tpu.memory_space<vmem>>, vector<16x512xbf16>
    tpu.vector_store %arg5[%c16_96, %c0_97], %84 {strides = array<i32>} : memref<144x512xbf16, #tpu.memory_space<vmem>>, vector<16x512xbf16>,
    %c0_98 = arith.constant 0 : index
    %c0_99 = arith.constant 0 : index
    %c140 = arith.constant 140 : index
    %86 = vector.load %arg1[%c0_98, %c0_99, %c140] : memref<1x16x1056xbf16, #tpu.memory_space<vmem>>, vector<1x16x512xbf16>
    %87 = vector.shape_cast %86 : vector<1x16x512xbf16> to vector<16x512xbf16>
    %c32_100 = arith.constant 32 : index
    %c0_101 = arith.constant 0 : index
    %88 = vector.load %arg5[%c32_100, %c0_101] : memref<144x512xbf16, #tpu.memory_space<vmem>>, vector<16x512xbf16>
    tpu.vector_store %arg5[%c32_100, %c0_101], %87 {strides = array<i32>} : memref<144x512xbf16, #tpu.memory_space<vmem>>, vector<16x512xbf16>,
    %c0_102 = arith.constant 0 : index
    %c0_103 = arith.constant 0 : index
    %c260 = arith.constant 260 : index
    %89 = vector.load %arg1[%c0_102, %c0_103, %c260] : memref<1x16x1056xbf16, #tpu.memory_space<vmem>>, vector<1x16x512xbf16>
    %90 = vector.shape_cast %89 : vector<1x16x512xbf16> to vector<16x512xbf16>
    %c48_104 = arith.constant 48 : index
    %c0_105 = arith.constant 0 : index
    %91 = vector.load %arg5[%c48_104, %c0_105] : memref<144x512xbf16, #tpu.memory_space<vmem>>, vector<16x512xbf16>
    tpu.vector_store %arg5[%c48_104, %c0_105], %90 {strides = array<i32>} : memref<144x512xbf16, #tpu.memory_space<vmem>>, vector<16x512xbf16>,
    %c0_106 = arith.constant 0 : index
    %c0_107 = arith.constant 0 : index
    %c264_108 = arith.constant 264 : index
    %92 = vector.load %arg1[%c0_106, %c0_107, %c264_108] : memref<1x16x1056xbf16, #tpu.memory_space<vmem>>, vector<1x16x512xbf16>
    %93 = vector.shape_cast %92 : vector<1x16x512xbf16> to vector<16x512xbf16>
    %c64_109 = arith.constant 64 : index
    %c0_110 = arith.constant 0 : index
    %94 = vector.load %arg5[%c64_109, %c0_110] : memref<144x512xbf16, #tpu.memory_space<vmem>>, vector<16x512xbf16>
    tpu.vector_store %arg5[%c64_109, %c0_110], %93 {strides = array<i32>} : memref<144x512xbf16, #tpu.memory_space<vmem>>, vector<16x512xbf16>,
    %c0_111 = arith.constant 0 : index
    %c0_112 = arith.constant 0 : index
    %c268 = arith.constant 268 : index
    %95 = vector.load %arg1[%c0_111, %c0_112, %c268] : memref<1x16x1056xbf16, #tpu.memory_space<vmem>>, vector<1x16x512xbf16>
    %96 = vector.shape_cast %95 : vector<1x16x512xbf16> to vector<16x512xbf16>
    %c80_113 = arith.constant 80 : index
    %c0_114 = arith.constant 0 : index
    %97 = vector.load %arg5[%c80_113, %c0_114] : memref<144x512xbf16, #tpu.memory_space<vmem>>, vector<16x512xbf16>
    tpu.vector_store %arg5[%c80_113, %c0_114], %96 {strides = array<i32>} : memref<144x512xbf16, #tpu.memory_space<vmem>>, vector<16x512xbf16>,
    %c0_115 = arith.constant 0 : index
    %c0_116 = arith.constant 0 : index
    %c388 = arith.constant 388 : index
    %98 = vector.load %arg1[%c0_115, %c0_116, %c388] : memref<1x16x1056xbf16, #tpu.memory_space<vmem>>, vector<1x16x512xbf16>
    %99 = vector.shape_cast %98 : vector<1x16x512xbf16> to vector<16x512xbf16>
    %c96_117 = arith.constant 96 : index
    %c0_118 = arith.constant 0 : index
    %100 = vector.load %arg5[%c96_117, %c0_118] : memref<144x512xbf16, #tpu.memory_space<vmem>>, vector<16x512xbf16>
    tpu.vector_store %arg5[%c96_117, %c0_118], %99 {strides = array<i32>} : memref<144x512xbf16, #tpu.memory_space<vmem>>, vector<16x512xbf16>,
    %c0_119 = arith.constant 0 : index
    %c0_120 = arith.constant 0 : index
    %c392 = arith.constant 392 : index
    %101 = vector.load %arg1[%c0_119, %c0_120, %c392] : memref<1x16x1056xbf16, #tpu.memory_space<vmem>>, vector<1x16x512xbf16>
    %102 = vector.shape_cast %101 : vector<1x16x512xbf16> to vector<16x512xbf16>
    %c112_121 = arith.constant 112 : index
    %c0_122 = arith.constant 0 : index
    %103 = vector.load %arg5[%c112_121, %c0_122] : memref<144x512xbf16, #tpu.memory_space<vmem>>, vector<16x512xbf16>
    tpu.vector_store %arg5[%c112_121, %c0_122], %102 {strides = array<i32>} : memref<144x512xbf16, #tpu.memory_space<vmem>>, vector<16x512xbf16>,
    %c0_123 = arith.constant 0 : index
    %c0_124 = arith.constant 0 : index
    %c396 = arith.constant 396 : index
    %104 = vector.load %arg1[%c0_123, %c0_124, %c396] : memref<1x16x1056xbf16, #tpu.memory_space<vmem>>, vector<1x16x512xbf16>
    %105 = vector.shape_cast %104 : vector<1x16x512xbf16> to vector<16x512xbf16>
    %c128_125 = arith.constant 128 : index
    %c0_126 = arith.constant 0 : index
    %106 = vector.load %arg5[%c128_125, %c0_126] : memref<144x512xbf16, #tpu.memory_space<vmem>>, vector<16x512xbf16>
    tpu.vector_store %arg5[%c128_125, %c0_126], %105 {strides = array<i32>} : memref<144x512xbf16, #tpu.memory_space<vmem>>, vector<16x512xbf16>,
    %c2 = arith.constant 2 : index
    %c0_127 = arith.constant 0 : index
    %c0_128 = arith.constant 0 : index
    %107 = vector.load %arg2[%c2, %c0_127, %c0_128] : memref<4x4x144xbf16, #tpu.memory_space<vmem>>, vector<1x4x144xbf16>
    %108 = vector.shape_cast %107 : vector<1x4x144xbf16> to vector<4x144xbf16>
    %c0_129 = arith.constant 0 : index
    %c0_130 = arith.constant 0 : index
    %109 = vector.load %arg5[%c0_129, %c0_130] : memref<144x512xbf16, #tpu.memory_space<vmem>>, vector<144x512xbf16>
    %cst_131 = arith.constant dense<0.000000e+00> : vector<4x512xf32>
    %110 = tpu.matmul %108, %109, %cst_131 {dimension_numbers = #tpu.dot_dimension_numbers<[1], [0], [0], [1], [0, 0, 1, 1], [], []>} : vector<4x144xbf16>, vector<144x512xbf16>, vector<4x512xf32> -> vector<4x512xf32>
    %c2_132 = arith.constant 2 : index
    %c0_133 = arith.constant 0 : index
    %c0_134 = arith.constant 0 : index
    %111 = vector.load %arg3[%c2_132, %c0_133, %c0_134] : memref<4x4x1xf32, #tpu.memory_space<vmem>>, vector<1x4x1xf32>
    %112 = vector.shape_cast %111 : vector<1x4x1xf32> to vector<4x1xf32>
    %113 = vector.broadcast %112 : vector<4x1xf32> to vector<4x512xf32>
    %114 = arith.addf %110, %113 : vector<4x512xf32>
    %cst_135 = arith.constant 0.000000e+00 : f32
    %115 = vector.broadcast %cst_135 : f32 to vector<4x512xf32>
    %116 = arith.maximumf %114, %115 : vector<4x512xf32>
    %c0_136 = arith.constant 0 : index
    %c2_137 = arith.constant 2 : index
    %c0_138 = arith.constant 0 : index
    %c0_139 = arith.constant 0 : index
    %117 = vector.load %arg4[%c0_136, %c2_137, %c0_138, %c0_139] : memref<1x4x4x512xf32, #tpu.memory_space<vmem>>, vector<1x1x4x512xf32>
    %118 = vector.shape_cast %117 : vector<1x1x4x512xf32> to vector<4x512xf32>
    %119 = vector.shape_cast %116 : vector<4x512xf32> to vector<1x1x4x512xf32>
    tpu.vector_store %arg4[%c0_136, %c2_137, %c0_138, %c0_139], %119 {strides = array<i32>} : memref<1x4x4x512xf32, #tpu.memory_space<vmem>>, vector<1x1x4x512xf32>,
    %c0_140 = arith.constant 0 : index
    %c0_141 = arith.constant 0 : index
    %c0_142 = arith.constant 0 : index
    %120 = vector.load %arg1[%c0_140, %c0_141, %c0_142] : memref<1x16x1056xbf16, #tpu.memory_space<vmem>>, vector<1x16x512xbf16>
    %121 = vector.shape_cast %120 : vector<1x16x512xbf16> to vector<16x512xbf16>
    %c0_143 = arith.constant 0 : index
    %c0_144 = arith.constant 0 : index
    %122 = vector.load %arg5[%c0_143, %c0_144] : memref<144x512xbf16, #tpu.memory_space<vmem>>, vector<16x512xbf16>
    tpu.vector_store %arg5[%c0_143, %c0_144], %121 {strides = array<i32>} : memref<144x512xbf16, #tpu.memory_space<vmem>>, vector<16x512xbf16>,
    %c0_145 = arith.constant 0 : index
    %c0_146 = arith.constant 0 : index
    %c8 = arith.constant 8 : index
    %123 = vector.load %arg1[%c0_145, %c0_146, %c8] : memref<1x16x1056xbf16, #tpu.memory_space<vmem>>, vector<1x16x512xbf16>
    %124 = vector.shape_cast %123 : vector<1x16x512xbf16> to vector<16x512xbf16>
    %c16_147 = arith.constant 16 : index
    %c0_148 = arith.constant 0 : index
    %125 = vector.load %arg5[%c16_147, %c0_148] : memref<144x512xbf16, #tpu.memory_space<vmem>>, vector<16x512xbf16>
    tpu.vector_store %arg5[%c16_147, %c0_148], %124 {strides = array<i32>} : memref<144x512xbf16, #tpu.memory_space<vmem>>, vector<16x512xbf16>,
    %c0_149 = arith.constant 0 : index
    %c0_150 = arith.constant 0 : index
    %c16_151 = arith.constant 16 : index
    %126 = vector.load %arg1[%c0_149, %c0_150, %c16_151] : memref<1x16x1056xbf16, #tpu.memory_space<vmem>>, vector<1x16x512xbf16>
    %127 = vector.shape_cast %126 : vector<1x16x512xbf16> to vector<16x512xbf16>
    %c32_152 = arith.constant 32 : index
    %c0_153 = arith.constant 0 : index
    %128 = vector.load %arg5[%c32_152, %c0_153] : memref<144x512xbf16, #tpu.memory_space<vmem>>, vector<16x512xbf16>
    tpu.vector_store %arg5[%c32_152, %c0_153], %127 {strides = array<i32>} : memref<144x512xbf16, #tpu.memory_space<vmem>>, vector<16x512xbf16>,
    %c0_154 = arith.constant 0 : index
    %c0_155 = arith.constant 0 : index
    %c256 = arith.constant 256 : index
    %129 = vector.load %arg1[%c0_154, %c0_155, %c256] : memref<1x16x1056xbf16, #tpu.memory_space<vmem>>, vector<1x16x512xbf16>
    %130 = vector.shape_cast %129 : vector<1x16x512xbf16> to vector<16x512xbf16>
    %c48_156 = arith.constant 48 : index
    %c0_157 = arith.constant 0 : index
    %131 = vector.load %arg5[%c48_156, %c0_157] : memref<144x512xbf16, #tpu.memory_space<vmem>>, vector<16x512xbf16>
    tpu.vector_store %arg5[%c48_156, %c0_157], %130 {strides = array<i32>} : memref<144x512xbf16, #tpu.memory_space<vmem>>, vector<16x512xbf16>,
    %c0_158 = arith.constant 0 : index
    %c0_159 = arith.constant 0 : index
    %c264_160 = arith.constant 264 : index
    %132 = vector.load %arg1[%c0_158, %c0_159, %c264_160] : memref<1x16x1056xbf16, #tpu.memory_space<vmem>>, vector<1x16x512xbf16>
    %133 = vector.shape_cast %132 : vector<1x16x512xbf16> to vector<16x512xbf16>
    %c64_161 = arith.constant 64 : index
    %c0_162 = arith.constant 0 : index
    %134 = vector.load %arg5[%c64_161, %c0_162] : memref<144x512xbf16, #tpu.memory_space<vmem>>, vector<16x512xbf16>
    tpu.vector_store %arg5[%c64_161, %c0_162], %133 {strides = array<i32>} : memref<144x512xbf16, #tpu.memory_space<vmem>>, vector<16x512xbf16>,
    %c0_163 = arith.constant 0 : index
    %c0_164 = arith.constant 0 : index
    %c272 = arith.constant 272 : index
    %135 = vector.load %arg1[%c0_163, %c0_164, %c272] : memref<1x16x1056xbf16, #tpu.memory_space<vmem>>, vector<1x16x512xbf16>
    %136 = vector.shape_cast %135 : vector<1x16x512xbf16> to vector<16x512xbf16>
    %c80_165 = arith.constant 80 : index
    %c0_166 = arith.constant 0 : index
    %137 = vector.load %arg5[%c80_165, %c0_166] : memref<144x512xbf16, #tpu.memory_space<vmem>>, vector<16x512xbf16>
    tpu.vector_store %arg5[%c80_165, %c0_166], %136 {strides = array<i32>} : memref<144x512xbf16, #tpu.memory_space<vmem>>, vector<16x512xbf16>,
    %c0_167 = arith.constant 0 : index
    %c0_168 = arith.constant 0 : index
    %c512 = arith.constant 512 : index
    %138 = vector.load %arg1[%c0_167, %c0_168, %c512] : memref<1x16x1056xbf16, #tpu.memory_space<vmem>>, vector<1x16x512xbf16>
    %139 = vector.shape_cast %138 : vector<1x16x512xbf16> to vector<16x512xbf16>
    %c96_169 = arith.constant 96 : index
    %c0_170 = arith.constant 0 : index
    %140 = vector.load %arg5[%c96_169, %c0_170] : memref<144x512xbf16, #tpu.memory_space<vmem>>, vector<16x512xbf16>
    tpu.vector_store %arg5[%c96_169, %c0_170], %139 {strides = array<i32>} : memref<144x512xbf16, #tpu.memory_space<vmem>>, vector<16x512xbf16>,
    %c0_171 = arith.constant 0 : index
    %c0_172 = arith.constant 0 : index
    %c520 = arith.constant 520 : index
    %141 = vector.load %arg1[%c0_171, %c0_172, %c520] : memref<1x16x1056xbf16, #tpu.memory_space<vmem>>, vector<1x16x512xbf16>
    %142 = vector.shape_cast %141 : vector<1x16x512xbf16> to vector<16x512xbf16>
    %c112_173 = arith.constant 112 : index
    %c0_174 = arith.constant 0 : index
    %143 = vector.load %arg5[%c112_173, %c0_174] : memref<144x512xbf16, #tpu.memory_space<vmem>>, vector<16x512xbf16>
    tpu.vector_store %arg5[%c112_173, %c0_174], %142 {strides = array<i32>} : memref<144x512xbf16, #tpu.memory_space<vmem>>, vector<16x512xbf16>,
    %c0_175 = arith.constant 0 : index
    %c0_176 = arith.constant 0 : index
    %c528 = arith.constant 528 : index
    %144 = vector.load %arg1[%c0_175, %c0_176, %c528] : memref<1x16x1056xbf16, #tpu.memory_space<vmem>>, vector<1x16x512xbf16>
    %145 = vector.shape_cast %144 : vector<1x16x512xbf16> to vector<16x512xbf16>
    %c128_177 = arith.constant 128 : index
    %c0_178 = arith.constant 0 : index
    %146 = vector.load %arg5[%c128_177, %c0_178] : memref<144x512xbf16, #tpu.memory_space<vmem>>, vector<16x512xbf16>
    tpu.vector_store %arg5[%c128_177, %c0_178], %145 {strides = array<i32>} : memref<144x512xbf16, #tpu.memory_space<vmem>>, vector<16x512xbf16>,
    %c3 = arith.constant 3 : index
    %c0_179 = arith.constant 0 : index
    %c0_180 = arith.constant 0 : index
    %147 = vector.load %arg2[%c3, %c0_179, %c0_180] : memref<4x4x144xbf16, #tpu.memory_space<vmem>>, vector<1x4x144xbf16>
    %148 = vector.shape_cast %147 : vector<1x4x144xbf16> to vector<4x144xbf16>
    %c0_181 = arith.constant 0 : index
    %c0_182 = arith.constant 0 : index
    %149 = vector.load %arg5[%c0_181, %c0_182] : memref<144x512xbf16, #tpu.memory_space<vmem>>, vector<144x512xbf16>
    %cst_183 = arith.constant dense<0.000000e+00> : vector<4x512xf32>
    %150 = tpu.matmul %148, %149, %cst_183 {dimension_numbers = #tpu.dot_dimension_numbers<[1], [0], [0], [1], [0, 0, 1, 1], [], []>} : vector<4x144xbf16>, vector<144x512xbf16>, vector<4x512xf32> -> vector<4x512xf32>
    %c3_184 = arith.constant 3 : index
    %c0_185 = arith.constant 0 : index
    %c0_186 = arith.constant 0 : index
    %151 = vector.load %arg3[%c3_184, %c0_185, %c0_186] : memref<4x4x1xf32, #tpu.memory_space<vmem>>, vector<1x4x1xf32>
    %152 = vector.shape_cast %151 : vector<1x4x1xf32> to vector<4x1xf32>
    %153 = vector.broadcast %152 : vector<4x1xf32> to vector<4x512xf32>
    %154 = arith.addf %150, %153 : vector<4x512xf32>
    %cst_187 = arith.constant 0.000000e+00 : f32
    %155 = vector.broadcast %cst_187 : f32 to vector<4x512xf32>
    %156 = arith.maximumf %154, %155 : vector<4x512xf32>
    %c0_188 = arith.constant 0 : index
    %c3_189 = arith.constant 3 : index
    %c0_190 = arith.constant 0 : index
    %c0_191 = arith.constant 0 : index
    %157 = vector.load %arg4[%c0_188, %c3_189, %c0_190, %c0_191] : memref<1x4x4x512xf32, #tpu.memory_space<vmem>>, vector<1x1x4x512xf32>
    %158 = vector.shape_cast %157 : vector<1x1x4x512xf32> to vector<4x512xf32>
    %159 = vector.shape_cast %156 : vector<4x512xf32> to vector<1x1x4x512xf32>
    tpu.vector_store %arg4[%c0_188, %c3_189, %c0_190, %c0_191], %159 {strides = array<i32>} : memref<1x4x4x512xf32, #tpu.memory_space<vmem>>, vector<1x1x4x512xf32>,
    return
  }
  func.func @transform_0(%arg0: i32) -> (i32, i32, i32) {
    %c0_i32 = arith.constant 0 : i32
    %c0_i32_0 = arith.constant 0 : i32
    %c0_i32_1 = arith.constant 0 : i32
    return %arg0, %c0_i32, %c0_i32_0 : i32, i32, i32
  }
  func.func @transform_1(%arg0: i32) -> (i32, i32, i32) {
    %c0_i32 = arith.constant 0 : i32
    %c0_i32_0 = arith.constant 0 : i32
    %c0_i32_1 = arith.constant 0 : i32
    %c0_i32_2 = arith.constant 0 : i32
    return %c0_i32, %c0_i32_0, %c0_i32_1 : i32, i32, i32
  }
  func.func @transform_2(%arg0: i32) -> (i32, i32, i32) {
    %c0_i32 = arith.constant 0 : i32
    %c0_i32_0 = arith.constant 0 : i32
    %c0_i32_1 = arith.constant 0 : i32
    %c0_i32_2 = arith.constant 0 : i32
    return %c0_i32, %c0_i32_0, %c0_i32_1 : i32, i32, i32
  }
  func.func @transform_3(%arg0: i32) -> (i32, i32, i32, i32) {
    %c0_i32 = arith.constant 0 : i32
    %c0_i32_0 = arith.constant 0 : i32
    %c0_i32_1 = arith.constant 0 : i32
    %c0_i32_2 = arith.constant 0 : i32
    return %arg0, %c0_i32, %c0_i32_0, %c0_i32_1 : i32, i32, i32, i32
  }
}

</mosaic_0001>

<bundles_post_ra>
// kernel: atn_conv_forward.2
= control target key start
LH: loop header
LB: loop body
LE: loop exit
PB: predicated region body
PF: predicated region fallthrough
CT: control target
= control target key end

     0   :  { %s1121_s15 = smov 0   ;;  %s1123_s16 = smov 0   ;;  %s1311_s0 = inlined_call_operand.vmem [shape: bf16[2,64,72], index: 0, kind: input, shape index: {}, may-alias: {0,1}]   ;;  %s1312_s1 = inlined_call_operand.vmem [shape: bf16[2,64,72], index: 1, kind: input, shape index: {}, may-alias: {0,1}]   ;;  %s1313_s2 = inlined_call_operand.vmem [shape: bf16[2,64,256], index: 2, kind: input, shape index: {}]   ;;  %s1314_s3 = inlined_call_operand.vmem [shape: f32[2,1,64], index: 3, kind: input, shape index: {}]   ;;  %s1315_s4 = inlined_call_operand.vmem [shape: f32[2,64,256], index: 4, kind: output, shape index: {}]  }
   0x1   :  { %s1125_s17 = smov 0  }
   0x2 LB: > { %s26_s18 = sadd.s32 1, %s1089_s16  ;;  %p899_p0 = scmp.ge.s32.totalorder %s1093_s17, 1  ;;  %s1093_s17 = sphi %s1125_s17, %s14_s17   ;;  %s1089_s16 = sphi %s1123_s16, %s1317_s16   ;;  %s1085_s15 = sphi %s1121_s15, %s1316_s15  }
   0x3   : > { %p28_p1 = scmp.ge.s32.totalorder %s26_s18, 2  ;;  %p211_p2 = scmp.lt.s32.totalorder %s1093_s17, 3 }
   0x5   : > { %s1319_s18 = smov (%p28_p1, %s26_s18), 0  ;;  %p212_p3 = pnand %p899_p0, %p211_p2 }
   0x6   : > { %p260_p4 = scmp.lt.s32.totalorder (!%p212_p3), %s1085_s15, 1 }
   0x7   : > { %215 = sbr.rel (%p212_p3) target bundleno = 961 (0x3c1), region = 36 }
   0xc   : > { %s1321_s15 = smov (!%p260_p4, %s1085_s15), 1  ;;  %vm318_vm0 = vcmask 588800   ;;  %vm511_vm1 = vcmask 523264  }
   0xd   : > { %s931_s19 = sshll.u32 %s1321_s15, 5  ;;  %s281_s28 = scalar_lea.vmem %s1314_s3, %s1321_s15 }
   0xe   : > { %s273_s22 = scalar_lea.vmem %s1312_s1, %s931_s19  ;;  %s1148_s25 = scalar_lea.vmem %s1311_s0, %s931_s19 }
   0xf   : > { %v953_v0 = vld [vmem:[%s273_s22 + $0x18] sm:$0xff]   ;;  %v952_v1 = vld [vmem:[%s273_s22 + $0x10] sm:$0xff]   ;;  %v951_v2 = vld [vmem:[%s273_s22 + $0x8] sm:$0xff]   ;;  %s933_s29 = sshll.u32 %s1321_s15, 6  ;;  %s934_s7 = sshll.u32 %s1321_s15, 7 }
  0x10   : > { %v1150_v3 = vunpack.c.l.bf16 %v953_v0  ;;  %v1152_v4 = vunpack.c.h.bf16 %v953_v0  ;;  %v1154_v5 = vunpack.c.l.bf16 %v952_v1  ;;  %v1156_v6 = vunpack.c.h.bf16 %v952_v1  ;;  %v936_v7 = vld [vmem:[%s273_s22] sm:$0xff]   ;;  %s278_s6 = scalar_lea.vmem %s1313_s2, %s933_s29  ;;  %s1284_s10 = scalar_lea.vmem %s1315_s4, %s934_s7 }
  0x11   : > { %v1158_v8 = vunpack.c.h.bf16 %v951_v2  ;;  %v1160_v9 = vunpack.c.l.bf16 %v951_v2  ;;  %v1172_v16 = vunpack.c.h.bf16 %v936_v7  ;;  %v1174_v17 = vunpack.c.l.bf16 %v936_v7  ;;  %v1007_v28 = vld [vmem:[%s1148_s25] sm:$0xff]  }
  0x12   : > { %v316_v10 = vmul.f32 %v1150_v3, %v1150_v3  ;;  %v317_v11 = vmul.f32 %v1152_v4, %v1152_v4  ;;  %v314_v12 = vmul.f32 %v1154_v5, %v1154_v5  ;;  %v315_v13 = vmul.f32 %v1156_v6, %v1156_v6  ;;  %970 = vmatprep.mubr.msk.bf16.mxu0 %vm318_vm0, %v1007_v28 }
  0x13   : > { %v313_v20 = vmul.f32 %v1158_v8, %v1158_v8  ;;  %v312_v21 = vmul.f32 %v1160_v9, %v1160_v9  ;;  %v311_v24 = vmul.f32 %v1172_v16, %v1172_v16  ;;  %v310_v25 = vmul.f32 %v1174_v17, %v1174_v17 }
  0x14   : > { %v337_v14 = vsel %vm318_vm0, %v316_v10, 0.0  ;;  %v331_v15 = vsel %vm318_vm0, %v314_v12, 0.0  ;;  %v340_v18 = vsel %vm318_vm0, %v317_v11, 0.0  ;;  %v334_v19 = vsel %vm318_vm0, %v315_v13, 0.0  ;;  %v1008_v13 = vld [vmem:[%s1148_s25 + $0x8] sm:$0xff]  }
  0x15   : > { %338 = vadd.xlane.f32.xlu0 %v337_v14  ;;  %332 = vadd.xlane.f32.xlu1 %v331_v15  ;;  %v328_v22 = vsel %vm318_vm0, %v313_v20, 0.0  ;;  %v325_v23 = vsel %vm318_vm0, %v312_v21, 0.0  ;;  %v322_v26 = vsel %vm318_vm0, %v311_v24, 0.0  ;;  %v319_v27 = vsel %vm318_vm0, %v310_v25, 0.0  ;;  %v1009_v14 = vld [vmem:[%s1148_s25 + $0x10] sm:$0xff]   ;;  %v1010_v15 = vld [vmem:[%s1148_s25 + $0x18] sm:$0xff]  }
  0x19   : > { %341 = vadd.xlane.f32.xlu0 %v340_v18  ;;  %335 = vadd.xlane.f32.xlu1 %v334_v19 }
  0x1d   : > { %329 = vadd.xlane.f32.xlu1 %v328_v22  ;;  %326 = vadd.xlane.f32.xlu0 %v325_v23 }
  0x21   : > { %323 = vadd.xlane.f32.xlu1 %v322_v26  ;;  %320 = vadd.xlane.f32.xlu0 %v319_v27 }
  0x9e   : > { %v339_v29 = vpop.xlane.xlu0 %338  ;;  %v333_v30 = vpop.xlane.xlu1 %332 }
  0x9f   : > { %v349_v31 = vmax.f32 %v339_v29, 1e-08  ;;  %v347_v32 = vmax.f32 %v333_v30, 1e-08 }
  0xa1   : > { %1023 = vrsqrt.f32 %v349_v31 }
  0xa2   : > { %v342_v33 = vpop.xlane.xlu0 %341  ;;  %1025 = vrsqrt.f32 %v347_v32  ;;  %v336_v34 = vpop.xlane.xlu1 %335 }
  0xa3   : > { %v350_v35 = vmax.f32 %v342_v33, 1e-08  ;;  %v348_v36 = vmax.f32 %v336_v34, 1e-08 }
  0xa5   : > { %1027 = vrsqrt.f32 %v350_v35 }
  0xa6   : > { %1029 = vrsqrt.f32 %v348_v36  ;;  %v330_v37 = vpop.xlane.xlu1 %329  ;;  %v327_v38 = vpop.xlane.xlu0 %326 }
  0xa7   : > { %v346_v39 = vmax.f32 %v330_v37, 1e-08  ;;  %v345_v40 = vmax.f32 %v327_v38, 1e-08 }
  0xa9   : > { %1031 = vrsqrt.f32 %v346_v39 }
  0xaa   : > { %1033 = vrsqrt.f32 %v345_v40  ;;  %v324_v41 = vpop.xlane.xlu1 %323  ;;  %v321_v42 = vpop.xlane.xlu0 %320 }
  0xab   : > { %v344_v43 = vmax.f32 %v324_v41, 1e-08  ;;  %v343_v44 = vmax.f32 %v321_v42, 1e-08 }
  0xad   : > { %1035 = vrsqrt.f32 %v344_v43 }
  0xae   : > { %v1024_v45 = vpop.eup %1023  ;;  %1037 = vrsqrt.f32 %v343_v44 }
  0xaf   : > { %v1026_v46 = vpop.eup %1025  ;;  %v365_v48 = vmul.f32 10.0, %v1024_v45 }
  0xb0   : > { %v363_v47 = vmul.f32 10.0, %v1026_v46 }
  0xb1   : > { %v373_v54 = vmul.f32 %v1150_v3, %v365_v48 }
  0xb2   : > { %v1028_v49 = vpop.eup %1027  ;;  %v371_v52 = vmul.f32 %v1154_v5, %v363_v47 }
  0xb3   : > { %v1030_v50 = vpop.eup %1029  ;;  %v366_v51 = vmul.f32 10.0, %v1028_v49 }
  0xb4   : > { %v364_v53 = vmul.f32 10.0, %v1030_v50 }
  0xb5   : > { %v374_v55 = vmul.f32 %v1152_v4, %v366_v51 }
  0xb6   : > { %v1032_v56 = vpop.eup %1031  ;;  %v372_v57 = vmul.f32 %v1156_v6, %v364_v53 }
  0xb7   : > { %v1034_v58 = vpop.eup %1033  ;;  %v362_v59 = vmul.f32 10.0, %v1032_v56  ;;  %v378_v60 = vpack.c.bf16 %v374_v55, %v373_v54 }
  0xb8   : > { %v361_v61 = vmul.f32 10.0, %v1034_v58  ;;  %v377_v62 = vpack.c.bf16 %v372_v57, %v371_v52 }
  0xb9   : > { %978 = vmatprep.subr.msk.bf16.mxu0 %vm318_vm0, %v378_v60  ;;  %v429_v63 = vsel %vm318_vm0, %v378_v60, 0  ;;  %v370_v1 = vmul.f32 %v1158_v8, %v362_v59 }
  0xba   : > { %963 = vmatpush3.bf16.xpose.msra.mxu0 %v429_v63  ;;  %v1036_v0 = vpop.eup %1035  ;;  %v369_v2 = vmul.f32 %v1160_v9, %v361_v61  ;;  %v426_v7 = vsel %vm318_vm0, %v377_v62, 0 }
  0xbb   : > { %979 = vmatprep.subr.msk.bf16.mxu0 %vm318_vm0, %v377_v62  ;;  %v1038_v3 = vpop.eup %1037  ;;  %v360_v4 = vmul.f32 10.0, %v1036_v0 }
  0xbc   : > { %v359_v5 = vmul.f32 10.0, %v1038_v3  ;;  %v376_v6 = vpack.c.bf16 %v370_v1, %v369_v2 }
  0xbd   : > { %v368_v10 = vmul.f32 %v1172_v16, %v360_v4 }
  0xbe   : > { %v367_v11 = vmul.f32 %v1174_v17, %v359_v5  ;;  %v423_v8 = vsel %vm318_vm0, %v376_v6, 0  ;;  %v1218_v17 = vld [vmem:[%s281_s28] ss:$0 sm:$0xff] }
  0xc0   : > { %v375_v9 = vpack.c.bf16 %v368_v10, %v367_v11 }
  0xc2   : > { %965 = vmatpush3.bf16.xpose.msra.mxu0 %v426_v7  ;;  %v420_v12 = vsel %vm318_vm0, %v375_v9, 0 }
  0xc3   : > { %980 = vmatprep.subr.msk.bf16.mxu0 %vm318_vm0, %v376_v6 }
  0xca   : > { %967 = vmatpush3.bf16.xpose.msra.mxu0 %v423_v8 }
  0xcb   : > { %981 = vmatprep.subr.msk.bf16.mxu0 %vm318_vm0, %v375_v9 }
  0xd2   : > { %969 = vmatpush3.bf16.xpose.msra.mxu0 %v420_v12 }
  0xd9   : > { %971 = vmatmul.mubr.msk.bf16.vlgmr.msra.gmra.mxu0 %vm318_vm0, %v1008_v13 }
  0xda   : > { %974 = vmatprep.mubr.msk.bf16.mxu0 %vm318_vm0, %v1009_v14 }
  0xe1   : > { %975 = vmatmul.mubr.msk.bf16.gmra.mxu0 %vm318_vm0, %v1010_v15 }
 0x199   : > { %v972_v16 = vpop.f32.mrf.mxu0 }
 0x19a   : > { %v505_v21 = vmul.f32 %v972_v16, %v1218_v17 }
 0x19b   : > { %v465_v18 = vpop.f32.mrf.mxu0 }
 0x19c   : > { %v503_v19 = vmul.f32 %v1218_v17, %v465_v18  ;;  %v518_v27 = vsel %vm511_vm1, %v505_v21, -inf  ;;  %v1011_v18 = vld [vmem:[%s278_s6 + $0x34] ss:$8 sps:$4 sm:$0xff]  }
 0x19d   : > { %v973_v20 = vpop.f32.mrf.mxu0  ;;  %688 = vmatprep.subr.bf16.mxu1 %v1011_v18 }
 0x19e   : > { %v512_v22 = vsel %vm511_vm1, %v503_v19, -inf  ;;  %v506_v26 = vmul.f32 %v973_v20, %v1218_v17  ;;  %v1014_v20 = vld [vmem:[%s278_s6 + $0x24] ss:$8 sps:$4 sm:$0xff]  }
 0x19f   : > { %513 = vmax.xlane.f32.xlu0 %v512_v22  ;;  %v468_v23 = vpop.f32.mrf.mxu0  ;;  %v1017_v22 = vld [vmem:[%s278_s6 + $0x14] ss:$8 sps:$4 sm:$0xff]  }
 0x1a0   : > { %v504_v24 = vmul.f32 %v1218_v17, %v468_v23  ;;  %v521_v33 = vsel %vm511_vm1, %v506_v26, -inf  ;;  %v1019_v23 = vld [vmem:[%s278_s6 + $0x10] ss:$8 sps:$4 sm:$0xff]  }
 0x1a1   : > { %v976_v25 = vpop.f32.mrf.mxu0 }
 0x1a2   : > { %v515_v28 = vsel %vm511_vm1, %v504_v24, -inf  ;;  %v509_v30 = vmul.f32 %v976_v25, %v1218_v17  ;;  %v1095_v25 = vmov 0  }
 0x1a3   : > { %519 = vmax.xlane.f32.xlu0 %v518_v27  ;;  %516 = vmax.xlane.f32.xlu1 %v515_v28  ;;  %v481_v29 = vpop.f32.mrf.mxu0 }
 0x1a4   : > { %v507_v31 = vmul.f32 %v1218_v17, %v481_v29  ;;  %v530_v37 = vsel %vm511_vm1, %v509_v30, -inf  ;;  %712 = vmatprep.mubr.bf16.mxu1 %v1095_v25 }
 0x1a5   : > { %v977_v32 = vpop.f32.mrf.mxu0 }
 0x1a6   : > { %v524_v34 = vsel %vm511_vm1, %v507_v31, -inf  ;;  %v510_v38 = vmul.f32 %v977_v32, %v1218_v17 }
 0x1a7   : > { %522 = vmax.xlane.f32.xlu1 %v521_v33  ;;  %525 = vmax.xlane.f32.xlu0 %v524_v34  ;;  %v484_v35 = vpop.f32.mrf.mxu0 }
 0x1a8   : > { %v508_v36 = vmul.f32 %v1218_v17, %v484_v35  ;;  %v533_v40 = vsel %vm511_vm1, %v510_v38, -inf }
 0x1aa   : > { %v527_v39 = vsel %vm511_vm1, %v508_v36, -inf }
 0x1ab   : > { %531 = vmax.xlane.f32.xlu0 %v530_v37  ;;  %528 = vmax.xlane.f32.xlu1 %v527_v39 }
 0x1af   : > { %534 = vmax.xlane.f32.xlu1 %v533_v40 }
 0x228   : > { %v514_v41 = vpop.xlane.xlu0 %513 }
 0x229   : > { %v536_v42 = vsub.f32 %v503_v19, %v514_v41  ;;  %v1013_v19 = vld [vmem:[%s278_s6 + $0x30] ss:$8 sps:$4 sm:$0xff]  }
 0x22a   : > { %689 = vmatpush1.bf16.msra.mxu1 %v1013_v19 }
 0x22b   : > { %v544_v43 = vmul.f32 1.442695, %v536_v42  ;;  %690 = vmatprep.subr.bf16.mxu1 %v1014_v20 }
 0x22c   : > { %v520_v44 = vpop.xlane.xlu0 %519  ;;  %v517_v45 = vpop.xlane.xlu1 %516 }
 0x22d   : > { %1039 = vpow2.f32 %v544_v43  ;;  %v538_v46 = vsub.f32 %v505_v21, %v520_v44  ;;  %v537_v47 = vsub.f32 %v504_v24, %v517_v45  ;;  %v1016_v21 = vld [vmem:[%s278_s6 + $0x20] ss:$8 sps:$4 sm:$0xff]   ;;  %v1020_v24 = vld [vmem:[%s278_s6 + $0x4] ss:$8 sps:$4 sm:$0xff]  }
 0x22e   : > { %691 = vmatpush1.bf16.msra.mxu1 %v1016_v21 }
 0x22f   : > { %v548_v48 = vmul.f32 1.442695, %v538_v46  ;;  %v546_v49 = vmul.f32 1.442695, %v537_v47  ;;  %692 = vmatprep.subr.bf16.mxu1 %v1017_v22 }
 0x230   : > { %v523_v50 = vpop.xlane.xlu1 %522  ;;  %v526_v51 = vpop.xlane.xlu0 %525 }
 0x231   : > { %1041 = vpow2.f32 %v548_v48  ;;  %v539_v52 = vsub.f32 %v506_v26, %v523_v50  ;;  %v540_v53 = vsub.f32 %v507_v31, %v526_v51  ;;  %v1022_v26 = vld [vmem:[%s278_s6] ss:$8 sps:$4 sm:$0xff]  }
 0x232   : > { %1043 = vpow2.f32 %v546_v49  ;;  %693 = vmatpush1.bf16.msra.mxu1 %v1019_v23 }
 0x233   : > { %v550_v54 = vmul.f32 1.442695, %v539_v52  ;;  %v552_v55 = vmul.f32 1.442695, %v540_v53  ;;  %694 = vmatprep.subr.bf16.mxu1 %v1020_v24 }
 0x234   : > { %v532_v56 = vpop.xlane.xlu0 %531  ;;  %v529_v57 = vpop.xlane.xlu1 %528 }
 0x235   : > { %1045 = vpow2.f32 %v550_v54  ;;  %v542_v58 = vsub.f32 %v509_v30, %v532_v56  ;;  %v541_v59 = vsub.f32 %v508_v36, %v529_v57 }
 0x236   : > { %1047 = vpow2.f32 %v552_v55  ;;  %695 = vmatpush1.bf16.msra.mxu1 %v1022_v26 }
 0x237   : > { %v556_v60 = vmul.f32 1.442695, %v542_v58  ;;  %v554_v61 = vmul.f32 1.442695, %v541_v59 }
 0x238   : > { %v535_v62 = vpop.xlane.xlu1 %534 }
 0x239   : > { %1049 = vpow2.f32 %v556_v60  ;;  %v543_v63 = vsub.f32 %v510_v38, %v535_v62 }
 0x23a   : > { %v1040_v0 = vpop.eup %1039  ;;  %1051 = vpow2.f32 %v554_v61 }
 0x23b   : > { %v558_v1 = vmul.f32 1.442695, %v543_v63  ;;  %v560_v2 = vsel %vm511_vm1, %v1040_v0, 0.0 }
 0x23c   : > { %561 = vadd.xlane.f32.xlu0 %v560_v2 }
 0x23d   : > { %1053 = vpow2.f32 %v558_v1 }
 0x23e   : > { %v1237_v3 = vpop.eup %1041 }
 0x23f   : > { %v1044_v4 = vpop.eup %1043  ;;  %v566_v5 = vsel %vm511_vm1, %v1237_v3, 0.0 }
 0x240   : > { %567 = vadd.xlane.f32.xlu0 %v566_v5  ;;  %v563_v6 = vsel %vm511_vm1, %v1044_v4, 0.0 }
 0x241   : > { %564 = vadd.xlane.f32.xlu1 %v563_v6 }
 0x242   : > { %v1046_v7 = vpop.eup %1045 }
 0x243   : > { %v1242_v10 = vpop.eup %1047  ;;  %v569_v11 = vsel %vm511_vm1, %v1046_v7, 0.0 }
 0x244   : > { %v572_v8 = vsel %vm511_vm1, %v1242_v10, 0.0 }
 0x245   : > { %573 = vadd.xlane.f32.xlu0 %v572_v8  ;;  %570 = vadd.xlane.f32.xlu1 %v569_v11 }
 0x246   : > { %v1247_v9 = vpop.eup %1049 }
 0x247   : > { %v1249_v12 = vpop.eup %1051  ;;  %v578_v13 = vsel %vm511_vm1, %v1247_v9, 0.0 }
 0x248   : > { %v575_v14 = vsel %vm511_vm1, %v1249_v12, 0.0 }
 0x249   : > { %579 = vadd.xlane.f32.xlu0 %v578_v13  ;;  %576 = vadd.xlane.f32.xlu1 %v575_v14 }
 0x24a   : > { %v1255_v15 = vpop.eup %1053 }
 0x24b   : > { %v581_v16 = vsel %vm511_vm1, %v1255_v15, 0.0 }
 0x24d   : > { %582 = vadd.xlane.f32.xlu1 %v581_v16 }
 0x2c5   : > { %v562_v27 = vpop.xlane.xlu0 %561 }
 0x2c6   : > { %1055 = vrcp.f32 %v562_v27 }
 0x2c9   : > { %v568_v28 = vpop.xlane.xlu0 %567 }
 0x2ca   : > { %v565_v29 = vpop.xlane.xlu1 %564 }
 0x2cb   : > { %1057 = vrcp.f32 %v565_v29 }
 0x2cc   : > { %1059 = vrcp.f32 %v568_v28 }
 0x2ce   : > { %v571_v30 = vpop.xlane.xlu1 %570  ;;  %v574_v31 = vpop.xlane.xlu0 %573 }
 0x2cf   : > { %1061 = vrcp.f32 %v571_v30 }
 0x2d2   : > { %v577_v32 = vpop.xlane.xlu1 %576  ;;  %v580_v40 = vpop.xlane.xlu0 %579 }
 0x2d3   : > { %v1056_v33 = vpop.eup %1055  ;;  %1063 = vrcp.f32 %v577_v32 }
 0x2d4   : > { %1065 = vrcp.f32 %v574_v31  ;;  %v592_v34 = vmul.f32 %v1056_v33, %v1040_v0 }
 0x2d6   : > { %v583_v36 = vpop.xlane.xlu1 %582  ;;  %v600_v38 = vmul.f32 %v1218_v17, %v592_v34 }
 0x2d7   : > { %1067 = vrcp.f32 %v583_v36 }
 0x2d8   : > { %v1058_v35 = vpop.eup %1057  ;;  %1069 = vrcp.f32 %v580_v40  ;;  %v608_v43 = vmax.f32 %v600_v38, 1e-08 }
 0x2d9   : > { %v593_v37 = vmul.f32 %v1058_v35, %v1044_v4  ;;  %v1060_v39 = vpop.eup %1059 }
 0x2da   : > { %v594_v45 = vmul.f32 %v1060_v39, %v1237_v3 }
 0x2db   : > { %v601_v41 = vmul.f32 %v1218_v17, %v593_v37 }
 0x2dc   : > { %v1062_v42 = vpop.eup %1061  ;;  %v602_v50 = vmul.f32 %v1218_v17, %v594_v45 }
 0x2dd   : > { %v609_v44 = vmax.f32 %v601_v41, 1e-08  ;;  %v595_v46 = vmul.f32 %v1062_v42, %v1046_v7 }
 0x2de   : > { %v610_v54 = vmax.f32 %v602_v50, 1e-08 }
 0x2df   : > { %v616_v47 = vpack.c.bf16 %v609_v44, %v608_v43  ;;  %v603_v48 = vmul.f32 %v1218_v17, %v595_v46 }
 0x2e0   : > { %v1064_v49 = vpop.eup %1063 }
 0x2e1   : > { %925 = vmatmul.mubr.msk.bf16.vlgmr.msra.gmra.mxu1 %vm511_vm1, %v616_v47  ;;  %v1066_v51 = vpop.eup %1065  ;;  %v611_v52 = vmax.f32 %v603_v48, 1e-08  ;;  %v597_v53 = vmul.f32 %v1064_v49, %v1249_v12 }
 0x2e2   : > { %722 = vmatprep.mubr.bf16.mxu1 %v1095_v25  ;;  %v596_v55 = vmul.f32 %v1066_v51, %v1242_v10 }
 0x2e3   : > { %v617_v56 = vpack.c.bf16 %v611_v52, %v610_v54  ;;  %v605_v57 = vmul.f32 %v1218_v17, %v597_v53 }
 0x2e4   : > { %v1068_v58 = vpop.eup %1067  ;;  %v604_v59 = vmul.f32 %v1218_v17, %v596_v55 }
 0x2e5   : > { %v1070_v60 = vpop.eup %1069  ;;  %v613_v61 = vmax.f32 %v605_v57, 1e-08  ;;  %v599_v62 = vmul.f32 %v1068_v58, %v1255_v15 }
 0x2e6   : > { %v612_v63 = vmax.f32 %v604_v59, 1e-08  ;;  %v598_v0 = vmul.f32 %v1070_v60, %v1247_v9 }
 0x2e7   : > { %v607_v2 = vmul.f32 %v1218_v17, %v599_v62 }
 0x2e8   : > { %v618_v1 = vpack.c.bf16 %v613_v61, %v612_v63  ;;  %v606_v3 = vmul.f32 %v1218_v17, %v598_v0 }
 0x2e9   : > { %926 = vmatmul.mubr.msk.bf16.gmra.mxu1 %vm511_vm1, %v617_v56  ;;  %v615_v4 = vmax.f32 %v607_v2, 1e-08 }
 0x2ea   : > { %732 = vmatprep.mubr.bf16.mxu1 %v1095_v25  ;;  %v614_v5 = vmax.f32 %v606_v3, 1e-08 }
 0x2ec   : > { %v619_v6 = vpack.c.bf16 %v615_v4, %v614_v5 }
 0x2f1   : > { %927 = vmatmul.mubr.msk.bf16.gmra.mxu1 %vm511_vm1, %v618_v1 }
 0x2f2   : > { %742 = vmatprep.mubr.bf16.mxu1 %v1095_v25 }
 0x2f9   : > { %928 = vmatmul.mubr.msk.bf16.gmra.mxu1 %vm511_vm1, %v619_v6 }
 0x3a1   : > { %v714_v17 = vpop.f32.mrf.mxu1 }
 0x3a2   : > { %753 = vst [vmem:[%s1284_s10] sm:$0xff] %v714_v17 }
 0x3a3   : > { %v716_v7 = vpop.f32.mrf.mxu1 }
 0x3a4   : > { %754 = vst [vmem:[%s1284_s10 + $0x8] sm:$0xff] %v716_v7 }
 0x3a5   : > { %v718_v10 = vpop.f32.mrf.mxu1 }
 0x3a6   : > { %755 = vst [vmem:[%s1284_s10 + $0x10] sm:$0xff] %v718_v10 }
 0x3a7   : > { %v720_v11 = vpop.f32.mrf.mxu1 }
 0x3a8   : > { %756 = vst [vmem:[%s1284_s10 + $0x18] sm:$0xff] %v720_v11 }
 0x3a9   : > { %v724_v8 = vpop.f32.mrf.mxu1 }
 0x3aa   : > { %757 = vst [vmem:[%s1284_s10 + $0x20] sm:$0xff] %v724_v8 }
 0x3ab   : > { %v726_v9 = vpop.f32.mrf.mxu1 }
 0x3ac   : > { %758 = vst [vmem:[%s1284_s10 + $0x28] sm:$0xff] %v726_v9 }
 0x3ad   : > { %v728_v12 = vpop.f32.mrf.mxu1 }
 0x3ae   : > { %759 = vst [vmem:[%s1284_s10 + $0x30] sm:$0xff] %v728_v12 }
 0x3af   : > { %v730_v13 = vpop.f32.mrf.mxu1 }
 0x3b0   : > { %760 = vst [vmem:[%s1284_s10 + $0x38] sm:$0xff] %v730_v13 }
 0x3b1   : > { %v734_v14 = vpop.f32.mrf.mxu1 }
 0x3b2   : > { %761 = vst [vmem:[%s1284_s10 + $0x40] sm:$0xff] %v734_v14 }
 0x3b3   : > { %v736_v15 = vpop.f32.mrf.mxu1 }
 0x3b4   : > { %762 = vst [vmem:[%s1284_s10 + $0x48] sm:$0xff] %v736_v15 }
 0x3b5   : > { %v738_v16 = vpop.f32.mrf.mxu1 }
 0x3b6   : > { %763 = vst [vmem:[%s1284_s10 + $0x50] sm:$0xff] %v738_v16 }
 0x3b7   : > { %v740_v18 = vpop.f32.mrf.mxu1 }
 0x3b8   : > { %764 = vst [vmem:[%s1284_s10 + $0x58] sm:$0xff] %v740_v18 }
 0x3b9   : > { %v744_v19 = vpop.f32.mrf.mxu1 }
 0x3ba   : > { %765 = vst [vmem:[%s1284_s10 + $0x60] sm:$0xff] %v744_v19 }
 0x3bb   : > { %v746_v20 = vpop.f32.mrf.mxu1 }
 0x3bc   : > { %766 = vst [vmem:[%s1284_s10 + $0x68] sm:$0xff] %v746_v20 }
 0x3bd   : > { %v748_v21 = vpop.f32.mrf.mxu1 }
 0x3be   : > { %767 = vst [vmem:[%s1284_s10 + $0x70] sm:$0xff] %v748_v21 }
 0x3bf   : > { %v750_v22 = vpop.f32.mrf.mxu1 }
 0x3c0   : > { %768 = vst [vmem:[%s1284_s10 + $0x78] sm:$0xff] %v750_v22 }
 0x3c1 PF: > { %s14_s17 = sadd.s32 1, %s1093_s17   ;;  %s1316_s15 = smov %s1089_s16 }
 0x3c2   : > { %p11_p5 = scmp.ge.s32.totalorder %s14_s17, 4   ;;  %s1317_s16 = smov %s1319_s18 }
 0x3c4   :  { %13 = sbr.rel (!%p11_p5) target bundleno = 2 (0x2), region = 75 }

// kernel: atn_conv_forward.3
= control target key start
LH: loop header
LB: loop body
LE: loop exit
PB: predicated region body
PF: predicated region fallthrough
CT: control target
= control target key end

     0   :  { %s3389_s12 = smov 0   ;;  %s4206_s0 = inlined_call_operand.vmem [shape: bf16[2,16,1056], index: 0, kind: input, shape index: {}]   ;;  %s4207_s1 = inlined_call_operand.vmem [shape: bf16[4,4,144], index: 1, kind: input, shape index: {}]   ;;  %s4208_s2 = inlined_call_operand.vmem [shape: f32[4,4,1], index: 2, kind: input, shape index: {}]   ;;  %s4209_s3 = inlined_call_operand.vmem [shape: f32[2,4,4,512], index: 3, kind: output, shape index: {}]  }
   0x1 LB: > { %s3125_s13 = sadd.s32 4294967295, %s3349_s12   ;;  %p3129_p0 = scmp.ge.s32.totalorder %s3349_s12, 1  ;;  %s3349_s12 = sphi %s3389_s12, %s13_s12  }
   0x2   : > { %p137_p1 = scmp.lt.s32.totalorder %s3349_s12, 3 }
   0x4   : > { %p138_p2 = pnand %p3129_p0, %p137_p1 }
   0x5   : > { %p161_p3 = scmp.lt.s32.totalorder (!%p138_p2), %s3125_s13, 1  ;;  %s3351_s18 = smov (!%p138_p2), 88  }
   0x6   : > { %141 = sbr.rel (%p138_p2) target bundleno = 736 (0x2e0), region = 32  ;;  %s3352_s19 = smov (!%p138_p2), 25  }
   0x7   : > { %s3353_s20 = smov (!%p138_p2), 89   ;;  %s3354_s21 = smov (!%p138_p2), 119  }
   0x8   : > { %s3355_s22 = smov (!%p138_p2), 120   ;;  %s3356_s23 = smov (!%p138_p2), 121  }
   0x9   : > { %s3357_s24 = smov (!%p138_p2), 23   ;;  %s3358_s25 = smov (!%p138_p2), 24  }
   0xa   : > { %s3359_s26 = smov (!%p138_p2), 87   ;;  %s3360_s29 = smov (!%p138_p2), 56  }
   0xb   : > { %s4211_s13 = smov (!%p161_p3, %s3125_s13), 1  ;;  %v3498_v26 = vld.sshfl [vmem:[%s4207_s1] sm:$0x33 pattern:$0x76325410]  ;;  %vm829_vm0 = vcmask 130048  }
   0xc   : > { %s3304_s14 = smul.u32 72, %s4211_s13  ;;  %v647_v27 = vcombine.high %v3498_v26, %v3498_v26  ;;  %s3361_s30 = smov 58   ;;  %vm202_vm1 = vcmask 1043456   ;;  %vm533_vm2 = vcmask 719872   ;;  %vm486_vm3 = vcmask 728064  }
   0xd   : > { %s3362_s4 = smov 118   ;;  %vm439_vm4 = vcmask 973824   ;;  %s3363_s5 = smov 122   ;;  %vm392_vm5 = vcmask 982016   ;;  %vm345_vm6 = vcmask 990208   ;;  %vm298_vm7 = vcmask 187392  }
   0xe   : > { %s3403_s17 = scalar_lea.vmem %s4206_s0, %s3304_s14  ;;  %3170 = vmatprep.mubr.msk.bf16.mxu0 %vm829_vm0, %v647_v27  ;;  %3171 = vmatprep.mubr.msk.bf16.mxu1 %vm829_vm0, %v647_v27  ;;  %s3364_s6 = smov 54   ;;  %vm251_vm8 = vcmask 195584   ;;  %vm204_vm9 = vcmask 203776   ;;  %vm580_vm10 = vcmask 711680   ;;  %vm1007_vm11 = vcmask 457728  }
   0xf   : > { %v3406_v0 = vld [vmem:[%s3403_s17 + $0x8] sm:$0xff]  ;;  %v3415_v2 = vld [vmem:[%s3403_s17 + $0x10] sm:$0xff]  ;;  %v504_v5 = vld [vmem:[%s3403_s17 + $0x18] sm:$0xf]  ;;  %s3365_s9 = smov 124   ;;  %s3366_s10 = smov 116  }
  0x10   : > { %v3409_v1 = vld [vmem:[%s3403_s17 + $0x4] sm:$0xff]  ;;  %514 = vrot.lane.b32.xlu1 %v3406_v0, %s3351_s18  ;;  %v3418_v3 = vld [vmem:[%s3403_s17 + $0xc] sm:$0xff]  ;;  %v507_v6 = vld [vmem:[%s3403_s17 + $0x3c] sm:$0xf]  ;;  %vm960_vm12 = vcmask 474112   ;;  %vm1194_vm13 = vcmask 965632  }
  0x11   : > { %184 = vrot.lane.b32.xlu0 %v3409_v1, %s3352_s19  ;;  %v3424_v4 = vld [vmem:[%s3403_s17 + $0x2c] sm:$0xff]  ;;  %v3430_v7 = vld [vmem:[%s3403_s17 + $0x34] sm:$0xff]  ;;  %v460_v9 = vld [vmem:[%s3403_s17 + $0x3c] sm:$0xf]  ;;  %vm1101_vm14 = vcmask 998400   ;;  %vm1054_vm15 = vcmask 441344  }
  0x12   : > { %v457_v8 = vld [vmem:[%s3403_s17 + $0x18] sm:$0xf]  ;;  %v413_v11 = vld [vmem:[%s3403_s17 + $0x3c] sm:$0xf]  ;;  %v3466_v16 = vld [vmem:[%s3403_s17 + $0x28] sm:$0xff]  ;;  %s3367_s15 = smov 112  }
  0x13   : > { %v410_v10 = vld [vmem:[%s3403_s17 + $0x18] sm:$0xf]  ;;  %v366_v13 = vld [vmem:[%s3403_s17 + $0x3c] sm:$0xf]  ;;  %v269_v17 = vld [vmem:[%s3403_s17 + $0x14] sm:$0xf] }
  0x14   : > { %516 = vrot.lane.b32.xlu1 %v3415_v2, %s3351_s18  ;;  %v363_v12 = vld [vmem:[%s3403_s17 + $0x18] sm:$0xf]  ;;  %v319_v15 = vld [vmem:[%s3403_s17 + $0x3c] sm:$0xf]  ;;  %v3472_v19 = vld [vmem:[%s3403_s17 + $0x30] sm:$0xff] }
  0x15   : > { %186 = vrot.lane.b32.xlu0 %v3418_v3, %s3352_s19  ;;  %v316_v14 = vld [vmem:[%s3403_s17 + $0x18] sm:$0xf]  ;;  %v222_v20 = vld [vmem:[%s3403_s17 + $0x14] sm:$0xf]  ;;  %v554_v25 = vld [vmem:[%s3403_s17 + $0x3c] sm:$0xf] }
  0x16   : > { %v272_v18 = vld [vmem:[%s3403_s17 + $0x38] sm:$0xf]  ;;  %v174_v22 = vld [vmem:[%s3403_s17 + $0x14] sm:$0xf]  ;;  %v1261_v29 = vld [vmem:[%s3403_s17 + $0x3c] sm:$0xf] }
  0x17   : > { %v225_v21 = vld [vmem:[%s3403_s17 + $0x38] sm:$0xf]  ;;  %v1215_v40 = vld [vmem:[%s3403_s17 + $0x3c] sm:$0xf] }
  0x18   : > { %520 = vrot.lane.b32.xlu1 %v3424_v4, %s3351_s18  ;;  %v177_v23 = vld [vmem:[%s3403_s17 + $0x38] sm:$0xf] }
  0x19   : > { %518 = vrot.lane.b32.xlu0 %v504_v5, %s3351_s18  ;;  %v551_v24 = vld [vmem:[%s3403_s17 + $0x18] sm:$0xf] }
  0x1a   : > { %v1258_v28 = vld [vmem:[%s3403_s17 + $0x18] sm:$0xf] }
  0x1b   : > { %v1212_v34 = vld [vmem:[%s3403_s17 + $0x18] sm:$0xf] }
  0x1c   : > { %524 = vrot.lane.b32.xlu1 %v507_v6, %s3351_s18  ;;  %v1165_v60 = vld [vmem:[%s3403_s17 + $0x18] sm:$0xf] }
  0x1d   : > { %522 = vrot.lane.b32.xlu0 %v3430_v7, %s3351_s18 }
  0x20   : > { %469 = vrot.lane.b32.xlu1 %v3415_v2, %s3353_s20 }
  0x21   : > { %467 = vrot.lane.b32.xlu0 %v3406_v0, %s3353_s20 }
  0x24   : > { %473 = vrot.lane.b32.xlu1 %v3424_v4, %s3353_s20 }
  0x25   : > { %471 = vrot.lane.b32.xlu0 %v457_v8, %s3353_s20  ;;  %v1168_v8 = vld [vmem:[%s3403_s17 + $0x3c] sm:$0xf] }
  0x28   : > { %477 = vrot.lane.b32.xlu1 %v460_v9, %s3353_s20 }
  0x29   : > { %475 = vrot.lane.b32.xlu0 %v3430_v7, %s3353_s20 }
  0x2c   : > { %422 = vrot.lane.b32.xlu1 %v3415_v2, %s3354_s21 }
  0x2d   : > { %420 = vrot.lane.b32.xlu0 %v3406_v0, %s3354_s21 }
  0x30   : > { %426 = vrot.lane.b32.xlu1 %v3424_v4, %s3354_s21 }
  0x31   : > { %424 = vrot.lane.b32.xlu0 %v410_v10, %s3354_s21 }
  0x34   : > { %430 = vrot.lane.b32.xlu1 %v413_v11, %s3354_s21 }
  0x35   : > { %428 = vrot.lane.b32.xlu0 %v3430_v7, %s3354_s21 }
  0x38   : > { %375 = vrot.lane.b32.xlu1 %v3415_v2, %s3355_s22 }
  0x39   : > { %373 = vrot.lane.b32.xlu0 %v3406_v0, %s3355_s22 }
  0x3c   : > { %379 = vrot.lane.b32.xlu1 %v3424_v4, %s3355_s22 }
  0x3d   : > { %377 = vrot.lane.b32.xlu0 %v363_v12, %s3355_s22 }
  0x40   : > { %383 = vrot.lane.b32.xlu1 %v366_v13, %s3355_s22 }
  0x41   : > { %381 = vrot.lane.b32.xlu0 %v3430_v7, %s3355_s22 }
  0x44   : > { %328 = vrot.lane.b32.xlu1 %v3415_v2, %s3356_s23 }
  0x45   : > { %326 = vrot.lane.b32.xlu0 %v3406_v0, %s3356_s23 }
  0x48   : > { %332 = vrot.lane.b32.xlu1 %v3424_v4, %s3356_s23 }
  0x49   : > { %330 = vrot.lane.b32.xlu0 %v316_v14, %s3356_s23 }
  0x4c   : > { %336 = vrot.lane.b32.xlu1 %v319_v15, %s3356_s23 }
  0x4d   : > { %334 = vrot.lane.b32.xlu0 %v3430_v7, %s3356_s23 }
  0x50   : > { %281 = vrot.lane.b32.xlu1 %v3418_v3, %s3357_s24 }
  0x51   : > { %279 = vrot.lane.b32.xlu0 %v3409_v1, %s3357_s24 }
  0x54   : > { %285 = vrot.lane.b32.xlu1 %v3466_v16, %s3357_s24 }
  0x55   : > { %283 = vrot.lane.b32.xlu0 %v269_v17, %s3357_s24 }
  0x58   : > { %289 = vrot.lane.b32.xlu1 %v272_v18, %s3357_s24 }
  0x59   : > { %287 = vrot.lane.b32.xlu0 %v3472_v19, %s3357_s24 }
  0x5c   : > { %234 = vrot.lane.b32.xlu1 %v3418_v3, %s3358_s25 }
  0x5d   : > { %232 = vrot.lane.b32.xlu0 %v3409_v1, %s3358_s25 }
  0x60   : > { %238 = vrot.lane.b32.xlu1 %v3466_v16, %s3358_s25 }
  0x61   : > { %236 = vrot.lane.b32.xlu0 %v222_v20, %s3358_s25 }
  0x64   : > { %242 = vrot.lane.b32.xlu1 %v225_v21, %s3358_s25 }
  0x65   : > { %240 = vrot.lane.b32.xlu0 %v3472_v19, %s3358_s25 }
  0x68   : > { %190 = vrot.lane.b32.xlu1 %v3466_v16, %s3352_s19 }
  0x69   : > { %188 = vrot.lane.b32.xlu0 %v174_v22, %s3352_s19 }
  0x6c   : > { %194 = vrot.lane.b32.xlu1 %v177_v23, %s3352_s19 }
  0x6d   : > { %192 = vrot.lane.b32.xlu0 %v3472_v19, %s3352_s19 }
  0x70   : > { %563 = vrot.lane.b32.xlu1 %v3415_v2, %s3359_s26 }
  0x71   : > { %561 = vrot.lane.b32.xlu0 %v3406_v0, %s3359_s26 }
  0x74   : > { %567 = vrot.lane.b32.xlu1 %v3424_v4, %s3359_s26 }
  0x75   : > { %565 = vrot.lane.b32.xlu0 %v551_v24, %s3359_s26 }
  0x78   : > { %571 = vrot.lane.b32.xlu1 %v554_v25, %s3359_s26 }
  0x79   : > { %569 = vrot.lane.b32.xlu0 %v3430_v7, %s3359_s26 }
  0x7c   : > { %1270 = vrot.lane.b32.xlu1 %v3415_v2, %s3360_s29 }
  0x7d   : > { %1268 = vrot.lane.b32.xlu0 %v3406_v0, %s3360_s29 }
  0x80   : > { %1274 = vrot.lane.b32.xlu1 %v3424_v4, %s3360_s29 }
  0x81   : > { %1272 = vrot.lane.b32.xlu0 %v1258_v28, %s3360_s29 }
  0x82   : > { %v515_v30 = vpop.permute.xlu1 %514 }
  0x83   : > { %v3513_v31 = vpop.permute.xlu0 %184  ;;  %v526_v39 = vrot.slane %v515_v30, 4 }
  0x84   : > { %1278 = vrot.lane.b32.xlu1 %v1261_v29, %s3360_s29 }
  0x85   : > { %1276 = vrot.lane.b32.xlu0 %v3430_v7, %s3360_s29 }
  0x86   : > { %v517_v32 = vpop.permute.xlu1 %516 }
  0x87   : > { %v3518_v33 = vpop.permute.xlu0 %186  ;;  %v527_v35 = vrot.slane %v517_v32, 4 }
  0x88   : > { %1224 = vrot.lane.b32.xlu1 %v3415_v2, %s3361_s30 }
  0x89   : > { %1222 = vrot.lane.b32.xlu0 %v3406_v0, %s3361_s30  ;;  %v532_v43 = vsel %vm202_vm1, %v526_v39, %v527_v35  ;;  %v1122_v39 = vld [vmem:[%s3403_s17 + $0x3c] sm:$0xf] }
  0x8a   : > { %v521_v36 = vpop.permute.xlu1 %520  ;;  %v534_v52 = vsel %vm533_vm2, %v515_v30, %v532_v43 }
  0x8b   : > { %v519_v37 = vpop.permute.xlu0 %518  ;;  %v529_v44 = vrot.slane %v521_v36, 4 }
  0x8c   : > { %v528_v38 = vrot.slane %v519_v37, 4  ;;  %1228 = vrot.lane.b32.xlu1 %v3424_v4, %s3361_s30 }
  0x8d   : > { %1226 = vrot.lane.b32.xlu0 %v1212_v34, %s3361_s30 }
  0x8e   : > { %v525_v41 = vpop.permute.xlu1 %524  ;;  %v535_v47 = vsel %vm202_vm1, %v527_v35, %v528_v38 }
  0x8f   : > { %v523_v42 = vpop.permute.xlu0 %522  ;;  %v531_v45 = vrot.slane %v525_v41, 4  ;;  %v536_v54 = vsel %vm533_vm2, %v517_v32, %v535_v47  ;;  %v1119_v32 = vld [vmem:[%s3403_s17 + $0x18] sm:$0xf] }
  0x90   : > { %v530_v46 = vrot.slane %v523_v42, 4  ;;  %1232 = vrot.lane.b32.xlu1 %v1215_v40, %s3361_s30 }
  0x91   : > { %1230 = vrot.lane.b32.xlu0 %v3430_v7, %s3361_s30 }
  0x92   : > { %v537_v48 = vsel %vm202_vm1, %v529_v44, %v530_v46  ;;  %v539_v49 = vsel %vm202_vm1, %v530_v46, %v531_v45  ;;  %v470_v50 = vpop.permute.xlu1 %469 }
  0x93   : > { %v468_v51 = vpop.permute.xlu0 %467  ;;  %v538_v53 = vsel %vm533_vm2, %v521_v36, %v537_v48  ;;  %v540_v55 = vsel %vm533_vm2, %v523_v42, %v539_v49  ;;  %v480_v61 = vrot.slane %v470_v50, 4  ;;  %vm1714_vm2 = vcmask 1014784  }
  0x94   : > { %v3163_v56 = vcombine.high %v534_v52, %v538_v53  ;;  %v3165_v57 = vcombine.high %v536_v54, %v540_v55  ;;  %1177 = vrot.lane.b32.xlu1 %v3415_v2, %s3362_s4  ;;  %v3162_v58 = vcombine.low %v534_v52, %v538_v53  ;;  %v3164_v59 = vcombine.low %v536_v54, %v540_v55 }
  0x95   : > { %1175 = vrot.lane.b32.xlu0 %v3406_v0, %s3362_s4  ;;  %v479_v62 = vrot.slane %v468_v51, 4 }
  0x96   : > { %833 = vmatprep.subr.bf16.mxu0 %v3163_v56  ;;  %874 = vmatprep.subr.bf16.mxu1 %v3165_v57  ;;  %v474_v63 = vpop.permute.xlu1 %473 }
  0x97   : > { %834 = vmatpush1.bf16.msra.mxu0 %v3162_v58  ;;  %875 = vmatpush1.bf16.msra.mxu1 %v3164_v59  ;;  %v472_v5 = vpop.permute.xlu0 %471  ;;  %v485_v9 = vsel %vm202_vm1, %v479_v62, %v480_v61  ;;  %v482_v12 = vrot.slane %v474_v63, 4  ;;  %v1072_v59 = vld [vmem:[%s3403_s17 + $0x18] sm:$0xf] }
  0x98   : > { %v481_v6 = vrot.slane %v472_v5, 4  ;;  %1181 = vrot.lane.b32.xlu1 %v3424_v4, %s3362_s4  ;;  %v487_v20 = vsel %vm486_vm3, %v468_v51, %v485_v9 }
  0x99   : > { %1179 = vrot.lane.b32.xlu0 %v1165_v60, %s3362_s4 }
  0x9a   : > { %v478_v10 = vpop.permute.xlu1 %477  ;;  %v488_v13 = vsel %vm202_vm1, %v480_v61, %v481_v6  ;;  %v1075_v6 = vld [vmem:[%s3403_s17 + $0x3c] sm:$0xf] }
  0x9b   : > { %v476_v11 = vpop.permute.xlu0 %475  ;;  %v484_v14 = vrot.slane %v478_v10, 4  ;;  %v489_v25 = vsel %vm486_vm3, %v470_v50, %v488_v13 }
  0x9c   : > { %v483_v15 = vrot.slane %v476_v11, 4  ;;  %1185 = vrot.lane.b32.xlu1 %v1168_v8, %s3362_s4 }
  0x9d   : > { %1183 = vrot.lane.b32.xlu0 %v3430_v7, %s3362_s4 }
  0x9e   : > { %v492_v17 = vsel %vm202_vm1, %v483_v15, %v484_v14  ;;  %v490_v18 = vsel %vm202_vm1, %v482_v12, %v483_v15  ;;  %v423_v22 = vpop.permute.xlu1 %422 }
  0x9f   : > { %v493_v21 = vsel %vm486_vm3, %v476_v11, %v492_v17  ;;  %v421_v23 = vpop.permute.xlu0 %420  ;;  %v491_v24 = vsel %vm486_vm3, %v474_v63, %v490_v18  ;;  %v433_v34 = vrot.slane %v423_v22, 4  ;;  %vm1807_vm3 = vcmask 949248  }
  0xa0   : > { %v3159_v27 = vcombine.high %v487_v20, %v491_v24  ;;  %v3161_v28 = vcombine.high %v489_v25, %v493_v21  ;;  %1131 = vrot.lane.b32.xlu1 %v3415_v2, %s3355_s22  ;;  %v3158_v29 = vcombine.low %v487_v20, %v491_v24  ;;  %v3160_v30 = vcombine.low %v489_v25, %v493_v21 }
  0xa1   : > { %1129 = vrot.lane.b32.xlu0 %v3406_v0, %s3355_s22  ;;  %v432_v35 = vrot.slane %v421_v23, 4 }
  0xa2   : > { %835 = vmatprep.subr.bf16.mxu0 %v3159_v27  ;;  %876 = vmatprep.subr.bf16.mxu1 %v3161_v28  ;;  %v427_v36 = vpop.permute.xlu1 %426 }
  0xa3   : > { %836 = vmatpush1.bf16.msra.mxu0 %v3158_v29  ;;  %877 = vmatpush1.bf16.msra.mxu1 %v3160_v30  ;;  %v425_v37 = vpop.permute.xlu0 %424  ;;  %v438_v40 = vsel %vm202_vm1, %v432_v35, %v433_v34  ;;  %v435_v43 = vrot.slane %v427_v36, 4  ;;  %v1025_v30 = vld [vmem:[%s3403_s17 + $0x14] sm:$0xf] }
  0xa4   : > { %v434_v38 = vrot.slane %v425_v37, 4  ;;  %1135 = vrot.lane.b32.xlu1 %v3424_v4, %s3355_s22  ;;  %v440_v49 = vsel %vm439_vm4, %v421_v23, %v438_v40 }
  0xa5   : > { %1133 = vrot.lane.b32.xlu0 %v1119_v32, %s3355_s22 }
  0xa6   : > { %v431_v41 = vpop.permute.xlu1 %430  ;;  %v441_v44 = vsel %vm202_vm1, %v433_v34, %v434_v38  ;;  %v1028_v38 = vld [vmem:[%s3403_s17 + $0x38] sm:$0xf] }
  0xa7   : > { %v429_v42 = vpop.permute.xlu0 %428  ;;  %v437_v45 = vrot.slane %v431_v41, 4  ;;  %v442_v54 = vsel %vm439_vm4, %v423_v22, %v441_v44 }
  0xa8   : > { %v436_v46 = vrot.slane %v429_v42, 4  ;;  %1139 = vrot.lane.b32.xlu1 %v1122_v39, %s3355_s22 }
  0xa9   : > { %1137 = vrot.lane.b32.xlu0 %v3430_v7, %s3355_s22 }
  0xaa   : > { %v445_v47 = vsel %vm202_vm1, %v436_v46, %v437_v45  ;;  %v443_v48 = vsel %vm202_vm1, %v435_v43, %v436_v46  ;;  %v376_v51 = vpop.permute.xlu1 %375 }
  0xab   : > { %v446_v50 = vsel %vm439_vm4, %v429_v42, %v445_v47  ;;  %v374_v52 = vpop.permute.xlu0 %373  ;;  %v444_v53 = vsel %vm439_vm4, %v427_v36, %v443_v48  ;;  %v386_v60 = vrot.slane %v376_v51, 4 }
  0xac   : > { %v3155_v55 = vcombine.high %v440_v49, %v444_v53  ;;  %v3157_v56 = vcombine.high %v442_v54, %v446_v50  ;;  %1084 = vrot.lane.b32.xlu1 %v3415_v2, %s3363_s5  ;;  %v3154_v57 = vcombine.low %v440_v49, %v444_v53  ;;  %v3156_v58 = vcombine.low %v442_v54, %v446_v50 }
  0xad   : > { %1082 = vrot.lane.b32.xlu0 %v3406_v0, %s3363_s5  ;;  %v385_v61 = vrot.slane %v374_v52, 4 }
  0xae   : > { %837 = vmatprep.subr.bf16.mxu0 %v3155_v55  ;;  %878 = vmatprep.subr.bf16.mxu1 %v3157_v56  ;;  %v380_v62 = vpop.permute.xlu1 %379 }
  0xaf   : > { %838 = vmatpush1.bf16.msra.mxu0 %v3154_v57  ;;  %879 = vmatpush1.bf16.msra.mxu1 %v3156_v58  ;;  %v378_v63 = vpop.permute.xlu0 %377  ;;  %v391_v8 = vsel %vm202_vm1, %v385_v61, %v386_v60  ;;  %v388_v11 = vrot.slane %v380_v62, 4  ;;  %v978_v58 = vld [vmem:[%s3403_s17 + $0x14] sm:$0xf] }
  0xb0   : > { %v387_v5 = vrot.slane %v378_v63, 4  ;;  %1088 = vrot.lane.b32.xlu1 %v3424_v4, %s3363_s5  ;;  %v393_v18 = vsel %vm392_vm5, %v374_v52, %v391_v8 }
  0xb1   : > { %1086 = vrot.lane.b32.xlu0 %v1072_v59, %s3363_s5 }
  0xb2   : > { %v384_v9 = vpop.permute.xlu1 %383  ;;  %v394_v12 = vsel %vm202_vm1, %v386_v60, %v387_v5  ;;  %v981_v5 = vld [vmem:[%s3403_s17 + $0x38] sm:$0xf] }
  0xb3   : > { %v382_v10 = vpop.permute.xlu0 %381  ;;  %v390_v13 = vrot.slane %v384_v9, 4  ;;  %v395_v24 = vsel %vm392_vm5, %v376_v51, %v394_v12 }
  0xb4   : > { %v389_v14 = vrot.slane %v382_v10, 4  ;;  %1092 = vrot.lane.b32.xlu1 %v1075_v6, %s3363_s5 }
  0xb5   : > { %1090 = vrot.lane.b32.xlu0 %v3430_v7, %s3363_s5 }
  0xb6   : > { %v398_v15 = vsel %vm202_vm1, %v389_v14, %v390_v13  ;;  %v396_v17 = vsel %vm202_vm1, %v388_v11, %v389_v14  ;;  %v329_v21 = vpop.permute.xlu1 %328 }
  0xb7   : > { %v399_v20 = vsel %vm392_vm5, %v382_v10, %v398_v15  ;;  %v327_v22 = vpop.permute.xlu0 %326  ;;  %v397_v23 = vsel %vm392_vm5, %v380_v62, %v396_v17  ;;  %v339_v32 = vrot.slane %v329_v21, 4 }
  0xb8   : > { %v3151_v25 = vcombine.high %v393_v18, %v397_v23  ;;  %v3153_v27 = vcombine.high %v395_v24, %v399_v20  ;;  %1037 = vrot.lane.b32.xlu1 %v3418_v3, %s3364_s6  ;;  %v3150_v28 = vcombine.low %v393_v18, %v397_v23  ;;  %v3152_v29 = vcombine.low %v395_v24, %v399_v20 }
  0xb9   : > { %1035 = vrot.lane.b32.xlu0 %v3409_v1, %s3364_s6  ;;  %v338_v34 = vrot.slane %v327_v22, 4 }
  0xba   : > { %839 = vmatprep.subr.bf16.mxu0 %v3151_v25  ;;  %880 = vmatprep.subr.bf16.mxu1 %v3153_v27  ;;  %v333_v35 = vpop.permute.xlu1 %332 }
  0xbb   : > { %840 = vmatpush1.bf16.msra.mxu0 %v3150_v28  ;;  %881 = vmatpush1.bf16.msra.mxu1 %v3152_v29  ;;  %v331_v36 = vpop.permute.xlu0 %330  ;;  %v344_v39 = vsel %vm202_vm1, %v338_v34, %v339_v32  ;;  %v341_v42 = vrot.slane %v333_v35, 4  ;;  %v931_v29 = vld [vmem:[%s3403_s17 + $0x14] sm:$0xf] }
  0xbc   : > { %v340_v37 = vrot.slane %v331_v36, 4  ;;  %1041 = vrot.lane.b32.xlu1 %v3466_v16, %s3364_s6  ;;  %v346_v48 = vsel %vm345_vm6, %v327_v22, %v344_v39 }
  0xbd   : > { %1039 = vrot.lane.b32.xlu0 %v1025_v30, %s3364_s6 }
  0xbe   : > { %v337_v40 = vpop.permute.xlu1 %336  ;;  %v347_v43 = vsel %vm202_vm1, %v339_v32, %v340_v37  ;;  %v934_v37 = vld [vmem:[%s3403_s17 + $0x38] sm:$0xf] }
  0xbf   : > { %v335_v41 = vpop.permute.xlu0 %334  ;;  %v343_v44 = vrot.slane %v337_v40, 4  ;;  %v348_v53 = vsel %vm345_vm6, %v329_v21, %v347_v43 }
  0xc0   : > { %v342_v45 = vrot.slane %v335_v41, 4  ;;  %1045 = vrot.lane.b32.xlu1 %v1028_v38, %s3364_s6 }
  0xc1   : > { %1043 = vrot.lane.b32.xlu0 %v3472_v19, %s3364_s6 }
  0xc2   : > { %v351_v46 = vsel %vm202_vm1, %v342_v45, %v343_v44  ;;  %v349_v47 = vsel %vm202_vm1, %v341_v42, %v342_v45  ;;  %v282_v50 = vpop.permute.xlu1 %281 }
  0xc3   : > { %v352_v49 = vsel %vm345_vm6, %v335_v41, %v351_v46  ;;  %v280_v51 = vpop.permute.xlu0 %279  ;;  %v350_v52 = vsel %vm345_vm6, %v333_v35, %v349_v47  ;;  %v292_v59 = vrot.slane %v282_v50, 4 }
  0xc4   : > { %v3147_v54 = vcombine.high %v346_v48, %v350_v52  ;;  %v3149_v55 = vcombine.high %v348_v53, %v352_v49  ;;  %990 = vrot.lane.b32.xlu1 %v3418_v3, %s3360_s29  ;;  %v3146_v56 = vcombine.low %v346_v48, %v350_v52  ;;  %v3148_v57 = vcombine.low %v348_v53, %v352_v49 }
  0xc5   : > { %988 = vrot.lane.b32.xlu0 %v3409_v1, %s3360_s29  ;;  %v291_v60 = vrot.slane %v280_v51, 4 }
  0xc6   : > { %841 = vmatprep.subr.bf16.mxu0 %v3147_v54  ;;  %882 = vmatprep.subr.bf16.mxu1 %v3149_v55  ;;  %v286_v61 = vpop.permute.xlu1 %285  ;;  %v196_v55 = vrot.slane %v3513_v31, 4 }
  0xc7   : > { %842 = vmatpush1.bf16.msra.mxu0 %v3146_v56  ;;  %883 = vmatpush1.bf16.msra.mxu1 %v3148_v57  ;;  %v284_v62 = vpop.permute.xlu0 %283  ;;  %v297_v6 = vsel %vm202_vm1, %v291_v60, %v292_v59  ;;  %v294_v10 = vrot.slane %v286_v61, 4 }
  0xc8   : > { %v293_v63 = vrot.slane %v284_v62, 4  ;;  %994 = vrot.lane.b32.xlu1 %v3466_v16, %s3360_s29  ;;  %v299_v17 = vsel %vm298_vm7, %v280_v51, %v297_v6  ;;  %v1307_v6 = vld [vmem:[%s3403_s17 + $0x3c] sm:$0xf] }
  0xc9   : > { %992 = vrot.lane.b32.xlu0 %v978_v58, %s3360_s29  ;;  %v1304_v58 = vld [vmem:[%s3403_s17 + $0x18] sm:$0xf] }
  0xca   : > { %v290_v8 = vpop.permute.xlu1 %289  ;;  %v300_v11 = vsel %vm202_vm1, %v292_v59, %v293_v63 }
  0xcb   : > { %v288_v9 = vpop.permute.xlu0 %287  ;;  %v296_v12 = vrot.slane %v290_v8, 4  ;;  %v301_v23 = vsel %vm298_vm7, %v282_v50, %v300_v11 }
  0xcc   : > { %v295_v13 = vrot.slane %v288_v9, 4  ;;  %998 = vrot.lane.b32.xlu1 %v981_v5, %s3360_s29 }
  0xcd   : > { %996 = vrot.lane.b32.xlu0 %v3472_v19, %s3360_s29 }
  0xce   : > { %v304_v14 = vsel %vm202_vm1, %v295_v13, %v296_v12  ;;  %v302_v15 = vsel %vm202_vm1, %v294_v10, %v295_v13  ;;  %v235_v20 = vpop.permute.xlu1 %234 }
  0xcf   : > { %v305_v18 = vsel %vm298_vm7, %v288_v9, %v304_v14  ;;  %v233_v21 = vpop.permute.xlu0 %232  ;;  %v303_v22 = vsel %vm298_vm7, %v286_v61, %v302_v15  ;;  %v245_v30 = vrot.slane %v235_v20, 4 }
  0xd0   : > { %v3143_v24 = vcombine.high %v299_v17, %v303_v22  ;;  %v3145_v25 = vcombine.high %v301_v23, %v305_v18  ;;  %943 = vrot.lane.b32.xlu1 %v3418_v3, %s3361_s30  ;;  %v3142_v27 = vcombine.low %v299_v17, %v303_v22  ;;  %v3144_v28 = vcombine.low %v301_v23, %v305_v18 }
  0xd1   : > { %941 = vrot.lane.b32.xlu0 %v3409_v1, %s3361_s30  ;;  %v244_v32 = vrot.slane %v233_v21, 4 }
  0xd2   : > { %843 = vmatprep.subr.bf16.mxu0 %v3143_v24  ;;  %884 = vmatprep.subr.bf16.mxu1 %v3145_v25  ;;  %v239_v34 = vpop.permute.xlu1 %238 }
  0xd3   : > { %844 = vmatpush1.bf16.msra.mxu0 %v3142_v27  ;;  %885 = vmatpush1.bf16.msra.mxu1 %v3144_v28  ;;  %v237_v35 = vpop.permute.xlu0 %236  ;;  %v250_v1 = vsel %vm202_vm1, %v244_v32, %v245_v30  ;;  %v247_v40 = vrot.slane %v239_v34, 4 }
  0xd4   : > { %v246_v36 = vrot.slane %v237_v35, 4  ;;  %947 = vrot.lane.b32.xlu1 %v3466_v16, %s3361_s30  ;;  %v197_v16 = vrot.slane %v3518_v33, 4  ;;  %v252_v46 = vsel %vm251_vm8, %v233_v21, %v250_v1  ;;  %v2012_v35 = vld [vmem:[%s3403_s17 + $0x40] sm:$0xf] }
  0xd5   : > { %945 = vrot.lane.b32.xlu0 %v931_v29, %s3361_s30 }
  0xd6   : > { %v243_v38 = vpop.permute.xlu1 %242  ;;  %v253_v41 = vsel %vm202_vm1, %v245_v30, %v246_v36  ;;  %v203_v61 = vsel %vm202_vm1, %v196_v55, %v197_v16  ;;  %v3684_v36 = vld [vmem:[%s3403_s17 + $0x38] sm:$0xff] }
  0xd7   : > { %v241_v39 = vpop.permute.xlu0 %240  ;;  %v249_v42 = vrot.slane %v243_v38, 4  ;;  %v254_v51 = vsel %vm251_vm8, %v235_v20, %v253_v41  ;;  %v205_v12 = vsel %vm204_vm9, %v3513_v31, %v203_v61  ;;  %v3669_v20 = vld [vmem:[%s3403_s17 + $0x14] sm:$0xff] }
  0xd8   : > { %v248_v43 = vrot.slane %v241_v39, 4  ;;  %951 = vrot.lane.b32.xlu1 %v934_v37, %s3361_s30 }
  0xd9   : > { %949 = vrot.lane.b32.xlu0 %v3472_v19, %s3361_s30 }
  0xda   : > { %v257_v44 = vsel %vm202_vm1, %v248_v43, %v249_v42  ;;  %v255_v45 = vsel %vm202_vm1, %v247_v40, %v248_v43  ;;  %v191_v48 = vpop.permute.xlu1 %190 }
  0xdb   : > { %v258_v47 = vsel %vm251_vm8, %v241_v39, %v257_v44  ;;  %v189_v49 = vpop.permute.xlu0 %188  ;;  %v256_v50 = vsel %vm251_vm8, %v239_v34, %v255_v45  ;;  %v199_v62 = vrot.slane %v191_v48, 4  ;;  %v3694_v44 = vld.sshfl [vmem:[%s4207_s1 + $0x4] sm:$0x33 pattern:$0x76325410] }
  0xdc   : > { %v198_v52 = vrot.slane %v189_v49, 4  ;;  %v3139_v53 = vcombine.high %v252_v46, %v256_v50  ;;  %v3141_v54 = vcombine.high %v254_v51, %v258_v47  ;;  %1316 = vrot.lane.b32.xlu1 %v3415_v2, %s3364_s6  ;;  %v3138_v56 = vcombine.low %v252_v46, %v256_v50 }
  0xdd   : > { %1314 = vrot.lane.b32.xlu0 %v3406_v0, %s3364_s6  ;;  %v3140_v57 = vcombine.low %v254_v51, %v258_v47  ;;  %v1401_v51 = vcombine.high %v3694_v44, %v3694_v44 }
  0xde   : > { %845 = vmatprep.subr.bf16.mxu0 %v3139_v53  ;;  %886 = vmatprep.subr.bf16.mxu1 %v3141_v54  ;;  %v195_v59 = vpop.permute.xlu1 %194  ;;  %v206_v63 = vsel %vm202_vm1, %v197_v16, %v198_v52  ;;  %v1963_v53 = vld [vmem:[%s3403_s17 + $0x1c] sm:$0xf] }
  0xdf   : > { %846 = vmatpush1.bf16.msra.mxu0 %v3138_v56  ;;  %887 = vmatpush1.bf16.msra.mxu1 %v3140_v57  ;;  %v193_v60 = vpop.permute.xlu0 %192  ;;  %v201_v2 = vrot.slane %v195_v59, 4 }
  0xe0   : > { %v200_v5 = vrot.slane %v193_v60, 4  ;;  %1320 = vrot.lane.b32.xlu1 %v3424_v4, %s3364_s6  ;;  %v207_v4 = vsel %vm204_vm9, %v3518_v33, %v206_v63 }
  0xe1   : > { %1318 = vrot.lane.b32.xlu0 %v1304_v58, %s3364_s6 }
  0xe2   : > { %v210_v0 = vsel %vm202_vm1, %v200_v5, %v201_v2  ;;  %v208_v8 = vsel %vm202_vm1, %v199_v62, %v200_v5  ;;  %v564_v10 = vpop.permute.xlu1 %563 }
  0xe3   : > { %v211_v9 = vsel %vm204_vm9, %v193_v60, %v210_v0  ;;  %v562_v11 = vpop.permute.xlu0 %561  ;;  %v209_v13 = vsel %vm204_vm9, %v191_v48, %v208_v8  ;;  %v574_v31 = vrot.slane %v564_v10, 4  ;;  %v1966_v60 = vld [vmem:[%s3403_s17 + $0x40] sm:$0xf] }
  0xe4   : > { %v3135_v14 = vcombine.high %v205_v12, %v209_v13  ;;  %v3137_v15 = vcombine.high %v207_v4, %v211_v9  ;;  %1324 = vrot.lane.b32.xlu1 %v1307_v6, %s3364_s6  ;;  %v3134_v17 = vcombine.low %v205_v12, %v209_v13  ;;  %v3136_v18 = vcombine.low %v207_v4, %v211_v9  ;;  %v3729_v12 = vld [vmem:[%s3403_s17 + $0x8] sm:$0xff] }
  0xe5   : > { %1322 = vrot.lane.b32.xlu0 %v3430_v7, %s3364_s6  ;;  %v573_v21 = vrot.slane %v562_v11, 4  ;;  %v2009_v7 = vld [vmem:[%s3403_s17 + $0x1c] sm:$0xf] }
  0xe6   : > { %847 = vmatprep.subr.bf16.mxu0 %v3135_v14  ;;  %888 = vmatprep.subr.bf16.mxu1 %v3137_v15  ;;  %v568_v22 = vpop.permute.xlu1 %567 }
  0xe7   : > { %848 = vmatpush1.bf16.msra.mxu0 %v3134_v17  ;;  %889 = vmatpush1.bf16.msra.mxu1 %v3136_v18  ;;  %v566_v33 = vpop.permute.xlu0 %565  ;;  %v579_v24 = vsel %vm202_vm1, %v573_v21, %v574_v31  ;;  %v576_v28 = vrot.slane %v568_v22, 4  ;;  %v3736_v18 = vld [vmem:[%s3403_s17 + $0x2c] sm:$0xff] }
  0xe8   : > { %v575_v23 = vrot.slane %v566_v33, 4  ;;  %2021 = vrot.lane.b32.xlu1 %v3669_v20, %s3355_s22  ;;  %v581_v1 = vsel %vm580_vm10, %v562_v11, %v579_v24  ;;  %v3726_v11 = vld [vmem:[%s3403_s17 + $0x10] sm:$0xff] }
  0xe9   : > { %2019 = vrot.lane.b32.xlu0 %v3418_v3, %s3355_s22 }
  0xea   : > { %v572_v25 = vpop.permute.xlu1 %571  ;;  %v582_v29 = vsel %vm202_vm1, %v574_v31, %v575_v23  ;;  %v1917_v31 = vld [vmem:[%s3403_s17 + $0x18] sm:$0xf] }
  0xeb   : > { %v570_v27 = vpop.permute.xlu0 %569  ;;  %v578_v30 = vrot.slane %v572_v25, 4  ;;  %v583_v42 = vsel %vm580_vm10, %v564_v10, %v582_v29  ;;  %v3747_v29 = vld [vmem:[%s3403_s17 + $0x34] sm:$0xff] }
  0xec   : > { %v577_v32 = vrot.slane %v570_v27, 4  ;;  %2025 = vrot.lane.b32.xlu1 %v3472_v19, %s3355_s22 }
  0xed   : > { %2023 = vrot.lane.b32.xlu0 %v2009_v7, %s3355_s22 }
  0xee   : > { %v586_v34 = vsel %vm202_vm1, %v577_v32, %v578_v30  ;;  %v584_v37 = vsel %vm202_vm1, %v576_v28, %v577_v32  ;;  %v1271_v39 = vpop.permute.xlu1 %1270  ;;  %v1920_v28 = vld [vmem:[%s3403_s17 + $0x3c] sm:$0xf] }
  0xef   : > { %v587_v38 = vsel %vm580_vm10, %v570_v27, %v586_v34  ;;  %v1269_v40 = vpop.permute.xlu0 %1268  ;;  %v585_v41 = vsel %vm580_vm10, %v568_v22, %v584_v37  ;;  %v1281_v47 = vrot.slane %v1271_v39, 4 }
  0xf0   : > { %v3167_v43 = vcombine.high %v581_v1, %v585_v41  ;;  %v3169_v16 = vcombine.high %v583_v42, %v587_v38  ;;  %2029 = vrot.lane.b32.xlu1 %v2012_v35, %s3355_s22  ;;  %v3166_v45 = vcombine.low %v581_v1, %v585_v41  ;;  %v3168_v46 = vcombine.low %v583_v42, %v587_v38 }
  0xf1   : > { %2027 = vrot.lane.b32.xlu0 %v3684_v36, %s3355_s22  ;;  %v1280_v48 = vrot.slane %v1269_v40, 4 }
  0xf2   : > { %863 = vmatprep.subr.bf16.mxu0 %v3167_v43  ;;  %904 = vmatprep.subr.bf16.mxu1 %v3169_v16  ;;  %v1275_v49 = vpop.permute.xlu1 %1274 }
  0xf3   : > { %864 = vmatpush2.bf16.msra.mxu0 %v3166_v45  ;;  %905 = vmatpush2.bf16.msra.mxu1 %v3168_v46  ;;  %v1273_v50 = vpop.permute.xlu0 %1272  ;;  %v1286_v54 = vsel %vm202_vm1, %v1280_v48, %v1281_v47  ;;  %v1283_v57 = vrot.slane %v1275_v49, 4  ;;  %v1871_v48 = vld [vmem:[%s3403_s17 + $0x18] sm:$0xf] }
  0xf4   : > { %v1282_v52 = vrot.slane %v1273_v50, 4  ;;  %1975 = vrot.lane.b32.xlu1 %v3669_v20, %s3365_s9  ;;  %v1287_v62 = vsel %vm1007_vm11, %v1269_v40, %v1286_v54 }
  0xf5   : > { %1973 = vrot.lane.b32.xlu0 %v3418_v3, %s3365_s9 }
  0xf6   : > { %866 = vmatmul.mubr.bf16.vlgmr.msra.gmra.mxu0 %v3498_v26  ;;  %907 = vmatmul.mubr.bf16.vlgmr.msra.gmra.mxu1 %v3498_v26  ;;  %v1279_v55 = vpop.permute.xlu1 %1278  ;;  %v1288_v58 = vsel %vm202_vm1, %v1281_v47, %v1282_v52 }
  0xf7   : > { %v1277_v56 = vpop.permute.xlu0 %1276  ;;  %3211 = vmatprep.mubr.msk.bf16.mxu0 %vm829_vm0, %v1401_v51  ;;  %3212 = vmatprep.mubr.msk.bf16.mxu1 %vm829_vm0, %v1401_v51  ;;  %v1285_v59 = vrot.slane %v1279_v55, 4  ;;  %v1289_v63 = vsel %vm1007_vm11, %v1271_v39, %v1288_v58 }
  0xf8   : > { %v1284_v3 = vrot.slane %v1277_v56, 4  ;;  %1979 = vrot.lane.b32.xlu1 %v3472_v19, %s3365_s9 }
  0xf9   : > { %1977 = vrot.lane.b32.xlu0 %v1963_v53, %s3365_s9 }
  0xfa   : > { %v1292_v26 = vsel %vm202_vm1, %v1284_v3, %v1285_v59  ;;  %v1290_v61 = vsel %vm202_vm1, %v1283_v57, %v1284_v3  ;;  %v1225_v5 = vpop.permute.xlu1 %1224  ;;  %v1874_v57 = vld [vmem:[%s3403_s17 + $0x3c] sm:$0xf] }
  0xfb   : > { %v1293_v2 = vsel %vm1007_vm11, %v1277_v56, %v1292_v26  ;;  %v1223_v0 = vpop.permute.xlu0 %1222  ;;  %v1291_v6 = vsel %vm1007_vm11, %v1275_v49, %v1290_v61  ;;  %v1235_v13 = vrot.slane %v1225_v5, 4 }
  0xfc   : > { %v3205_v19 = vcombine.low %v1289_v63, %v1293_v2  ;;  %v3203_v8 = vcombine.low %v1287_v62, %v1291_v6  ;;  %1983 = vrot.lane.b32.xlu1 %v1966_v60, %s3365_s9  ;;  %v3204_v9 = vcombine.high %v1287_v62, %v1291_v6  ;;  %v3206_v10 = vcombine.high %v1289_v63, %v1293_v2 }
  0xfd   : > { %1981 = vrot.lane.b32.xlu0 %v3684_v36, %s3365_s9  ;;  %v1234_v4 = vrot.slane %v1223_v0, 4 }
  0xfe   : > { %1586 = vmatprep.subr.bf16.mxu0 %v3204_v9  ;;  %1627 = vmatprep.subr.bf16.mxu1 %v3206_v10  ;;  %v1229_v14 = vpop.permute.xlu1 %1228 }
  0xff   : > { %v1227_v15 = vpop.permute.xlu0 %1226  ;;  %1587 = vmatpush1.bf16.msra.mxu0 %v3203_v8  ;;  %1628 = vmatpush1.bf16.msra.mxu1 %v3205_v19  ;;  %v1240_v21 = vsel %vm202_vm1, %v1234_v4, %v1235_v13  ;;  %v1237_v23 = vrot.slane %v1229_v14, 4 }
 0x100   : > { %v1236_v17 = vrot.slane %v1227_v15, 4  ;;  %1929 = vrot.lane.b32.xlu1 %v3726_v11, %s3366_s10  ;;  %v1241_v32 = vsel %vm960_vm12, %v1223_v0, %v1240_v21 }
 0x101   : > { %1927 = vrot.lane.b32.xlu0 %v3729_v12, %s3366_s10 }
 0x102   : > { %v1233_v22 = vpop.permute.xlu1 %1232  ;;  %v1242_v7 = vsel %vm202_vm1, %v1235_v13, %v1236_v17  ;;  %v1825_v13 = vld [vmem:[%s3403_s17 + $0x18] sm:$0xf] }
 0x103   : > { %v1231_v33 = vpop.permute.xlu0 %1230  ;;  %v1239_v24 = vrot.slane %v1233_v22, 4  ;;  %v1243_v34 = vsel %vm960_vm12, %v1225_v5, %v1242_v7 }
 0x104   : > { %v1238_v25 = vrot.slane %v1231_v33, 4  ;;  %1933 = vrot.lane.b32.xlu1 %v3736_v18, %s3366_s10 }
 0x105   : > { %1931 = vrot.lane.b32.xlu0 %v1917_v31, %s3366_s10 }
 0x106   : > { %v1246_v27 = vsel %vm202_vm1, %v1238_v25, %v1239_v24  ;;  %v1244_v30 = vsel %vm202_vm1, %v1237_v23, %v1238_v25  ;;  %v1178_v37 = vpop.permute.xlu1 %1177  ;;  %v1828_v23 = vld [vmem:[%s3403_s17 + $0x3c] sm:$0xf] }
 0x107   : > { %v1247_v35 = vsel %vm960_vm12, %v1231_v33, %v1246_v27  ;;  %v1176_v1 = vpop.permute.xlu0 %1175  ;;  %v1245_v38 = vsel %vm960_vm12, %v1229_v14, %v1244_v30  ;;  %v1188_v43 = vrot.slane %v1178_v37, 4 }
 0x108   : > { %v3201_v39 = vcombine.low %v1243_v34, %v1247_v35  ;;  %v3199_v40 = vcombine.low %v1241_v32, %v1245_v38  ;;  %1937 = vrot.lane.b32.xlu1 %v1920_v28, %s3366_s10  ;;  %v3200_v41 = vcombine.high %v1241_v32, %v1245_v38  ;;  %v3202_v42 = vcombine.high %v1243_v34, %v1247_v35  ;;  %v3798_v38 = vld [vmem:[%s3403_s17 + $0xc] sm:$0xff] }
 0x109   : > { %1935 = vrot.lane.b32.xlu0 %v3747_v29, %s3366_s10  ;;  %v1187_v16 = vrot.slane %v1176_v1, 4 }
 0x10a   : > { %1588 = vmatprep.subr.bf16.mxu0 %v3200_v41  ;;  %1629 = vmatprep.subr.bf16.mxu1 %v3202_v42  ;;  %v1182_v45 = vpop.permute.xlu1 %1181 }
 0x10b   : > { %v1180_v46 = vpop.permute.xlu0 %1179  ;;  %1589 = vmatpush1.bf16.msra.mxu0 %v3199_v40  ;;  %1630 = vmatpush1.bf16.msra.mxu1 %v3201_v39  ;;  %v1193_v49 = vsel %vm202_vm1, %v1187_v16, %v1188_v43  ;;  %v1190_v52 = vrot.slane %v1182_v45, 4  ;;  %v3801_v39 = vld [vmem:[%s3403_s17 + $0x4] sm:$0xff] }
 0x10c   : > { %v1189_v47 = vrot.slane %v1180_v46, 4  ;;  %1883 = vrot.lane.b32.xlu1 %v3726_v11, %s3355_s22  ;;  %v1195_v59 = vsel %vm1194_vm13, %v1176_v1, %v1193_v49  ;;  %v1778_v46 = vld [vmem:[%s3403_s17 + $0x14] sm:$0xf] }
 0x10d   : > { %1881 = vrot.lane.b32.xlu0 %v3729_v12, %s3355_s22 }
 0x10e   : > { %v1186_v50 = vpop.permute.xlu1 %1185  ;;  %v1196_v53 = vsel %vm202_vm1, %v1188_v43, %v1189_v47 }
 0x10f   : > { %v1184_v51 = vpop.permute.xlu0 %1183  ;;  %v1192_v54 = vrot.slane %v1186_v50, 4  ;;  %v1197_v3 = vsel %vm1194_vm13, %v1178_v37, %v1196_v53 }
 0x110   : > { %v1191_v55 = vrot.slane %v1184_v51, 4  ;;  %1887 = vrot.lane.b32.xlu1 %v3736_v18, %s3355_s22 }
 0x111   : > { %1885 = vrot.lane.b32.xlu0 %v1871_v48, %s3355_s22 }
 0x112   : > { %v1200_v56 = vsel %vm202_vm1, %v1191_v55, %v1192_v54  ;;  %v1198_v58 = vsel %vm202_vm1, %v1190_v52, %v1191_v55  ;;  %v1132_v60 = vpop.permute.xlu1 %1131  ;;  %v1781_v55 = vld [vmem:[%s3403_s17 + $0x38] sm:$0xf] }
 0x113   : > { %v1201_v26 = vsel %vm1194_vm13, %v1184_v51, %v1200_v56  ;;  %v1130_v61 = vpop.permute.xlu0 %1129  ;;  %v1199_v62 = vsel %vm1194_vm13, %v1182_v45, %v1198_v58  ;;  %v1142_v6 = vrot.slane %v1132_v60, 4  ;;  %v3808_v45 = vld [vmem:[%s3403_s17 + $0x28] sm:$0xff]  ;;  %v3819_v56 = vld [vmem:[%s3403_s17 + $0x30] sm:$0xff] }
 0x114   : > { %v3197_v63 = vcombine.low %v1197_v3, %v1201_v26  ;;  %v3195_v2 = vcombine.low %v1195_v59, %v1199_v62  ;;  %1891 = vrot.lane.b32.xlu1 %v1874_v57, %s3355_s22  ;;  %v3196_v5 = vcombine.high %v1195_v59, %v1199_v62  ;;  %v3198_v0 = vcombine.high %v1197_v3, %v1201_v26 }
 0x115   : > { %1889 = vrot.lane.b32.xlu0 %v3747_v29, %s3355_s22  ;;  %v1141_v19 = vrot.slane %v1130_v61, 4 }
 0x116   : > { %1590 = vmatprep.subr.bf16.mxu0 %v3196_v5  ;;  %1631 = vmatprep.subr.bf16.mxu1 %v3198_v0  ;;  %v1136_v8 = vpop.permute.xlu1 %1135 }
 0x117   : > { %v1134_v9 = vpop.permute.xlu0 %1133  ;;  %1591 = vmatpush1.bf16.msra.mxu0 %v3195_v2  ;;  %1632 = vmatpush1.bf16.msra.mxu1 %v3197_v63  ;;  %v1147_v4 = vsel %vm202_vm1, %v1141_v19, %v1142_v6  ;;  %v1144_v17 = vrot.slane %v1136_v8, 4 }
 0x118   : > { %v1143_v10 = vrot.slane %v1134_v9, 4  ;;  %1837 = vrot.lane.b32.xlu1 %v3726_v11, %s3365_s9  ;;  %v1148_v24 = vsel %vm392_vm5, %v1130_v61, %v1147_v4 }
 0x119   : > { %1835 = vrot.lane.b32.xlu0 %v3729_v12, %s3365_s9 }
 0x11a   : > { %v1140_v14 = vpop.permute.xlu1 %1139  ;;  %v1149_v31 = vsel %vm202_vm1, %v1142_v6, %v1143_v10  ;;  %v1732_v10 = vld [vmem:[%s3403_s17 + $0x14] sm:$0xf] }
 0x11b   : > { %v1138_v15 = vpop.permute.xlu0 %1137  ;;  %v1146_v21 = vrot.slane %v1140_v14, 4  ;;  %v1150_v25 = vsel %vm392_vm5, %v1132_v60, %v1149_v31 }
 0x11c   : > { %v1145_v22 = vrot.slane %v1138_v15, 4  ;;  %1841 = vrot.lane.b32.xlu1 %v3736_v18, %s3365_s9 }
 0x11d   : > { %1839 = vrot.lane.b32.xlu0 %v1825_v13, %s3365_s9 }
 0x11e   : > { %v1153_v33 = vsel %vm202_vm1, %v1145_v22, %v1146_v21  ;;  %v1151_v7 = vsel %vm202_vm1, %v1144_v17, %v1145_v22  ;;  %v1085_v28 = vpop.permute.xlu1 %1084 }
 0x11f   : > { %v1154_v27 = vsel %vm392_vm5, %v1138_v15, %v1153_v33  ;;  %v1083_v30 = vpop.permute.xlu0 %1082  ;;  %v1152_v32 = vsel %vm392_vm5, %v1136_v8, %v1151_v7  ;;  %v1095_v40 = vrot.slane %v1085_v28, 4  ;;  %v1735_v33 = vld [vmem:[%s3403_s17 + $0x38] sm:$0xf] }
 0x120   : > { %v3193_v34 = vcombine.low %v1150_v25, %v1154_v27  ;;  %v3191_v35 = vcombine.low %v1148_v24, %v1152_v32  ;;  %1845 = vrot.lane.b32.xlu1 %v1828_v23, %s3365_s9  ;;  %v3192_v37 = vcombine.high %v1148_v24, %v1152_v32  ;;  %v3194_v1 = vcombine.high %v1150_v25, %v1154_v27 }
 0x121   : > { %1843 = vrot.lane.b32.xlu0 %v3747_v29, %s3365_s9  ;;  %v1094_v41 = vrot.slane %v1083_v30, 4 }
 0x122   : > { %1592 = vmatprep.subr.bf16.mxu0 %v3192_v37  ;;  %1633 = vmatprep.subr.bf16.mxu1 %v3194_v1  ;;  %v1089_v42 = vpop.permute.xlu1 %1088 }
 0x123   : > { %v1087_v43 = vpop.permute.xlu0 %1086  ;;  %1593 = vmatpush1.bf16.msra.mxu0 %v3191_v35  ;;  %1634 = vmatpush1.bf16.msra.mxu1 %v3193_v34  ;;  %v1100_v47 = vsel %vm202_vm1, %v1094_v41, %v1095_v40  ;;  %v1097_v50 = vrot.slane %v1089_v42, 4 }
 0x124   : > { %v1096_v16 = vrot.slane %v1087_v43, 4  ;;  %1790 = vrot.lane.b32.xlu1 %v3798_v38, %s3366_s10  ;;  %v1102_v58 = vsel %vm1101_vm14, %v1083_v30, %v1100_v47 }
 0x125   : > { %1788 = vrot.lane.b32.xlu0 %v3801_v39, %s3366_s10 }
 0x126   : > { %v1093_v48 = vpop.permute.xlu1 %1092  ;;  %v1103_v51 = vsel %vm202_vm1, %v1095_v40, %v1096_v16  ;;  %v1685_v16 = vld [vmem:[%s3403_s17 + $0x14] sm:$0xf] }
 0x127   : > { %v1091_v49 = vpop.permute.xlu0 %1090  ;;  %v1099_v52 = vrot.slane %v1093_v48, 4  ;;  %v1104_v59 = vsel %vm1101_vm14, %v1085_v28, %v1103_v51 }
 0x128   : > { %v1098_v53 = vrot.slane %v1091_v49, 4  ;;  %1794 = vrot.lane.b32.xlu1 %v3808_v45, %s3366_s10 }
 0x129   : > { %1792 = vrot.lane.b32.xlu0 %v1778_v46, %s3366_s10 }
 0x12a   : > { %v1107_v54 = vsel %vm202_vm1, %v1098_v53, %v1099_v52  ;;  %v1105_v57 = vsel %vm202_vm1, %v1097_v50, %v1098_v53  ;;  %v1038_v26 = vpop.permute.xlu1 %1037 }
 0x12b   : > { %v1108_v3 = vsel %vm1101_vm14, %v1091_v49, %v1107_v54  ;;  %v1036_v60 = vpop.permute.xlu0 %1035  ;;  %v1106_v61 = vsel %vm1101_vm14, %v1089_v42, %v1105_v57  ;;  %v1048_v0 = vrot.slane %v1038_v26, 4  ;;  %v1688_v54 = vld [vmem:[%s3403_s17 + $0x38] sm:$0xf] }
 0x12c   : > { %v3189_v62 = vcombine.low %v1104_v59, %v1108_v3  ;;  %v3187_v63 = vcombine.low %v1102_v58, %v1106_v61  ;;  %1798 = vrot.lane.b32.xlu1 %v1781_v55, %s3366_s10  ;;  %v3188_v2 = vcombine.high %v1102_v58, %v1106_v61  ;;  %v3190_v5 = vcombine.high %v1104_v59, %v1108_v3 }
 0x12d   : > { %1796 = vrot.lane.b32.xlu0 %v3819_v56, %s3366_s10  ;;  %v1047_v6 = vrot.slane %v1036_v60, 4 }
 0x12e   : > { %1594 = vmatprep.subr.bf16.mxu0 %v3188_v2  ;;  %1635 = vmatprep.subr.bf16.mxu1 %v3190_v5  ;;  %v1042_v19 = vpop.permute.xlu1 %1041 }
 0x12f   : > { %v1040_v8 = vpop.permute.xlu0 %1039  ;;  %1595 = vmatpush1.bf16.msra.mxu0 %v3187_v63  ;;  %1636 = vmatpush1.bf16.msra.mxu1 %v3189_v62  ;;  %v1053_v13 = vsel %vm202_vm1, %v1047_v6, %v1048_v0  ;;  %v1050_v15 = vrot.slane %v1042_v19, 4 }
 0x130   : > { %v1049_v9 = vrot.slane %v1040_v8, 4  ;;  %1744 = vrot.lane.b32.xlu1 %v3798_v38, %s3355_s22  ;;  %v1055_v7 = vsel %vm1054_vm15, %v1036_v60, %v1053_v13 }
 0x131   : > { %1742 = vrot.lane.b32.xlu0 %v3801_v39, %s3355_s22 }
 0x132   : > { %v1046_v4 = vpop.permute.xlu1 %1045  ;;  %v1056_v17 = vsel %vm202_vm1, %v1048_v0, %v1049_v9 }
 0x133   : > { %v1044_v14 = vpop.permute.xlu0 %1043  ;;  %v1052_v31 = vrot.slane %v1046_v4, 4  ;;  %v1057_v24 = vsel %vm1054_vm15, %v1038_v26, %v1056_v17  ;;  %v2058_v17 = vld [vmem:[%s3403_s17 + $0x40] sm:$0xf] }
 0x134   : > { %v1051_v21 = vrot.slane %v1044_v14, 4  ;;  %1748 = vrot.lane.b32.xlu1 %v3808_v45, %s3355_s22 }
 0x135   : > { %1746 = vrot.lane.b32.xlu0 %v1732_v10, %s3355_s22 }
 0x136   : > { %v1060_v22 = vsel %vm202_vm1, %v1051_v21, %v1052_v31  ;;  %v1058_v23 = vsel %vm202_vm1, %v1050_v15, %v1051_v21  ;;  %v991_v27 = vpop.permute.xlu1 %990 }
 0x137   : > { %v1061_v25 = vsel %vm1054_vm15, %v1044_v14, %v1060_v22  ;;  %v989_v28 = vpop.permute.xlu0 %988  ;;  %v1059_v30 = vsel %vm1054_vm15, %v1042_v19, %v1058_v23  ;;  %v1001_v1 = vrot.slane %v991_v27, 4  ;;  %v2055_v19 = vld [vmem:[%s3403_s17 + $0x1c] sm:$0xf] }
 0x138   : > { %v3185_v32 = vcombine.low %v1057_v24, %v1061_v25  ;;  %v3183_v34 = vcombine.low %v1055_v7, %v1059_v30  ;;  %1752 = vrot.lane.b32.xlu1 %v1735_v33, %s3355_s22  ;;  %v3184_v35 = vcombine.high %v1055_v7, %v1059_v30  ;;  %v3186_v37 = vcombine.high %v1057_v24, %v1061_v25 }
 0x139   : > { %1750 = vrot.lane.b32.xlu0 %v3819_v56, %s3355_s22  ;;  %v1000_v40 = vrot.slane %v989_v28, 4 }
 0x13a   : > { %1596 = vmatprep.subr.bf16.mxu0 %v3184_v35  ;;  %1637 = vmatprep.subr.bf16.mxu1 %v3186_v37  ;;  %v995_v41 = vpop.permute.xlu1 %994 }
 0x13b   : > { %v993_v42 = vpop.permute.xlu0 %992  ;;  %1597 = vmatpush1.bf16.msra.mxu0 %v3183_v34  ;;  %1638 = vmatpush1.bf16.msra.mxu1 %v3185_v32  ;;  %v1006_v46 = vsel %vm202_vm1, %v1000_v40, %v1001_v1  ;;  %v1003_v49 = vrot.slane %v995_v41, 4 }
 0x13c   : > { %v1002_v43 = vrot.slane %v993_v42, 4  ;;  %1697 = vrot.lane.b32.xlu1 %v3798_v38, %s3365_s9  ;;  %v1008_v55 = vsel %vm1007_vm11, %v989_v28, %v1006_v46  ;;  %v3890_v28 = vld [vmem:[%s3403_s17 + $0x18] sm:$0xff] }
 0x13d   : > { %1695 = vrot.lane.b32.xlu0 %v3801_v39, %s3365_s9 }
 0x13e   : > { %v999_v47 = vpop.permute.xlu1 %998  ;;  %v1009_v50 = vsel %vm202_vm1, %v1001_v1, %v1002_v43 }
 0x13f   : > { %v997_v48 = vpop.permute.xlu0 %996  ;;  %v1005_v51 = vrot.slane %v999_v47, 4  ;;  %v1010_v57 = vsel %vm1007_vm11, %v991_v27, %v1009_v50  ;;  %v3906_v50 = vld [vmem:[%s3403_s17 + $0x3c] sm:$0xff] }
 0x140   : > { %v1004_v52 = vrot.slane %v997_v48, 4  ;;  %1701 = vrot.lane.b32.xlu1 %v3808_v45, %s3365_s9 }
 0x141   : > { %1699 = vrot.lane.b32.xlu0 %v1685_v16, %s3365_s9 }
 0x142   : > { %v1013_v53 = vsel %vm202_vm1, %v1004_v52, %v1005_v51  ;;  %v1011_v39 = vsel %vm202_vm1, %v1003_v49, %v1004_v52  ;;  %v944_v59 = vpop.permute.xlu1 %943  ;;  %v2648_v49 = vld [vmem:[%s3403_s17 + $0x44] sm:$0xf] }
 0x143   : > { %v1014_v58 = vsel %vm1007_vm11, %v997_v48, %v1013_v53  ;;  %v942_v3 = vpop.permute.xlu0 %941  ;;  %v1012_v26 = vsel %vm1007_vm11, %v995_v41, %v1011_v39  ;;  %v954_v63 = vrot.slane %v944_v59, 4 }
 0x144   : > { %v3181_v60 = vcombine.low %v1010_v57, %v1014_v58  ;;  %v3179_v61 = vcombine.low %v1008_v55, %v1012_v26  ;;  %1705 = vrot.lane.b32.xlu1 %v1688_v54, %s3365_s9  ;;  %v3180_v45 = vcombine.high %v1008_v55, %v1012_v26  ;;  %v3182_v62 = vcombine.high %v1010_v57, %v1014_v58 }
 0x145   : > { %1703 = vrot.lane.b32.xlu0 %v3819_v56, %s3365_s9  ;;  %v953_v2 = vrot.slane %v942_v3, 4 }
 0x146   : > { %1598 = vmatprep.subr.bf16.mxu0 %v3180_v45  ;;  %1639 = vmatprep.subr.bf16.mxu1 %v3182_v62  ;;  %v948_v5 = vpop.permute.xlu1 %947 }
 0x147   : > { %v946_v0 = vpop.permute.xlu0 %945  ;;  %1599 = vmatpush1.bf16.msra.mxu0 %v3179_v61  ;;  %1640 = vmatpush1.bf16.msra.mxu1 %v3181_v60  ;;  %v959_v8 = vsel %vm202_vm1, %v953_v2, %v954_v63  ;;  %v956_v13 = vrot.slane %v948_v5, 4  ;;  %v3288_v60 = vcombine.high %v3890_v28, %v3906_v50  ;;  %v3287_v61 = vcombine.low %v3890_v28, %v3906_v50 }
 0x148   : > { %v955_v6 = vrot.slane %v946_v0, 4  ;;  %2067 = vrot.lane.b32.xlu1 %v3669_v20, %s3366_s10  ;;  %v961_v31 = vsel %vm960_vm12, %v942_v3, %v959_v8 }
 0x149   : > { %2065 = vrot.lane.b32.xlu0 %v3798_v38, %s3366_s10 }
 0x14a   : > { %v952_v9 = vpop.permute.xlu1 %951  ;;  %v962_v4 = vsel %vm202_vm1, %v954_v63, %v955_v6  ;;  %v2591_v6 = vld [vmem:[%s3403_s17 + $0x18] sm:$0xf] }
 0x14b   : > { %v950_v10 = vpop.permute.xlu0 %949  ;;  %v958_v14 = vrot.slane %v952_v9, 4  ;;  %v963_v21 = vsel %vm960_vm12, %v944_v59, %v962_v4  ;;  %v3915_v59 = vld.sshfl [vmem:[%s4207_s1 + $0x8] sm:$0x33 pattern:$0x76325410] }
 0x14c   : > { %v957_v15 = vrot.slane %v950_v10, 4  ;;  %2071 = vrot.lane.b32.xlu1 %v3819_v56, %s3366_s10  ;;  %v2152_v63 = vcombine.high %v3915_v59, %v3915_v59 }
 0x14d   : > { %2069 = vrot.lane.b32.xlu0 %v2055_v19, %s3366_s10 }
 0x14e   : > { %v966_v20 = vsel %vm202_vm1, %v957_v15, %v958_v14  ;;  %v964_v38 = vsel %vm202_vm1, %v956_v13, %v957_v15  ;;  %v1317_v33 = vpop.permute.xlu1 %1316 }
 0x14f   : > { %v967_v22 = vsel %vm960_vm12, %v950_v10, %v966_v20  ;;  %v1315_v23 = vpop.permute.xlu0 %1314  ;;  %v965_v7 = vsel %vm960_vm12, %v948_v5, %v964_v38  ;;  %v1327_v35 = vrot.slane %v1317_v33, 4  ;;  %v2594_v20 = vld [vmem:[%s3403_s17 + $0x3c] sm:$0xf] }
 0x150   : > { %v3177_v24 = vcombine.low %v963_v21, %v967_v22  ;;  %v3175_v56 = vcombine.low %v961_v31, %v965_v7  ;;  %2075 = vrot.lane.b32.xlu1 %v2058_v17, %s3366_s10  ;;  %v3176_v25 = vcombine.high %v961_v31, %v965_v7  ;;  %v3178_v27 = vcombine.high %v963_v21, %v967_v22 }
 0x151   : > { %2073 = vrot.lane.b32.xlu0 %v3684_v36, %s3366_s10  ;;  %v1326_v37 = vrot.slane %v1315_v23, 4  ;;  %v2645_v36 = vld [vmem:[%s3403_s17 + $0x20] sm:$0xf] }
 0x152   : > { %1600 = vmatprep.subr.bf16.mxu0 %v3176_v25  ;;  %1641 = vmatprep.subr.bf16.mxu1 %v3178_v27  ;;  %v1321_v30 = vpop.permute.xlu1 %1320 }
 0x153   : > { %v1319_v32 = vpop.permute.xlu0 %1318  ;;  %1601 = vmatpush1.bf16.msra.mxu0 %v3175_v56  ;;  %1642 = vmatpush1.bf16.msra.mxu1 %v3177_v24  ;;  %v1329_v41 = vrot.slane %v1321_v30, 4  ;;  %v1332_v46 = vsel %vm202_vm1, %v1326_v37, %v1327_v35 }
 0x154   : > { %v1328_v34 = vrot.slane %v1319_v32, 4  ;;  %2657 = vrot.lane.b32.xlu1 %v3890_v28, %s3355_s22  ;;  %v1333_v55 = vsel %vm1054_vm15, %v1315_v23, %v1332_v46 }
 0x155   : > { %2655 = vrot.lane.b32.xlu0 %v3726_v11, %s3355_s22 }
 0x156   : > { %v1325_v1 = vpop.permute.xlu1 %1324  ;;  %v1334_v42 = vsel %vm202_vm1, %v1327_v35, %v1328_v34  ;;  %v2545_v35 = vld [vmem:[%s3403_s17 + $0x18] sm:$0xf] }
 0x157   : > { %v1323_v40 = vpop.permute.xlu0 %1322  ;;  %v1331_v43 = vrot.slane %v1325_v1, 4  ;;  %v1335_v51 = vsel %vm1054_vm15, %v1317_v33, %v1334_v42 }
 0x158   : > { %v1330_v16 = vrot.slane %v1323_v40, 4  ;;  %2661 = vrot.lane.b32.xlu1 %v3747_v29, %s3355_s22 }
 0x159   : > { %2659 = vrot.lane.b32.xlu0 %v2645_v36, %s3355_s22 }
 0x15a   : > { %v1336_v47 = vsel %vm202_vm1, %v1329_v41, %v1330_v16  ;;  %v1338_v48 = vsel %vm202_vm1, %v1330_v16, %v1331_v43  ;;  %v2022_v53 = vpop.permute.xlu1 %2021  ;;  %v3368_v43 = vmov 0  }
 0x15b   : > { %v1339_v52 = vsel %vm1054_vm15, %v1323_v40, %v1338_v48  ;;  %v2020_v54 = vpop.permute.xlu0 %2019  ;;  %v1337_v39 = vsel %vm1054_vm15, %v1321_v30, %v1336_v47  ;;  %v2032_v5 = vrot.slane %v2022_v53, 4  ;;  %3331 = vset.pattern.permute.xlu0 %v3368_v43  ;;  %3332 = vset.pattern.permute.xlu1 %v3368_v43  ;;  %v2548_v48 = vld [vmem:[%s3403_s17 + $0x3c] sm:$0xf] }
 0x15c   : > { %v3209_v57 = vcombine.low %v1335_v51, %v1339_v52  ;;  %v3210_v58 = vcombine.high %v1335_v51, %v1339_v52  ;;  %2665 = vrot.lane.b32.xlu1 %v2648_v49, %s3355_s22  ;;  %v3207_v3 = vcombine.low %v1333_v55, %v1337_v39  ;;  %v3208_v26 = vcombine.high %v1333_v55, %v1337_v39 }
 0x15d   : > { %2663 = vrot.lane.b32.xlu0 %v3906_v50, %s3355_s22  ;;  %v2031_v0 = vrot.slane %v2020_v54, 4 }
 0x15e   : > { %1657 = vmatprep.subr.bf16.mxu1 %v3210_v58  ;;  %1616 = vmatprep.subr.bf16.mxu0 %v3208_v26  ;;  %v2026_v45 = vpop.permute.xlu1 %2025  ;;  %v3971_v26 = vld [vmem:[%s3403_s17] sm:$0xff] }
 0x15f   : > { %1658 = vmatpush2.bf16.msra.mxu1 %v3209_v57  ;;  %v2024_v62 = vpop.permute.xlu0 %2023  ;;  %1617 = vmatpush2.bf16.msra.mxu0 %v3207_v3  ;;  %v2034_v9 = vrot.slane %v2026_v45, 4  ;;  %v2037_v14 = vsel %vm202_vm1, %v2031_v0, %v2032_v5  ;;  %v3978_v0 = vld [vmem:[%s3403_s17 + $0x24] sm:$0xff] }
 0x160   : > { %v2033_v2 = vrot.slane %v2024_v62, 4  ;;  %2603 = vrot.lane.b32.xlu1 %v3726_v11, %s3367_s15  ;;  %v2038_v33 = vsel %vm392_vm5, %v2020_v54, %v2037_v14 }
 0x161   : > { %2601 = vrot.lane.b32.xlu0 %v3729_v12, %s3367_s15 }
 0x162   : > { %1660 = vmatmul.mubr.bf16.vlgmr.msra.gmra.mxu1 %v3694_v44  ;;  %v2030_v19 = vpop.permute.xlu1 %2029  ;;  %1619 = vmatmul.mubr.bf16.vlgmr.msra.gmra.mxu0 %v3694_v44  ;;  %v2039_v10 = vsel %vm202_vm1, %v2032_v5, %v2033_v2 }
 0x163   : > { %v2028_v8 = vpop.permute.xlu0 %2027  ;;  %3255 = vmatprep.mubr.msk.bf16.mxu1 %vm829_vm0, %v2152_v63  ;;  %v2036_v13 = vrot.slane %v2030_v19, 4  ;;  %3254 = vmatprep.mubr.msk.bf16.mxu0 %vm829_vm0, %v2152_v63  ;;  %v2040_v17 = vsel %vm392_vm5, %v2022_v53, %v2039_v10 }
 0x164   : > { %v2035_v4 = vrot.slane %v2028_v8, 4  ;;  %2607 = vrot.lane.b32.xlu1 %v3736_v18, %s3367_s15 }
 0x165   : > { %2605 = vrot.lane.b32.xlu0 %v2591_v6, %s3367_s15  ;;  %v2490_v6 = vld [vmem:[%s3403_s17 + $0x10] sm:$0xf] }
 0x166   : > { %v2041_v15 = vsel %vm202_vm1, %v2034_v9, %v2035_v4  ;;  %v2043_v44 = vsel %vm202_vm1, %v2035_v4, %v2036_v13  ;;  %v1976_v31 = vpop.permute.xlu1 %1975 }
 0x167   : > { %v2044_v38 = vsel %vm392_vm5, %v2028_v8, %v2043_v44  ;;  %v1974_v21 = vpop.permute.xlu0 %1973  ;;  %v2042_v22 = vsel %vm392_vm5, %v2026_v45, %v2041_v15  ;;  %v1986_v32 = vrot.slane %v1976_v31, 4 }
 0x168   : > { %v3248_v23 = vcombine.low %v2040_v17, %v2044_v38  ;;  %v3249_v7 = vcombine.high %v2040_v17, %v2044_v38  ;;  %2611 = vrot.lane.b32.xlu1 %v2594_v20, %s3367_s15  ;;  %v3246_v24 = vcombine.low %v2038_v33, %v2042_v22  ;;  %v3247_v56 = vcombine.high %v2038_v33, %v2042_v22  ;;  %v2493_v20 = vld [vmem:[%s3403_s17 + $0x34] sm:$0xf] }
 0x169   : > { %2609 = vrot.lane.b32.xlu0 %v3747_v29, %s3367_s15  ;;  %v1985_v34 = vrot.slane %v1974_v21, 4 }
 0x16a   : > { %2378 = vmatprep.subr.bf16.mxu1 %v3249_v7  ;;  %2337 = vmatprep.subr.bf16.mxu0 %v3247_v56  ;;  %v1980_v25 = vpop.permute.xlu1 %1979 }
 0x16b   : > { %2379 = vmatpush1.bf16.msra.mxu1 %v3248_v23  ;;  %v1978_v27 = vpop.permute.xlu0 %1977  ;;  %2338 = vmatpush1.bf16.msra.mxu0 %v3246_v24  ;;  %v1988_v1 = vrot.slane %v1980_v25, 4  ;;  %v1991_v16 = vsel %vm202_vm1, %v1985_v34, %v1986_v32 }
 0x16c   : > { %v1987_v30 = vrot.slane %v1978_v27, 4  ;;  %2557 = vrot.lane.b32.xlu1 %v3726_v11, %s3355_s22  ;;  %v1992_v39 = vsel %vm1714_vm2, %v1974_v21, %v1991_v16 }
 0x16d   : > { %2555 = vrot.lane.b32.xlu0 %v3729_v12, %s3355_s22 }
 0x16e   : > { %v1984_v37 = vpop.permute.xlu1 %1983  ;;  %v1993_v40 = vsel %vm202_vm1, %v1986_v32, %v1987_v30 }
 0x16f   : > { %v1982_v36 = vpop.permute.xlu0 %1981  ;;  %v1990_v41 = vrot.slane %v1984_v37, 4  ;;  %v1994_v49 = vsel %vm1714_vm2, %v1976_v31, %v1993_v40 }
 0x170   : > { %v1989_v42 = vrot.slane %v1982_v36, 4  ;;  %2561 = vrot.lane.b32.xlu1 %v3736_v18, %s3355_s22 }
 0x171   : > { %2559 = vrot.lane.b32.xlu0 %v2545_v35, %s3355_s22  ;;  %v2444_v35 = vld [vmem:[%s3403_s17 + $0x10] sm:$0xf] }
 0x172   : > { %v1995_v46 = vsel %vm202_vm1, %v1988_v1, %v1989_v42  ;;  %v1997_v47 = vsel %vm202_vm1, %v1989_v42, %v1990_v41  ;;  %v1930_v52 = vpop.permute.xlu1 %1929 }
 0x173   : > { %v1998_v51 = vsel %vm1714_vm2, %v1982_v36, %v1997_v47  ;;  %v1928_v53 = vpop.permute.xlu0 %1927  ;;  %v1996_v54 = vsel %vm1714_vm2, %v1980_v25, %v1995_v46  ;;  %v1940_v2 = vrot.slane %v1930_v52, 4  ;;  %v2447_v46 = vld [vmem:[%s3403_s17 + $0x34] sm:$0xf] }
 0x174   : > { %v3244_v55 = vcombine.low %v1994_v49, %v1998_v51  ;;  %v3245_v57 = vcombine.high %v1994_v49, %v1998_v51  ;;  %2565 = vrot.lane.b32.xlu1 %v2548_v48, %s3355_s22  ;;  %v3242_v58 = vcombine.low %v1992_v39, %v1996_v54  ;;  %v3243_v3 = vcombine.high %v1992_v39, %v1996_v54 }
 0x175   : > { %2563 = vrot.lane.b32.xlu0 %v3747_v29, %s3355_s22  ;;  %v1939_v5 = vrot.slane %v1928_v53, 4 }
 0x176   : > { %2380 = vmatprep.subr.bf16.mxu1 %v3245_v57  ;;  %2339 = vmatprep.subr.bf16.mxu0 %v3243_v3  ;;  %v1934_v45 = vpop.permute.xlu1 %1933  ;;  %v3261_v3 = vcombine.low %v3971_v26, %v3978_v0 }
 0x177   : > { %2381 = vmatpush1.bf16.msra.mxu1 %v3244_v55  ;;  %v1932_v62 = vpop.permute.xlu0 %1931  ;;  %2340 = vmatpush1.bf16.msra.mxu0 %v3242_v58  ;;  %v1942_v9 = vrot.slane %v1934_v45, 4  ;;  %v1945_v14 = vsel %vm202_vm1, %v1939_v5, %v1940_v2  ;;  %v3262_v58 = vcombine.high %v3971_v26, %v3978_v0 }
 0x178   : > { %v1941_v63 = vrot.slane %v1932_v62, 4  ;;  %2502 = vrot.lane.b32.xlu1 %v3729_v12, %s3367_s15  ;;  %v1946_v33 = vsel %vm1807_vm3, %v1928_v53, %v1945_v14 }
 0x179   : > { %2500 = vrot.lane.b32.xlu0 %v3971_v26, %s3367_s15 }
 0x17a   : > { %v1938_v19 = vpop.permute.xlu1 %1937  ;;  %v1947_v10 = vsel %vm202_vm1, %v1940_v2, %v1941_v63 }
 0x17b   : > { %v1936_v8 = vpop.permute.xlu0 %1935  ;;  %v1944_v13 = vrot.slane %v1938_v19, 4  ;;  %v1948_v17 = vsel %vm1807_vm3, %v1930_v52, %v1947_v10 }
 0x17c   : > { %v1943_v4 = vrot.slane %v1936_v8, 4  ;;  %2506 = vrot.lane.b32.xlu1 %v3978_v0, %s3367_s15 }
 0x17d   : > { %2504 = vrot.lane.b32.xlu0 %v2490_v6, %s3367_s15 }
 0x17e   : > { %v1949_v15 = vsel %vm202_vm1, %v1942_v9, %v1943_v4  ;;  %v1951_v44 = vsel %vm202_vm1, %v1943_v4, %v1944_v13  ;;  %v1884_v31 = vpop.permute.xlu1 %1883 }
 0x17f   : > { %v1952_v38 = vsel %vm1807_vm3, %v1936_v8, %v1951_v44  ;;  %v1882_v21 = vpop.permute.xlu0 %1881  ;;  %v1950_v22 = vsel %vm1807_vm3, %v1934_v45, %v1949_v15  ;;  %v1894_v32 = vrot.slane %v1884_v31, 4 }
 0x180   : > { %v3240_v23 = vcombine.low %v1948_v17, %v1952_v38  ;;  %v3241_v7 = vcombine.high %v1948_v17, %v1952_v38  ;;  %2510 = vrot.lane.b32.xlu1 %v2493_v20, %s3367_s15  ;;  %v3238_v24 = vcombine.low %v1946_v33, %v1950_v22  ;;  %v3239_v56 = vcombine.high %v1946_v33, %v1950_v22 }
 0x181   : > { %2508 = vrot.lane.b32.xlu0 %v3736_v18, %s3367_s15  ;;  %v1893_v34 = vrot.slane %v1882_v21, 4 }
 0x182   : > { %2382 = vmatprep.subr.bf16.mxu1 %v3241_v7  ;;  %2341 = vmatprep.subr.bf16.mxu0 %v3239_v56  ;;  %v1888_v25 = vpop.permute.xlu1 %1887  ;;  %v633_v7 = vld [vmem:[%s4208_s2] sm:$0xf] }
 0x183   : > { %2383 = vmatpush1.bf16.msra.mxu1 %v3240_v23  ;;  %v1886_v27 = vpop.permute.xlu0 %1885  ;;  %2342 = vmatpush1.bf16.msra.mxu0 %v3238_v24  ;;  %v1896_v1 = vrot.slane %v1888_v25, 4  ;;  %v1899_v43 = vsel %vm202_vm1, %v1893_v34, %v1894_v32  ;;  %v3173_v24 = vld [vmem:[%s4208_s2 + $0x4] sm:$0xf]  ;;  %v3216_v34 = vld [vmem:[%s4208_s2 + $0x8] sm:$0xf] }
 0x184   : > { %v1895_v30 = vrot.slane %v1886_v27, 4  ;;  %2456 = vrot.lane.b32.xlu1 %v3729_v12, %s3355_s22  ;;  %v1900_v53 = vsel %vm392_vm5, %v1882_v21, %v1899_v43 }
 0x185   : > { %2454 = vrot.lane.b32.xlu0 %v3971_v26, %s3355_s22 }
 0x186   : > { %v1892_v37 = vpop.permute.xlu1 %1891  ;;  %v1901_v40 = vsel %vm202_vm1, %v1894_v32, %v1895_v30 }
 0x187   : > { %v1890_v36 = vpop.permute.xlu0 %1889  ;;  %v1898_v41 = vrot.slane %v1892_v37, 4  ;;  %v1902_v47 = vsel %vm392_vm5, %v1884_v31, %v1901_v40 }
 0x188   : > { %v1897_v42 = vrot.slane %v1890_v36, 4  ;;  %2460 = vrot.lane.b32.xlu1 %v3978_v0, %s3355_s22 }
 0x189   : > { %2458 = vrot.lane.b32.xlu0 %v2444_v35, %s3355_s22  ;;  %v3259_v35 = vld [vmem:[%s4208_s2 + $0xc] sm:$0xf] }
 0x18a   : > { %v1903_v12 = vsel %vm202_vm1, %v1896_v1, %v1897_v42  ;;  %v1905_v16 = vsel %vm202_vm1, %v1897_v42, %v1898_v41  ;;  %v1838_v49 = vpop.permute.xlu1 %1837 }
 0x18b   : > { %v1906_v48 = vsel %vm392_vm5, %v1890_v36, %v1905_v16  ;;  %v1836_v51 = vpop.permute.xlu0 %1835  ;;  %v1904_v52 = vsel %vm392_vm5, %v1888_v25, %v1903_v12  ;;  %v1848_v2 = vrot.slane %v1838_v49, 4 }
 0x18c   : > { %v3236_v54 = vcombine.low %v1902_v47, %v1906_v48  ;;  %v3237_v39 = vcombine.high %v1902_v47, %v1906_v48  ;;  %2464 = vrot.lane.b32.xlu1 %v2447_v46, %s3355_s22  ;;  %v3234_v55 = vcombine.low %v1900_v53, %v1904_v52  ;;  %v3235_v57 = vcombine.high %v1900_v53, %v1904_v52 }
 0x18d   : > { %2462 = vrot.lane.b32.xlu0 %v3736_v18, %s3355_s22  ;;  %v1847_v5 = vrot.slane %v1836_v51, 4  ;;  %v2691_v18 = vld [vmem:[%s3403_s17 + $0x20] sm:$0xf] }
 0x18e   : > { %2384 = vmatprep.subr.bf16.mxu1 %v3237_v39  ;;  %2343 = vmatprep.subr.bf16.mxu0 %v3235_v57  ;;  %v1842_v45 = vpop.permute.xlu1 %1841 }
 0x18f   : > { %2385 = vmatpush1.bf16.msra.mxu1 %v3236_v54  ;;  %v1840_v62 = vpop.permute.xlu0 %1839  ;;  %2344 = vmatpush1.bf16.msra.mxu0 %v3234_v55  ;;  %v1850_v8 = vrot.slane %v1842_v45, 4  ;;  %v1853_v4 = vsel %vm202_vm1, %v1847_v5, %v1848_v2 }
 0x190   : > { %v1849_v63 = vrot.slane %v1840_v62, 4  ;;  %2703 = vrot.lane.b32.xlu1 %v3890_v28, %s3367_s15  ;;  %v1854_v21 = vsel %vm1714_vm2, %v1836_v51, %v1853_v4 }
 0x191   : > { %2701 = vrot.lane.b32.xlu0 %v3726_v11, %s3367_s15  ;;  %v2694_v11 = vld [vmem:[%s3403_s17 + $0x44] sm:$0xf] }
 0x192   : > { %v1846_v6 = vpop.permute.xlu1 %1845  ;;  %v1855_v9 = vsel %vm202_vm1, %v1848_v2, %v1849_v63 }
 0x193   : > { %v1844_v19 = vpop.permute.xlu0 %1843  ;;  %v1852_v10 = vrot.slane %v1846_v6, 4  ;;  %v1856_v44 = vsel %vm1714_vm2, %v1838_v49, %v1855_v9 }
 0x194   : > { %v1851_v13 = vrot.slane %v1844_v19, 4  ;;  %2707 = vrot.lane.b32.xlu1 %v3747_v29, %s3367_s15 }
 0x195   : > { %2705 = vrot.lane.b32.xlu0 %v2691_v18, %s3367_s15 }
 0x196   : > { %v1857_v14 = vsel %vm202_vm1, %v1850_v8, %v1851_v13  ;;  %v1859_v15 = vsel %vm202_vm1, %v1851_v13, %v1852_v10  ;;  %v1791_v17 = vpop.permute.xlu1 %1790 }
 0x197   : > { %v1860_v20 = vsel %vm1714_vm2, %v1844_v19, %v1859_v15  ;;  %v1789_v38 = vpop.permute.xlu0 %1788  ;;  %v1858_v31 = vsel %vm1714_vm2, %v1842_v45, %v1857_v14  ;;  %v1801_v30 = vrot.slane %v1791_v17, 4 }
 0x198   : > { %v3232_v22 = vcombine.low %v1856_v44, %v1860_v20  ;;  %v3233_v33 = vcombine.high %v1856_v44, %v1860_v20  ;;  %2711 = vrot.lane.b32.xlu1 %v2694_v11, %s3367_s15  ;;  %v3230_v29 = vcombine.low %v1854_v21, %v1858_v31  ;;  %v3231_v23 = vcombine.high %v1854_v21, %v1858_v31 }
 0x199   : > { %2709 = vrot.lane.b32.xlu0 %v3906_v50, %s3367_s15  ;;  %v1800_v32 = vrot.slane %v1789_v38, 4 }
 0x19a   : > { %2386 = vmatprep.subr.bf16.mxu1 %v3233_v33  ;;  %2345 = vmatprep.subr.bf16.mxu0 %v3231_v23  ;;  %v1795_v56 = vpop.permute.xlu1 %1794 }
 0x19b   : > { %2387 = vmatpush1.bf16.msra.mxu1 %v3232_v22  ;;  %v1793_v25 = vpop.permute.xlu0 %1792  ;;  %2346 = vmatpush1.bf16.msra.mxu0 %v3230_v29  ;;  %v1803_v1 = vrot.slane %v1795_v56, 4  ;;  %v1806_v43 = vsel %vm202_vm1, %v1800_v32, %v1801_v30 }
 0x19c   : > { %v1802_v27 = vrot.slane %v1793_v25, 4  ;;  %1390 = vperm.xlu1 %3332, %v3173_v24   ;;  %v1808_v52 = vsel %vm1807_vm3, %v1789_v38, %v1806_v43 }
 0x19d   : > { %636 = vperm.xlu0 %3331, %v633_v7  }
 0x19e   : > { %v1799_v37 = vpop.permute.xlu1 %1798  ;;  %v1809_v40 = vsel %vm202_vm1, %v1801_v30, %v1802_v27 }
 0x19f   : > { %v1797_v36 = vpop.permute.xlu0 %1796  ;;  %v1805_v41 = vrot.slane %v1799_v37, 4  ;;  %v1810_v46 = vsel %vm1807_vm3, %v1791_v17, %v1809_v40 }
 0x1a0   : > { %v1804_v42 = vrot.slane %v1797_v36, 4  ;;  %2141 = vperm.xlu1 %3332, %v3216_v34  }
 0x1a1   : > { %2777 = vperm.xlu0 %3331, %v3259_v35  }
 0x1a2   : > { %v1811_v12 = vsel %vm202_vm1, %v1803_v1, %v1804_v42  ;;  %v1813_v16 = vsel %vm202_vm1, %v1804_v42, %v1805_v41  ;;  %v1745_v48 = vpop.permute.xlu1 %1744 }
 0x1a3   : > { %v1814_v47 = vsel %vm1807_vm3, %v1797_v36, %v1813_v16  ;;  %v1743_v49 = vpop.permute.xlu0 %1742  ;;  %v1812_v51 = vsel %vm1807_vm3, %v1795_v56, %v1811_v12  ;;  %v1755_v63 = vrot.slane %v1745_v48, 4 }
 0x1a4   : > { %v3228_v53 = vcombine.low %v1810_v46, %v1814_v47  ;;  %v3229_v54 = vcombine.high %v1810_v46, %v1814_v47  ;;  %v3226_v39 = vcombine.low %v1808_v52, %v1812_v51  ;;  %v3227_v55 = vcombine.high %v1808_v52, %v1812_v51 }
 0x1a5   : > { %v1754_v2 = vrot.slane %v1743_v49, 4 }
 0x1a6   : > { %2388 = vmatprep.subr.bf16.mxu1 %v3229_v54  ;;  %2347 = vmatprep.subr.bf16.mxu0 %v3227_v55  ;;  %v1749_v57 = vpop.permute.xlu1 %1748 }
 0x1a7   : > { %2389 = vmatpush1.bf16.msra.mxu1 %v3228_v53  ;;  %v1747_v45 = vpop.permute.xlu0 %1746  ;;  %2348 = vmatpush1.bf16.msra.mxu0 %v3226_v39  ;;  %v1757_v6 = vrot.slane %v1749_v57, 4  ;;  %v1760_v10 = vsel %vm202_vm1, %v1754_v2, %v1755_v63 }
 0x1a8   : > { %v1756_v62 = vrot.slane %v1747_v45, 4  ;;  %v1761_v17 = vsel %vm392_vm5, %v1743_v49, %v1760_v10 }
 0x1aa   : > { %v1753_v5 = vpop.permute.xlu1 %1752  ;;  %v1762_v19 = vsel %vm202_vm1, %v1755_v63, %v1756_v62 }
 0x1ab   : > { %v1751_v18 = vpop.permute.xlu0 %1750  ;;  %v1759_v8 = vrot.slane %v1753_v5, 4  ;;  %v1763_v14 = vsel %vm392_vm5, %v1745_v48, %v1762_v19 }
 0x1ac   : > { %v1758_v9 = vrot.slane %v1751_v18, 4 }
 0x1ae   : > { %v1764_v13 = vsel %vm202_vm1, %v1757_v6, %v1758_v9  ;;  %v1766_v4 = vsel %vm202_vm1, %v1758_v9, %v1759_v8  ;;  %v1698_v11 = vpop.permute.xlu1 %1697 }
 0x1af   : > { %v1767_v15 = vsel %vm392_vm5, %v1751_v18, %v1766_v4  ;;  %v1696_v44 = vpop.permute.xlu0 %1695  ;;  %v1765_v20 = vsel %vm392_vm5, %v1749_v57, %v1764_v13  ;;  %v1708_v7 = vrot.slane %v1698_v11, 4 }
 0x1b0   : > { %v3224_v38 = vcombine.low %v1763_v14, %v1767_v15  ;;  %v3225_v31 = vcombine.high %v1763_v14, %v1767_v15  ;;  %v3222_v21 = vcombine.low %v1761_v17, %v1765_v20  ;;  %v3223_v22 = vcombine.high %v1761_v17, %v1765_v20 }
 0x1b1   : > { %v1707_v24 = vrot.slane %v1696_v44, 4 }
 0x1b2   : > { %2390 = vmatprep.subr.bf16.mxu1 %v3225_v31  ;;  %2349 = vmatprep.subr.bf16.mxu0 %v3223_v22  ;;  %v1702_v33 = vpop.permute.xlu1 %1701  ;;  %v4095_v22 = vld.sshfl [vmem:[%s4207_s1 + $0xc] sm:$0x33 pattern:$0x76325410] }
 0x1b3   : > { %2391 = vmatpush1.bf16.msra.mxu1 %v3224_v38  ;;  %v1700_v29 = vpop.permute.xlu0 %1699  ;;  %2350 = vmatpush1.bf16.msra.mxu0 %v3222_v21  ;;  %v1710_v32 = vrot.slane %v1702_v33, 4  ;;  %v1713_v40 = vsel %vm202_vm1, %v1707_v24, %v1708_v7  ;;  %v2788_v24 = vcombine.high %v4095_v22, %v4095_v22 }
 0x1b4   : > { %v1709_v23 = vrot.slane %v1700_v29, 4  ;;  %v1715_v51 = vsel %vm1714_vm2, %v1696_v44, %v1713_v40 }
 0x1b6   : > { %v4068_v56 = vpop.f32.mrf.mxu0  ;;  %v4070_v25 = vpop.f32.mrf.mxu1  ;;  %v1716_v34 = vsel %vm202_vm1, %v1708_v7, %v1709_v23 }
 0x1b7   : > { %v1706_v27 = vpop.permute.xlu1 %1705  ;;  %v1704_v30 = vpop.permute.xlu0 %1703  ;;  %v1717_v16 = vsel %vm1714_vm2, %v1698_v11, %v1716_v34 }
 0x1b8   : > { %v1712_v35 = vrot.slane %v1706_v27, 4  ;;  %v1711_v37 = vrot.slane %v1704_v30, 4  ;;  %v4073_v36 = vpop.f32.mrf.mxu0  ;;  %v4075_v1 = vpop.f32.mrf.mxu1 }
 0x1ba   : > { %v1718_v41 = vsel %vm202_vm1, %v1710_v32, %v1711_v37  ;;  %v1720_v42 = vsel %vm202_vm1, %v1711_v37, %v1712_v35  ;;  %v871_v43 = vpop.f32.mrf.mxu0  ;;  %v912_v12 = vpop.f32.mrf.mxu1 }
 0x1bb   : > { %v1721_v46 = vsel %vm1714_vm2, %v1704_v30, %v1720_v42  ;;  %v2068_v47 = vpop.permute.xlu1 %2067  ;;  %v2066_v48 = vpop.permute.xlu0 %2065  ;;  %v1719_v49 = vsel %vm1714_vm2, %v1702_v33, %v1718_v41 }
 0x1bc   : > { %v3220_v52 = vcombine.low %v1717_v16, %v1721_v46  ;;  %v3221_v53 = vcombine.high %v1717_v16, %v1721_v46  ;;  %v872_v54 = vpop.f32.mrf.mxu0  ;;  %v913_v39 = vpop.f32.mrf.mxu1  ;;  %v3218_v55 = vcombine.low %v1715_v51, %v1719_v49  ;;  %v3219_v57 = vcombine.high %v1715_v51, %v1719_v49 }
 0x1bd   : > { %v2078_v2 = vrot.slane %v2068_v47, 4  ;;  %v2077_v5 = vrot.slane %v2066_v48, 4 }
 0x1be   : > { %2392 = vmatprep.subr.bf16.mxu1 %v3221_v53  ;;  %2351 = vmatprep.subr.bf16.mxu0 %v3219_v57 }
 0x1bf   : > { %v2072_v45 = vpop.permute.xlu1 %2071  ;;  %2393 = vmatpush1.bf16.msra.mxu1 %v3220_v52  ;;  %v2070_v62 = vpop.permute.xlu0 %2069  ;;  %2352 = vmatpush1.bf16.msra.mxu0 %v3218_v55  ;;  %v2083_v13 = vsel %vm202_vm1, %v2077_v5, %v2078_v2  ;;  %v4112_v55 = vld [vmem:[%s3403_s17 + $0x14] ss:$36 sps:$4 sm:$0xff]  }
 0x1c0   : > { %v2079_v63 = vrot.slane %v2070_v62, 4  ;;  %v2080_v19 = vrot.slane %v2072_v45, 4  ;;  %v2084_v38 = vsel %vm1807_vm3, %v2066_v48, %v2083_v13 }
 0x1c2   : > { %v2085_v8 = vsel %vm202_vm1, %v2078_v2, %v2079_v63  ;;  %v4115_v63 = vld [vmem:[%s3403_s17 + $0x10] ss:$36 sps:$4 sm:$0xff]  }
 0x1c3   : > { %v2076_v18 = vpop.permute.xlu1 %2075  ;;  %v2074_v6 = vpop.permute.xlu0 %2073  ;;  %v2086_v15 = vsel %vm1807_vm3, %v2068_v47, %v2085_v8 }
 0x1c4   : > { %v2082_v9 = vrot.slane %v2076_v18, 4  ;;  %v2081_v10 = vrot.slane %v2074_v6, 4 }
 0x1c6   : > { %v2087_v4 = vsel %vm202_vm1, %v2080_v19, %v2081_v10  ;;  %v2089_v14 = vsel %vm202_vm1, %v2081_v10, %v2082_v9 }
 0x1c7   : > { %v2090_v11 = vsel %vm1807_vm3, %v2074_v6, %v2089_v14  ;;  %v2658_v44 = vpop.permute.xlu1 %2657  ;;  %v2656_v20 = vpop.permute.xlu0 %2655  ;;  %v2088_v17 = vsel %vm1807_vm3, %v2072_v45, %v2087_v4 }
 0x1c8   : > { %v3252_v31 = vcombine.low %v2086_v15, %v2090_v11  ;;  %v3253_v21 = vcombine.high %v2086_v15, %v2090_v11  ;;  %v3250_v33 = vcombine.low %v2084_v38, %v2088_v17  ;;  %v3251_v29 = vcombine.high %v2084_v38, %v2088_v17 }
 0x1c9   : > { %v2668_v30 = vrot.slane %v2658_v44, 4  ;;  %v2667_v32 = vrot.slane %v2656_v20, 4 }
 0x1ca   : > { %2408 = vmatprep.subr.bf16.mxu1 %v3253_v21  ;;  %2367 = vmatprep.subr.bf16.mxu0 %v3251_v29 }
 0x1cb   : > { %v2662_v23 = vpop.permute.xlu1 %2661  ;;  %2409 = vmatpush2.bf16.msra.mxu1 %v3252_v31  ;;  %v2660_v7 = vpop.permute.xlu0 %2659  ;;  %2368 = vmatpush2.bf16.msra.mxu0 %v3250_v33  ;;  %v2673_v43 = vsel %vm202_vm1, %v2667_v32, %v2668_v30 }
 0x1cc   : > { %v2669_v27 = vrot.slane %v2660_v7, 4  ;;  %v2670_v37 = vrot.slane %v2662_v23, 4  ;;  %v2674_v51 = vsel %vm392_vm5, %v2656_v20, %v2673_v43 }
 0x1ce   : > { %2411 = vmatmul.mubr.bf16.vlgmr.msra.gmra.mxu1 %v3915_v59  ;;  %2370 = vmatmul.mubr.bf16.vlgmr.msra.gmra.mxu0 %v3915_v59  ;;  %v2675_v40 = vsel %vm202_vm1, %v2668_v30, %v2669_v27 }
 0x1cf   : > { %v2666_v34 = vpop.permute.xlu1 %2665  ;;  %v2664_v35 = vpop.permute.xlu0 %2663  ;;  %3298 = vmatprep.mubr.msk.bf16.mxu1 %vm829_vm0, %v2788_v24  ;;  %3297 = vmatprep.mubr.msk.bf16.mxu0 %vm829_vm0, %v2788_v24  ;;  %v2676_v46 = vsel %vm392_vm5, %v2658_v44, %v2675_v40  ;;  %vm2519_vm0 = vcmask 916480  }
 0x1d0   : > { %v2672_v41 = vrot.slane %v2666_v34, 4  ;;  %v2671_v42 = vrot.slane %v2664_v35, 4 }
 0x1d2   : > { %v2677_v12 = vsel %vm202_vm1, %v2670_v37, %v2671_v42  ;;  %v2679_v16 = vsel %vm202_vm1, %v2671_v42, %v2672_v41 }
 0x1d3   : > { %v2680_v59 = vsel %vm392_vm5, %v2664_v35, %v2679_v16  ;;  %v2604_v47 = vpop.permute.xlu1 %2603  ;;  %v2602_v48 = vpop.permute.xlu0 %2601  ;;  %v2678_v49 = vsel %vm392_vm5, %v2662_v23, %v2677_v12 }
 0x1d4   : > { %v3291_v52 = vcombine.low %v2676_v46, %v2680_v59  ;;  %v3292_v53 = vcombine.high %v2676_v46, %v2680_v59  ;;  %v3289_v54 = vcombine.low %v2674_v51, %v2678_v49  ;;  %v3290_v39 = vcombine.high %v2674_v51, %v2678_v49  ;;  %v4142_v51 = vld [vmem:[%s3403_s17 + $0xc] ss:$36 sps:$4 sm:$0xff]  }
 0x1d5   : > { %v2614_v2 = vrot.slane %v2604_v47, 4  ;;  %v2613_v5 = vrot.slane %v2602_v48, 4 }
 0x1d6   : > { %3014 = vmatprep.subr.bf16.mxu1 %v3292_v53  ;;  %2973 = vmatprep.subr.bf16.mxu0 %v3290_v39  ;;  %v4145_v39 = vld [vmem:[%s3403_s17 + $0x8] ss:$36 sps:$4 sm:$0xff]   ;;  %s3303_s17 = sshll.u32 %s4211_s13, 6 }
 0x1d7   : > { %v2608_v57 = vpop.permute.xlu1 %2607  ;;  %3015 = vmatpush1.bf16.msra.mxu1 %v3291_v52  ;;  %v2606_v45 = vpop.permute.xlu0 %2605  ;;  %2974 = vmatpush1.bf16.msra.mxu0 %v3289_v54  ;;  %s4193_s29 = scalar_lea.vmem %s4209_s3, %s3303_s17 }
 0x1d8   : > { %v2615_v62 = vrot.slane %v2606_v45, 4  ;;  %3016 = vmatprep.subr.bf16.mxu1 %v3288_v60  ;;  %2975 = vmatprep.subr.bf16.mxu0 %v4112_v55  ;;  %v2616_v19 = vrot.slane %v2608_v57, 4  ;;  %v2619_v60 = vsel %vm202_vm1, %v2613_v5, %v2614_v2 }
 0x1d9   : > { %v2620_v11 = vsel %vm2519_vm0, %v2602_v48, %v2619_v60 }
 0x1da   : > { %v2621_v8 = vsel %vm202_vm1, %v2614_v2, %v2615_v62 }
 0x1db   : > { %v2612_v18 = vpop.permute.xlu1 %2611  ;;  %v2610_v6 = vpop.permute.xlu0 %2609  ;;  %3017 = vmatpush1.bf16.msra.mxu1 %v3287_v61  ;;  %2976 = vmatpush1.bf16.msra.mxu0 %v4115_v63  ;;  %v2622_v14 = vsel %vm2519_vm0, %v2604_v47, %v2621_v8 }
 0x1dc   : > { %v2618_v9 = vrot.slane %v2612_v18, 4  ;;  %v2617_v10 = vrot.slane %v2610_v6, 4 }
 0x1de   : > { %v2623_v13 = vsel %vm202_vm1, %v2616_v19, %v2617_v10  ;;  %v2625_v4 = vsel %vm202_vm1, %v2617_v10, %v2618_v9 }
 0x1df   : > { %v2626_v15 = vsel %vm2519_vm0, %v2610_v6, %v2625_v4  ;;  %v2558_v28 = vpop.permute.xlu1 %2557  ;;  %v2556_v50 = vpop.permute.xlu0 %2555  ;;  %v2624_v61 = vsel %vm2519_vm0, %v2608_v57, %v2623_v13 }
 0x1e0   : > { %v3283_v44 = vcombine.low %v2622_v14, %v2626_v15  ;;  %v3284_v20 = vcombine.high %v2622_v14, %v2626_v15  ;;  %v3281_v17 = vcombine.low %v2620_v11, %v2624_v61  ;;  %v3282_v38 = vcombine.high %v2620_v11, %v2624_v61 }
 0x1e1   : > { %v2568_v29 = vrot.slane %v2558_v28, 4  ;;  %v2567_v23 = vrot.slane %v2556_v50, 4 }
 0x1e2   : > { %3018 = vmatprep.subr.bf16.mxu1 %v3284_v20  ;;  %2977 = vmatprep.subr.bf16.mxu0 %v3282_v38 }
 0x1e3   : > { %v2562_v31 = vpop.permute.xlu1 %2561  ;;  %3019 = vmatpush1.bf16.msra.mxu1 %v3283_v44  ;;  %v2560_v21 = vpop.permute.xlu0 %2559  ;;  %2978 = vmatpush1.bf16.msra.mxu0 %v3281_v17  ;;  %v2573_v35 = vsel %vm202_vm1, %v2567_v23, %v2568_v29 }
 0x1e4   : > { %v2569_v33 = vrot.slane %v2560_v21, 4  ;;  %v2570_v27 = vrot.slane %v2562_v31, 4  ;;  %v2574_v46 = vsel %vm392_vm5, %v2556_v50, %v2573_v35 }
 0x1e6   : > { %v2575_v30 = vsel %vm202_vm1, %v2568_v29, %v2569_v33 }
 0x1e7   : > { %v2566_v7 = vpop.permute.xlu1 %2565  ;;  %v2564_v24 = vpop.permute.xlu0 %2563  ;;  %v2576_v41 = vsel %vm392_vm5, %v2558_v28, %v2575_v30 }
 0x1e8   : > { %v2572_v32 = vrot.slane %v2566_v7, 4  ;;  %v2571_v34 = vrot.slane %v2564_v24, 4 }
 0x1ea   : > { %v2577_v37 = vsel %vm202_vm1, %v2570_v27, %v2571_v34  ;;  %v2579_v40 = vsel %vm202_vm1, %v2571_v34, %v2572_v32 }
 0x1eb   : > { %v2580_v42 = vsel %vm392_vm5, %v2564_v24, %v2579_v40  ;;  %v2503_v43 = vpop.permute.xlu1 %2502  ;;  %v2501_v12 = vpop.permute.xlu0 %2500  ;;  %v2578_v16 = vsel %vm392_vm5, %v2562_v31, %v2577_v37 }
 0x1ec   : > { %v3279_v59 = vcombine.low %v2576_v41, %v2580_v42  ;;  %v3280_v47 = vcombine.high %v2576_v41, %v2580_v42  ;;  %v3277_v48 = vcombine.low %v2574_v46, %v2578_v16  ;;  %v3278_v49 = vcombine.high %v2574_v46, %v2578_v16 }
 0x1ed   : > { %v2513_v57 = vrot.slane %v2503_v43, 4  ;;  %v2512_v45 = vrot.slane %v2501_v12, 4 }
 0x1ee   : > { %3020 = vmatprep.subr.bf16.mxu1 %v3280_v47  ;;  %2979 = vmatprep.subr.bf16.mxu0 %v3278_v49 }
 0x1ef   : > { %v2507_v52 = vpop.permute.xlu1 %2506  ;;  %3021 = vmatpush1.bf16.msra.mxu1 %v3279_v59  ;;  %v2505_v53 = vpop.permute.xlu0 %2504  ;;  %2980 = vmatpush1.bf16.msra.mxu0 %v3277_v48  ;;  %v2518_v8 = vsel %vm202_vm1, %v2512_v45, %v2513_v57 }
 0x1f0   : > { %v2514_v54 = vrot.slane %v2505_v53, 4  ;;  %3022 = vmatprep.subr.bf16.mxu1 %v4112_v55  ;;  %2981 = vmatprep.subr.bf16.mxu0 %v4142_v51  ;;  %v2515_v5 = vrot.slane %v2507_v52, 4  ;;  %v2520_v14 = vsel %vm2519_vm0, %v2501_v12, %v2518_v8 }
 0x1f2   : > { %v2521_v18 = vsel %vm202_vm1, %v2513_v57, %v2514_v54 }
 0x1f3   : > { %v2511_v62 = vpop.permute.xlu1 %2510  ;;  %v2509_v2 = vpop.permute.xlu0 %2508  ;;  %3023 = vmatpush1.bf16.msra.mxu1 %v4115_v63  ;;  %2982 = vmatpush1.bf16.msra.mxu0 %v4145_v39  ;;  %v2522_v10 = vsel %vm2519_vm0, %v2503_v43, %v2521_v18 }
 0x1f4   : > { %v2517_v6 = vrot.slane %v2511_v62, 4  ;;  %v2516_v19 = vrot.slane %v2509_v2, 4 }
 0x1f6   : > { %v2523_v9 = vsel %vm202_vm1, %v2515_v5, %v2516_v19  ;;  %v2525_v55 = vsel %vm202_vm1, %v2516_v19, %v2517_v6 }
 0x1f7   : > { %v2526_v60 = vsel %vm2519_vm0, %v2509_v2, %v2525_v55  ;;  %v2457_v13 = vpop.permute.xlu1 %2456  ;;  %v2455_v4 = vpop.permute.xlu0 %2454  ;;  %v2524_v63 = vsel %vm2519_vm0, %v2507_v52, %v2523_v9 }
 0x1f8   : > { %v3271_v15 = vcombine.low %v2522_v10, %v2526_v60  ;;  %v3272_v28 = vcombine.high %v2522_v10, %v2526_v60  ;;  %v3269_v50 = vcombine.low %v2520_v14, %v2524_v63  ;;  %v3270_v61 = vcombine.high %v2520_v14, %v2524_v63 }
 0x1f9   : > { %v2467_v17 = vrot.slane %v2457_v13, 4  ;;  %v2466_v38 = vrot.slane %v2455_v4, 4 }
 0x1fa   : > { %3024 = vmatprep.subr.bf16.mxu1 %v3272_v28  ;;  %2983 = vmatprep.subr.bf16.mxu0 %v3270_v61 }
 0x1fb   : > { %v2461_v11 = vpop.permute.xlu1 %2460  ;;  %3025 = vmatpush1.bf16.msra.mxu1 %v3271_v15  ;;  %v2459_v44 = vpop.permute.xlu0 %2458  ;;  %2984 = vmatpush1.bf16.msra.mxu0 %v3269_v50  ;;  %v2472_v24 = vsel %vm202_vm1, %v2466_v38, %v2467_v17 }
 0x1fc   : > { %v2468_v20 = vrot.slane %v2459_v44, 4  ;;  %v2469_v33 = vrot.slane %v2461_v11, 4  ;;  %v2473_v41 = vsel %vm392_vm5, %v2455_v4, %v2472_v24 }
 0x1fe   : > { %v2474_v29 = vsel %vm202_vm1, %v2467_v17, %v2468_v20 }
 0x1ff   : > { %v2465_v31 = vpop.permute.xlu1 %2464  ;;  %v2463_v21 = vpop.permute.xlu0 %2462  ;;  %v2475_v32 = vsel %vm392_vm5, %v2457_v13, %v2474_v29 }
 0x200   : > { %v2471_v23 = vrot.slane %v2465_v31, 4  ;;  %v2470_v7 = vrot.slane %v2463_v21, 4 }
 0x202   : > { %v2476_v27 = vsel %vm202_vm1, %v2469_v33, %v2470_v7  ;;  %v2478_v30 = vsel %vm202_vm1, %v2470_v7, %v2471_v23 }
 0x203   : > { %v2479_v34 = vsel %vm392_vm5, %v2463_v21, %v2478_v30  ;;  %v2704_v35 = vpop.permute.xlu1 %2703  ;;  %v2702_v37 = vpop.permute.xlu0 %2701  ;;  %v2477_v40 = vsel %vm392_vm5, %v2461_v11, %v2476_v27 }
 0x204   : > { %v3267_v42 = vcombine.low %v2475_v32, %v2479_v34  ;;  %v3268_v43 = vcombine.high %v2475_v32, %v2479_v34  ;;  %v3265_v12 = vcombine.low %v2473_v41, %v2477_v40  ;;  %v3266_v16 = vcombine.high %v2473_v41, %v2477_v40 }
 0x205   : > { %v2714_v46 = vrot.slane %v2704_v35, 4  ;;  %v2713_v59 = vrot.slane %v2702_v37, 4 }
 0x206   : > { %3026 = vmatprep.subr.bf16.mxu1 %v3268_v43  ;;  %2985 = vmatprep.subr.bf16.mxu0 %v3266_v16 }
 0x207   : > { %v2708_v47 = vpop.permute.xlu1 %2707  ;;  %3027 = vmatpush1.bf16.msra.mxu1 %v3267_v42  ;;  %v2706_v48 = vpop.permute.xlu0 %2705  ;;  %2986 = vmatpush1.bf16.msra.mxu0 %v3265_v12  ;;  %v2719_v52 = vsel %vm202_vm1, %v2713_v59, %v2714_v46 }
 0x208   : > { %v2715_v49 = vrot.slane %v2706_v48, 4  ;;  %3028 = vmatprep.subr.bf16.mxu1 %v4142_v51  ;;  %2987 = vmatprep.subr.bf16.mxu0 %v3262_v58  ;;  %v2716_v57 = vrot.slane %v2708_v47, 4  ;;  %v2720_v58 = vsel %vm2519_vm0, %v2702_v37, %v2719_v52 }
 0x20a   : > { %v2721_v45 = vsel %vm202_vm1, %v2714_v46, %v2715_v49 }
 0x20b   : > { %v2712_v53 = vpop.permute.xlu1 %2711  ;;  %v2710_v54 = vpop.permute.xlu0 %2709  ;;  %3029 = vmatpush1.bf16.msra.mxu1 %v4145_v39  ;;  %2988 = vmatpush1.bf16.msra.mxu0 %v3261_v3  ;;  %v2722_v18 = vsel %vm2519_vm0, %v2704_v35, %v2721_v45 }
 0x20c   : > { %v2718_v62 = vrot.slane %v2712_v53, 4  ;;  %v2717_v2 = vrot.slane %v2710_v54, 4 }
 0x20e   : > { %v2723_v51 = vsel %vm202_vm1, %v2716_v57, %v2717_v2  ;;  %v2725_v5 = vsel %vm202_vm1, %v2717_v2, %v2718_v62 }
 0x20f   : > { %v2726_v39 = vsel %vm2519_vm0, %v2710_v54, %v2725_v5  ;;  %v2724_v6 = vsel %vm2519_vm0, %v2708_v47, %v2723_v51 }
 0x210   : > { %v3295_v19 = vcombine.low %v2722_v18, %v2726_v39  ;;  %v3296_v8 = vcombine.high %v2722_v18, %v2726_v39  ;;  %v3293_v9 = vcombine.low %v2720_v58, %v2724_v6  ;;  %v3294_v55 = vcombine.high %v2720_v58, %v2724_v6 }
 0x212   : > { %3003 = vmatprep.subr.bf16.mxu0 %v3294_v55  ;;  %3044 = vmatprep.subr.bf16.mxu1 %v3296_v8 }
 0x213   : > { %3004 = vmatpush2.bf16.msra.mxu0 %v3293_v9  ;;  %3045 = vmatpush2.bf16.msra.mxu1 %v3295_v19 }
 0x216   : > { %3006 = vmatmul.mubr.bf16.vlgmr.msra.gmra.mxu0 %v4095_v22  ;;  %3047 = vmatmul.mubr.bf16.vlgmr.msra.gmra.mxu1 %v4095_v22 }
 0x218   : > { %v637_v26 = vpop.permute.xlu0 %636 }
 0x219   : > { %v868_v0 = vadd.f32 %v4068_v56, %v637_v26  ;;  %v870_v3 = vadd.f32 %v4073_v36, %v637_v26  ;;  %v909_v10 = vadd.f32 %v4070_v25, %v637_v26  ;;  %v911_v60 = vadd.f32 %v4075_v1, %v637_v26  ;;  %v1391_v56 = vpop.permute.xlu1 %1390 }
 0x21b   : > { %v915_v13 = vmax.f32 %v868_v0, 0.0  ;;  %v916_v4 = vmax.f32 %v870_v3, 0.0  ;;  %v917_v63 = vmax.f32 %v909_v10, 0.0  ;;  %v918_v14 = vmax.f32 %v911_v60, 0.0 }
 0x21c   : > { %v2778_v54 = vpop.permute.xlu0 %2777 }
 0x21d   : > { %v923_v22 = vcombine.low %v915_v13, %v916_v4  ;;  %v924_v15 = vcombine.low %v917_v63, %v918_v14  ;;  %v2142_v27 = vpop.permute.xlu1 %2141 }
 0x21f   : > { %927 = vst [vmem:[%s4193_s29] sm:$0xff] %v923_v22  ;;  %928 = vst [vmem:[%s4193_s29 + $0x8] sm:$0xff] %v924_v15 }
 0x222   : > { %v1661_v36 = vpop.f32.mrf.mxu1  ;;  %v1620_v25 = vpop.f32.mrf.mxu0 }
 0x223   : > { %v1662_v28 = vadd.f32 %v1661_v36, %v1391_v56  ;;  %v1621_v50 = vadd.f32 %v1620_v25, %v1391_v56 }
 0x224   : > { %v1663_v1 = vpop.f32.mrf.mxu1  ;;  %v1622_v61 = vpop.f32.mrf.mxu0 }
 0x225   : > { %v1664_v11 = vadd.f32 %v1663_v1, %v1391_v56  ;;  %v1670_v44 = vmax.f32 %v1662_v28, 0.0  ;;  %v1623_v17 = vadd.f32 %v1622_v61, %v1391_v56  ;;  %v1668_v38 = vmax.f32 %v1621_v50, 0.0 }
 0x226   : > { %v1665_v20 = vpop.f32.mrf.mxu1  ;;  %v1624_v31 = vpop.f32.mrf.mxu0 }
 0x227   : > { %v1671_v21 = vmax.f32 %v1664_v11, 0.0  ;;  %v1669_v33 = vmax.f32 %v1623_v17, 0.0 }
 0x228   : > { %v1666_v29 = vpop.f32.mrf.mxu1  ;;  %v1625_v7 = vpop.f32.mrf.mxu0 }
 0x229   : > { %v1677_v23 = vcombine.low %v1670_v44, %v1671_v21  ;;  %v1676_v24 = vcombine.low %v1668_v38, %v1669_v33 }
 0x22b   : > { %3214 = vst [vmem:[%s4193_s29 + $0x18] sm:$0xff] %v1677_v23  ;;  %3213 = vst [vmem:[%s4193_s29 + $0x10] sm:$0xff] %v1676_v24 }
 0x28e   : > { %v2412_v30 = vpop.f32.mrf.mxu1  ;;  %v2371_v32 = vpop.f32.mrf.mxu0 }
 0x28f   : > { %v2413_v34 = vadd.f32 %v2412_v30, %v2142_v27  ;;  %v2372_v37 = vadd.f32 %v2371_v32, %v2142_v27 }
 0x290   : > { %v2414_v35 = vpop.f32.mrf.mxu1  ;;  %v2373_v40 = vpop.f32.mrf.mxu0 }
 0x291   : > { %v2415_v41 = vadd.f32 %v2414_v35, %v2142_v27  ;;  %v2421_v42 = vmax.f32 %v2413_v34, 0.0  ;;  %v2374_v12 = vadd.f32 %v2373_v40, %v2142_v27  ;;  %v2419_v16 = vmax.f32 %v2372_v37, 0.0 }
 0x292   : > { %v2416_v43 = vpop.f32.mrf.mxu1  ;;  %v2375_v46 = vpop.f32.mrf.mxu0 }
 0x293   : > { %v2422_v59 = vmax.f32 %v2415_v41, 0.0  ;;  %v2420_v47 = vmax.f32 %v2374_v12, 0.0 }
 0x294   : > { %v2417_v48 = vpop.f32.mrf.mxu1  ;;  %v2376_v52 = vpop.f32.mrf.mxu0 }
 0x295   : > { %v2428_v49 = vcombine.low %v2421_v42, %v2422_v59  ;;  %v2427_v53 = vcombine.low %v2419_v16, %v2420_v47 }
 0x297   : > { %3257 = vst [vmem:[%s4193_s29 + $0x28] sm:$0xff] %v2428_v49  ;;  %3256 = vst [vmem:[%s4193_s29 + $0x20] sm:$0xff] %v2427_v53 }
 0x2d6   : > { %v3007_v57 = vpop.f32.mrf.mxu0  ;;  %v3048_v45 = vpop.f32.mrf.mxu1 }
 0x2d7   : > { %v3008_v62 = vadd.f32 %v3007_v57, %v2778_v54  ;;  %v3049_v2 = vadd.f32 %v3048_v45, %v2778_v54 }
 0x2d8   : > { %v3009_v51 = vpop.f32.mrf.mxu0  ;;  %v3050_v5 = vpop.f32.mrf.mxu1 }
 0x2d9   : > { %v3010_v58 = vadd.f32 %v3009_v51, %v2778_v54  ;;  %v3051_v18 = vadd.f32 %v3050_v5, %v2778_v54  ;;  %v3055_v19 = vmax.f32 %v3008_v62, 0.0  ;;  %v3057_v8 = vmax.f32 %v3049_v2, 0.0 }
 0x2da   : > { %v3011_v39 = vpop.f32.mrf.mxu0  ;;  %v3052_v6 = vpop.f32.mrf.mxu1 }
 0x2db   : > { %v3056_v9 = vmax.f32 %v3010_v58, 0.0  ;;  %v3058_v55 = vmax.f32 %v3051_v18, 0.0 }
 0x2dc   : > { %v3012_v26 = vpop.f32.mrf.mxu0  ;;  %v3053_v0 = vpop.f32.mrf.mxu1 }
 0x2dd   : > { %v3063_v3 = vcombine.low %v3055_v19, %v3056_v9  ;;  %v3064_v10 = vcombine.low %v3057_v8, %v3058_v55 }
 0x2df   : > { %3299 = vst [vmem:[%s4193_s29 + $0x30] sm:$0xff] %v3063_v3  ;;  %3300 = vst [vmem:[%s4193_s29 + $0x38] sm:$0xff] %v3064_v10 }
 0x2e0 PF: > { %s13_s12 = sadd.s32 1, %s3349_s12  }
 0x2e1   : > { %p10_p4 = scmp.ge.s32.totalorder %s13_s12, 4  }
 0x2e3   :  { %12 = sbr.rel (!%p10_p4) target bundleno = 1 (0x1), region = 71 }

</bundles_post_ra>
